<compile_context>
chip_gen: v7x
topology: tpu7x:2x2x1
jax: 0.10.0
libtpu: 0.0.40
codegen_flags: <defaults>
</compile_context>

<pallas_src>
import math
import functools

import jax
import jax.numpy as jnp
from jax.experimental import pallas as pl
from jax.experimental.pallas import tpu as pltpu


def _round_up(x, m):
    return (x + m - 1) // m * m


def _pick_div(p, cands=(512, 384, 256, 128)):
    for c in cands:
        if p % c == 0:
            return c
    return 128


_VMEM_LIMIT = 32 * 1024 * 1024  # safe on v5e / v6e / v7x


# ----------------------------------------------------------------------------
# Pallas kernels
# ----------------------------------------------------------------------------

def _mm_kernel(x_ref, w_ref, b_ref, o_ref, acc_ref, *, act, scale):
    """K-tiled matmul: bf16 inputs, f32 accumulator, fused bias + activation."""
    k = pl.program_id(2)

    @pl.when(k == 0)
    def _():
        acc_ref[...] = jnp.zeros_like(acc_ref)

    acc_ref[...] += jnp.dot(x_ref[...], w_ref[...],
                            preferred_element_type=jnp.float32)

    @pl.when(k == pl.num_programs(2) - 1)
    def _():
        acc = acc_ref[...] * scale + b_ref[...]
        if act == "relu":
            acc = jnp.maximum(acc, 0.0)
        elif act == "sigmoid":
            acc = jax.nn.sigmoid(acc)
        elif act == "tanh":
            acc = jnp.tanh(acc)
        o_ref[...] = acc


def _mm_gru_kernel(x_ref, w_ref, b_ref, h_ref, z_ref, o_ref, acc_ref, *, scale):
    """Same as _mm_kernel, but the epilogue is the fused GRU gate update:
    o = (1 - z) * h + z * tanh(x @ w + b)."""
    k = pl.program_id(2)

    @pl.when(k == 0)
    def _():
        acc_ref[...] = jnp.zeros_like(acc_ref)

    acc_ref[...] += jnp.dot(x_ref[...], w_ref[...],
                            preferred_element_type=jnp.float32)

    @pl.when(k == pl.num_programs(2) - 1)
    def _():
        q = jnp.tanh(acc_ref[...] * scale + b_ref[...])
        z = z_ref[...]
        o_ref[...] = (1.0 - z) * h_ref[...] + z * q


def _corr_kernel(f1_ref, f2_ref, o_ref, *, scale):
    """All-pairs correlation tile: (tm, C) x (tn, C)^T contracted in-kernel."""
    a = f1_ref[0]                                   # (tm, C) bf16
    b = f2_ref[0]                                   # (tn, C) bf16
    acc = jax.lax.dot_general(a, b, (((1,), (1,)), ((), ())),
                              preferred_element_type=jnp.float32)
    o_ref[0] = acc * scale


# ----------------------------------------------------------------------------
# GEMM wrapper (weights pre-packed / padded / bf16-cast once at init)
# ----------------------------------------------------------------------------

def gemm(x, gw, act="none", scale=1.0, extra=None):
    """o = act(scale * (x @ W) + b); act == 'gru' fuses (1-z)*h + z*tanh(.)."""
    M, K = x.shape
    assert K == gw["K"], (K, gw["K"])
    Kp, Np, N = gw["Kp"], gw["Np"], gw["N"]

    bm = min(256, _round_up(M, 8))
    Mp = _round_up(M, bm)
    bk = _pick_div(Kp)
    bn = Np if Np <= 512 else _pick_div(Np)

    xb = x.astype(jnp.bfloat16)
    if (Mp, Kp) != (M, K):
        xb = jnp.pad(xb, ((0, Mp - M), (0, Kp - K)))

    grid = (Mp // bm, Np // bn, Kp // bk)
    in_specs = [
        pl.BlockSpec((bm, bk), lambda i, j, k: (i, k)),
        pl.BlockSpec((bk, bn), lambda i, j, k: (k, j)),
        pl.BlockSpec((1, bn), lambda i, j, k: (0, j)),
    ]
    args = [xb, gw["w"], gw["b"]]

    if act == "gru":
        h2d, z2d = extra
        hp = h2d.astype(jnp.float32)
        zp = z2d.astype(jnp.float32)
        if (Mp, Np) != (M, N):
            hp = jnp.pad(hp, ((0, Mp - M), (0, Np - N)))
            zp = jnp.pad(zp, ((0, Mp - M), (0, Np - N)))
        in_specs += [pl.BlockSpec((bm, bn), lambda i, j, k: (i, j)),
                     pl.BlockSpec((bm, bn), lambda i, j, k: (i, j))]
        args += [hp, zp]
        kernel = functools.partial(_mm_gru_kernel, scale=float(scale))
    else:
        kernel = functools.partial(_mm_kernel, act=act, scale=float(scale))

    out = pl.pallas_call(
        kernel,
        out_shape=jax.ShapeDtypeStruct((Mp, Np), jnp.float32),
        grid_spec=pltpu.PrefetchScalarGridSpec(
            num_scalar_prefetch=0,
            grid=grid,
            in_specs=in_specs,
            out_specs=pl.BlockSpec((bm, bn), lambda i, j, k: (i, j)),
            scratch_shapes=[pltpu.VMEM((bm, bn), jnp.float32)]),
        compiler_params=pltpu.CompilerParams(
            dimension_semantics=("parallel", "parallel", "arbitrary"),
            vmem_limit_bytes=_VMEM_LIMIT),
    )(*args)

    if (Mp, Np) != (M, N):
        out = out[:M, :N]
    return out


# ----------------------------------------------------------------------------
# Conv via im2col (XLA glue) + the Pallas GEMM
# ----------------------------------------------------------------------------
# TODO(synk): the im2col patch matrix is still materialized by XLA (kh*kw HBM
# inflation); true in-kernel tap accumulation needs element-offset blocks or
# manual halo DMA and is left for a follow-up.

def _im2col(x, kh, kw, padding):
    B, H, W, Cin = x.shape
    ph, pw = padding
    assert 2 * ph == kh - 1 and 2 * pw == kw - 1
    if kh == 1 and kw == 1:
        return x.reshape(B * H * W, Cin)
    xp = jnp.pad(x, ((0, 0), (ph, ph), (pw, pw), (0, 0)))
    cols = [xp[:, i:i + H, j:j + W, :] for i in range(kh) for j in range(kw)]
    return jnp.concatenate(cols, axis=-1).reshape(B * H * W, kh * kw * Cin)


def conv2d(x, gw, act="none", padding=(0, 0)):
    B, H, W, _ = x.shape
    kh, kw = gw["ksize"]
    patches = _im2col(x, kh, kw, padding)
    out = gemm(patches, gw, act=act)
    return out.reshape(B, H, W, gw["N"])


def conv2d_gru(x, gw, padding, h2d, z2d):
    """q conv with the GRU gate update fused into the epilogue; returns new h2d."""
    B, H, W, _ = x.shape
    kh, kw = gw["ksize"]
    patches = _im2col(x, kh, kw, padding)
    return gemm(patches, gw, act="gru", extra=(h2d, z2d))


# ----------------------------------------------------------------------------
# Correlation volume (CorrBlock)
# ----------------------------------------------------------------------------

def corr_volume(f1, f2, scale):
    """f1, f2: (B, hw, C) -> (B, hw, hw) = scale * f1 @ f2^T (batched, Pallas)."""
    B, hw, C = f1.shape
    t = min(128, _round_up(hw, 8))
    hwp = _round_up(hw, t)

    f1b = f1.astype(jnp.bfloat16)
    f2b = f2.astype(jnp.bfloat16)
    if hwp != hw:
        f1b = jnp.pad(f1b, ((0, 0), (0, hwp - hw), (0, 0)))
        f2b = jnp.pad(f2b, ((0, 0), (0, hwp - hw), (0, 0)))

    grid = (B, hwp // t, hwp // t)
    out = pl.pallas_call(
        functools.partial(_corr_kernel, scale=float(scale)),
        out_shape=jax.ShapeDtypeStruct((B, hwp, hwp), jnp.float32),
        grid_spec=pltpu.PrefetchScalarGridSpec(
            num_scalar_prefetch=0,
            grid=grid,
            in_specs=[pl.BlockSpec((1, t, C), lambda b, i, j: (b, i, 0)),
                      pl.BlockSpec((1, t, C), lambda b, i, j: (b, j, 0))],
            out_specs=pl.BlockSpec((1, t, t), lambda b, i, j: (b, i, j))),
        compiler_params=pltpu.CompilerParams(
            dimension_semantics=("parallel", "parallel", "parallel"),
            vmem_limit_bytes=_VMEM_LIMIT),
    )(f1b, f2b)

    if hwp != hw:
        out = out[:, :hw, :hw]
    return out


def _bilinear_sample_zeros(vol, px, py):
    """vol: (B,h1,w1,h2,w2); px/py broadcastable (B,h1,w1,D,D) pixel coords.
    Bilinear sample with zero padding (torch grid_sample, align_corners=True)."""
    # TODO(synk): XLA gather; at real resolutions this should become a Pallas
    # kernel (scalar-prefetched integer coords + pl.ds row loads).
    B, h1, w1, h2, w2 = vol.shape
    x0 = jnp.floor(px)
    y0 = jnp.floor(py)
    x1 = x0 + 1.0
    y1 = y0 + 1.0
    wx1 = px - x0
    wx0 = 1.0 - wx1
    wy1 = py - y0
    wy0 = 1.0 - wy1

    bidx = jnp.arange(B)[:, None, None, None, None]
    yy = jnp.arange(h1)[None, :, None, None, None]
    xx = jnp.arange(w1)[None, None, :, None, None]

    def gather(xi, yi):
        valid = (xi >= 0) & (xi <= w2 - 1) & (yi >= 0) & (yi <= h2 - 1)
        xc = jnp.clip(xi, 0, w2 - 1).astype(jnp.int32)
        yc = jnp.clip(yi, 0, h2 - 1).astype(jnp.int32)
        v = vol[bidx, yy, xx, yc, xc]
        return jnp.where(valid, v, 0.0)

    return (gather(x0, y0) * wx0 * wy0 + gather(x1, y0) * wx1 * wy0 +
            gather(x0, y1) * wx0 * wy1 + gather(x1, y1) * wx1 * wy1)


class CorrBlockJax:
    def __init__(self, fmap1, fmap2, num_levels, radius):
        # fmap1 / fmap2: (B, h, w, C) NHWC
        B, h, w, C = fmap1.shape
        assert h % (2 ** (num_levels - 1)) == 0 and w % (2 ** (num_levels - 1)) == 0, \
            "feature map size must be divisible by 2**(corr_levels-1)"
        self.num_levels = num_levels
        self.radius = radius
        corr = corr_volume(fmap1.reshape(B, h * w, C),
                           fmap2.reshape(B, h * w, C),
                           1.0 / math.sqrt(C)).reshape(B, h, w, h, w)
        self.pyramid = [corr]
        for _ in range(1, num_levels):
            B_, h1, w1, h2, w2 = corr.shape
            corr = corr.reshape(B_, h1, w1, h2 // 2, 2, w2 // 2, 2).mean(axis=(4, 6))
            self.pyramid.append(corr)

    def __call__(self, coords):
        # coords: (B, 2, h, w) NCHW; channel 0 = x, channel 1 = y.
        r = self.radius
        B, _, h, w = coords.shape
        cx = coords[:, 0]
        cy = coords[:, 1]
        dx = jnp.linspace(-r, r, 2 * r + 1, dtype=jnp.float32)
        dy = jnp.linspace(-r, r, 2 * r + 1, dtype=jnp.float32)
        out = []
        for i, corr in enumerate(self.pyramid):
            px = cx[..., None, None] / (2 ** i) + dx[None, None, None, :, None]
            py = cy[..., None, None] / (2 ** i) + dy[None, None, None, None, :]
            sampled = _bilinear_sample_zeros(corr, px, py)   # (B,h,w,2r+1,2r+1)
            out.append(sampled.reshape(B, h, w, (2 * r + 1) ** 2))
        return jnp.concatenate(out, axis=-1)                 # (B,h,w, L*(2r+1)^2)


# ----------------------------------------------------------------------------
# Update block pieces
# ----------------------------------------------------------------------------

def motion_encoder(pp, flow, corr):
    # flow: (B,h,w,2), corr: (B,h,w,corr_planes)
    cor = conv2d(corr, pp["convc1"], "relu", (0, 0))
    cor = conv2d(cor, pp["convc2"], "relu", (1, 1))
    flo = conv2d(flow, pp["convf1"], "relu", (3, 3))
    flo = conv2d(flo, pp["convf2"], "relu", (1, 1))
    combined = jnp.concatenate([cor, flo], axis=-1)
    combined = conv2d(combined, pp["conv"], "relu", (1, 1))
    return jnp.concatenate([combined, flow], axis=-1)        # (B,h,w,128)


def sep_conv_gru(pp, h, x):
    B, H, W, C = h.shape
    M = B * H * W

    # horizontal (1,5) half: z+r fused conv, GRU update fused into q conv
    hx = jnp.concatenate([h, x], axis=-1)
    zr = conv2d(hx, pp["zr1"], "sigmoid", (0, 2))
    z, r = zr[..., :C], zr[..., C:]
    hx2 = jnp.concatenate([r * h, x], axis=-1)
    h2d = conv2d_gru(hx2, pp["q1"], (0, 2),
                     h.reshape(M, C), z.reshape(M, C))
    h = h2d.reshape(B, H, W, C)

    # vertical (5,1) half
    hx = jnp.concatenate([h, x], axis=-1)
    zr = conv2d(hx, pp["zr2"], "sigmoid", (2, 0))
    z, r = zr[..., :C], zr[..., C:]
    hx2 = jnp.concatenate([r * h, x], axis=-1)
    h2d = conv2d_gru(hx2, pp["q2"], (2, 0),
                     h.reshape(M, C), z.reshape(M, C))
    return h2d.reshape(B, H, W, C)


def upsample_flow(mask, flow, temperature=4.0):
    # mask: (B,h,w,576) raw; flow: (B,h,w,2)  ->  (B,2,8h,8w) NCHW
    B, h, w, _ = flow.shape
    mask = mask.reshape(B, h, w, 9, 8, 8)
    mask = jax.nn.softmax(mask / temperature, axis=3)

    f8 = 8.0 * flow
    fp = jnp.pad(f8, ((0, 0), (1, 1), (1, 1), (0, 0)))
    nb = jnp.stack([fp[:, i:i + h, j:j + w, :]
                    for i in range(3) for j in range(3)], axis=3)  # (B,h,w,9,2)
    up = jnp.einsum("bhwkpq,bhwkc->bhwcpq", mask, nb)              # (B,h,w,2,8,8)
    up = up.transpose(0, 3, 1, 4, 2, 5)                            # (B,2,h,8,w,8)
    return up.reshape(B, 2, 8 * h, 8 * w)


# ----------------------------------------------------------------------------
# Parameters: raw init (deterministic, synthetic) + hoisted GEMM packing
# ----------------------------------------------------------------------------

def init_raw_params(key, cfg):
    hdim, cdim = cfg["recurrent_channels"], cfg["context_channels"]
    corr_planes = cfg["corr_levels"] * (2 * cfg["corr_radius"] + 1) ** 2
    gru_in = hdim + cdim + 128      # h + (context + motion-encoder output)
    keys = iter(jax.random.split(key, 64))

    def cw(kh, kw, cin, cout):
        return jax.random.normal(next(keys), (kh, kw, cin, cout),
                                 jnp.float32) / math.sqrt(kh * kw * cin)

    def bias(cout):
        return 0.01 * jax.random.normal(next(keys), (cout,), jnp.float32)

    p = {}
    # stride-8 patch-embedding encoders (see TODO(synk) at top)
    p["fnet_w"] = jax.random.normal(next(keys), (8 * 8 * 3, cfg["corr_channels"]),
                                    jnp.float32) / math.sqrt(8 * 8 * 3)
    p["fnet_b"] = bias(cfg["corr_channels"])
    p["cnet_w"] = jax.random.normal(next(keys), (8 * 8 * 3, hdim + cdim),
                                    jnp.float32) / math.sqrt(8 * 8 * 3)
    p["cnet_b"] = bias(hdim + cdim)

    # BasicMotionEncoder
    p["convc1_w"], p["convc1_b"] = cw(1, 1, corr_planes, 256), bias(256)
    p["convc2_w"], p["convc2_b"] = cw(3, 3, 256, 192), bias(192)
    p["convf1_w"], p["convf1_b"] = cw(7, 7, 2, 128), bias(128)
    p["convf2_w"], p["convf2_b"] = cw(3, 3, 128, 64), bias(64)
    p["conv_w"], p["conv_b"] = cw(3, 3, 192 + 64, 128 - 2), bias(126)

    # SepConvGru
    for n in ("z1", "r1", "q1"):
        p[f"conv{n}_w"], p[f"conv{n}_b"] = cw(1, 5, gru_in, hdim), bias(hdim)
    for n in ("z2", "r2", "q2"):
        p[f"conv{n}_w"], p[f"conv{n}_b"] = cw(5, 1, gru_in, hdim), bias(hdim)

    # FlowHead
    p["fh1_w"], p["fh1_b"] = cw(3, 3, hdim, 256), bias(256)
    p["fh2_w"], p["fh2_b"] = cw(3, 3, 256, 2), bias(2)

    # Up8Network
    p["up1_w"], p["up1_b"] = cw(3, 3, hdim, 256), bias(256)
    p["up2_w"], p["up2_b"] = cw(1, 1, 256, 8 * 8 * 9), bias(8 * 8 * 9)
    return p


def _pack_matrix(w2d, b):
    K, N = w2d.shape
    Kp, Np = _round_up(K, 128), _round_up(N, 128)
    wp = jnp.zeros((Kp, Np), jnp.bfloat16).at[:K, :N].set(w2d.astype(jnp.bfloat16))
    bp = jnp.zeros((1, Np), jnp.float32).at[0, :N].set(b.astype(jnp.float32))
    return dict(w=wp, b=bp, K=K, N=N, Kp=Kp, Np=Np)


def pack_conv(w, b):
    kh, kw, cin, cout = w.shape
    gw = _pack_matrix(w.reshape(kh * kw * cin, cout), b)
    gw["ksize"] = (kh, kw)
    return gw


def pack_dense(w2d, b):
    gw = _pack_matrix(w2d, b)
    gw["ksize"] = (1, 1)
    return gw


def pack_params(raw):
    """Pad + bf16-cast every GEMM weight once (hoisted out of the forward)."""
    pp = {}
    pp["fnet"] = pack_dense(raw["fnet_w"], raw["fnet_b"])
    pp["cnet"] = pack_dense(raw["cnet_w"], raw["cnet_b"])
    for n in ("convc1", "convc2", "convf1", "convf2", "conv"):
        pp[n] = pack_conv(raw[n + "_w"], raw[n + "_b"])
    # fused z+r convs (shared hx input patches)
    pp["zr1"] = pack_conv(jnp.concatenate([raw["convz1_w"], raw["convr1_w"]], axis=3),
                          jnp.concatenate([raw["convz1_b"], raw["convr1_b"]], axis=0))
    pp["q1"] = pack_conv(raw["convq1_w"], raw["convq1_b"])
    pp["zr2"] = pack_conv(jnp.concatenate([raw["convz2_w"], raw["convr2_w"]], axis=3),
                          jnp.concatenate([raw["convz2_b"], raw["convr2_b"]], axis=0))
    pp["q2"] = pack_conv(raw["convq2_w"], raw["convq2_b"])
    # fused flow-head conv1 + up-mask conv1 (shared hidden-state input)
    pp["fh1_up1"] = pack_conv(jnp.concatenate([raw["fh1_w"], raw["up1_w"]], axis=3),
                              jnp.concatenate([raw["fh1_b"], raw["up1_b"]], axis=0))
    pp["fh2"] = pack_conv(raw["fh2_w"], raw["fh2_b"])
    pp["up2"] = pack_conv(raw["up2_w"], raw["up2_b"])
    return pp


# ----------------------------------------------------------------------------
# RAFT forward
# ----------------------------------------------------------------------------

def raft_forward(pp, cfg, img1, img2, iterations=2):
    # img1, img2: (B, 3, H, W) NCHW
    B, C, H, W = img1.shape
    h, w = H // 8, W // 8
    hdim, cdim = cfg["recurrent_channels"], cfg["context_channels"]

    def encode(img, gw):
        x = img.transpose(0, 2, 3, 1)                              # NHWC
        x = x.reshape(B, h, 8, w, 8, C).transpose(0, 1, 3, 2, 4, 5)
        x = x.reshape(B * h * w, 8 * 8 * C)
        return gemm(x, gw, act="none").reshape(B, h, w, gw["N"])

    fmap1 = encode(img1, pp["fnet"])
    fmap2 = encode(img2, pp["fnet"])
    cnet = encode(img1, pp["cnet"])
    hid = jnp.tanh(cnet[..., :hdim])
    ctx = jax.nn.relu(cnet[..., hdim:hdim + cdim])

    corr_vol = CorrBlockJax(fmap1, fmap2, cfg["corr_levels"], cfg["corr_radius"])

    # coordinate grid: channel 0 = x (column), channel 1 = y (row)
    gx, gy = jnp.meshgrid(jnp.arange(w, dtype=jnp.float32),
                          jnp.arange(h, dtype=jnp.float32), indexing="xy")
    coords0 = jnp.broadcast_to(jnp.stack([gx, gy], axis=0)[None], (B, 2, h, w))
    coords1 = coords0
    flow = coords1 - coords0

    out = []
    for _ in range(iterations):
        corr = corr_vol(coords1)                                   # (B,h,w,planes)
        flow_nhwc = flow.transpose(0, 2, 3, 1)
        m = motion_encoder(pp, flow_nhwc, corr)                    # (B,h,w,128)
        xcat = jnp.concatenate([ctx, m], axis=-1)
        hid = sep_conv_gru(pp, hid, xcat)

        # fused FlowHead conv1 + Up8Network conv1 on the shared hidden state
        mid = conv2d(hid, pp["fh1_up1"], "relu", (1, 1))           # (B,h,w,512)
        d = conv2d(mid[..., :256], pp["fh2"], "none", (1, 1))      # (B,h,w,2)
        mask = conv2d(mid[..., 256:], pp["up2"], "none", (0, 0))   # (B,h,w,576)

        coords1 = coords1 + d.transpose(0, 3, 1, 2)
        flow = coords1 - coords0
        flow_up = upsample_flow(mask, flow.transpose(0, 2, 3, 1), temperature=4.0)
        out.append(flow_up)                                        # (B,2,8h,8w)
    return out


# ----------------------------------------------------------------------------
# main
# ----------------------------------------------------------------------------

if __name__ == "__main__":
    cfg = dict(
        corr_levels=2,          # kept small so the corr pyramid fits 4x4 feature maps
        corr_radius=3,
        corr_channels=64,
        context_channels=64,
        recurrent_channels=64,
    )

    key = jax.random.PRNGKey(0)
    k1, k2, kp = jax.random.split(key, 3)
    B = 2
    img1 = jax.random.normal(k1, (B, 3, 32, 32), jnp.float32)
    img2 = jax.random.normal(k2, (B, 3, 32, 32), jnp.float32)

    raw = init_raw_params(kp, cfg)
    pp = pack_params(raw)                                   # hoisted pad + bf16 cast

    fwd = jax.jit(lambda a, b: raft_forward(pp, cfg, a, b, iterations=2))
    flows = fwd(img1, img2)
    flows = jax.block_until_ready(flows)

    assert len(flows) == 2
    for f in flows:
        assert f.shape == (B, 2, 32, 32), f.shape
        assert bool(jnp.all(jnp.isfinite(f)))
    print("KERNEL_OK")
</pallas_src>

<mosaic_0001>
module attributes {stable_mosaic.version = 11 : i64} {
  func.func @_mm_kernel(%arg0: i32, %arg1: i32, %arg2: i32, %arg3: memref<32x256xbf16, #tpu.memory_space<vmem>>, %arg4: memref<256x128xbf16, #tpu.memory_space<vmem>>, %arg5: memref<1x128xf32, #tpu.memory_space<vmem>>, %arg6: memref<32x128xf32, #tpu.memory_space<vmem>>, %arg7: memref<32x128xf32, #tpu.memory_space<vmem>>) attributes {dimension_semantics = [#tpu.dimension_semantics<parallel>, #tpu.dimension_semantics<parallel>, #tpu.dimension_semantics<arbitrary>], iteration_bounds = array<i64: 1, 1, 1>, scalar_prefetch = 0 : i64, scratch_operands = 1 : i64, tpu.core_type = #tpu.core_type<tc>, window_params = [{transform_indices = @transform_0, window_bounds = array<i64: 32, 256>}, {transform_indices = @transform_1, window_bounds = array<i64: 256, 128>}, {transform_indices = @transform_2, window_bounds = array<i64: 1, 128>}, {transform_indices = @transform_3, window_bounds = array<i64: 32, 128>}]} {
    %c0_i32 = arith.constant 0 : i32
    %0 = arith.cmpi eq, %arg2, %c0_i32 : i32
    %1 = arith.extui %0 : i1 to i32
    %c0_i32_0 = arith.constant 0 : i32
    %2 = arith.cmpi ne, %1, %c0_i32_0 : i32
    scf.if %2 {
      %cst_10 = arith.constant 0.000000e+00 : f32
      %12 = vector.broadcast %cst_10 : f32 to vector<32x128xf32>
      %c0_11 = arith.constant 0 : index
      %c0_12 = arith.constant 0 : index
      %13 = vector.load %arg7[%c0_11, %c0_12] : memref<32x128xf32, #tpu.memory_space<vmem>>, vector<32x128xf32>
      tpu.vector_store %arg7[%c0_11, %c0_12], %12 {strides = array<i32>} : memref<32x128xf32, #tpu.memory_space<vmem>>, vector<32x128xf32>,
    } else {
    }
    %c0 = arith.constant 0 : index
    %c0_1 = arith.constant 0 : index
    %3 = vector.load %arg7[%c0, %c0_1] : memref<32x128xf32, #tpu.memory_space<vmem>>, vector<32x128xf32>
    %c0_2 = arith.constant 0 : index
    %c0_3 = arith.constant 0 : index
    %4 = vector.load %arg3[%c0_2, %c0_3] : memref<32x256xbf16, #tpu.memory_space<vmem>>, vector<32x256xbf16>
    %c0_4 = arith.constant 0 : index
    %c0_5 = arith.constant 0 : index
    %5 = vector.load %arg4[%c0_4, %c0_5] : memref<256x128xbf16, #tpu.memory_space<vmem>>, vector<256x128xbf16>
    %cst = arith.constant dense<0.000000e+00> : vector<32x128xf32>
    %6 = tpu.matmul %4, %5, %cst {dimension_numbers = #tpu.dot_dimension_numbers<[1], [0], [0], [1], [0, 0, 1, 1], [], []>} : vector<32x256xbf16>, vector<256x128xbf16>, vector<32x128xf32> -> vector<32x128xf32>
    %7 = arith.addf %3, %6 : vector<32x128xf32>
    %c0_6 = arith.constant 0 : index
    %c0_7 = arith.constant 0 : index
    %8 = vector.load %arg7[%c0_6, %c0_7] : memref<32x128xf32, #tpu.memory_space<vmem>>, vector<32x128xf32>
    tpu.vector_store %arg7[%c0_6, %c0_7], %7 {strides = array<i32>} : memref<32x128xf32, #tpu.memory_space<vmem>>, vector<32x128xf32>,
    %c0_i32_8 = arith.constant 0 : i32
    %9 = arith.cmpi eq, %arg2, %c0_i32_8 : i32
    %10 = arith.extui %9 : i1 to i32
    %c0_i32_9 = arith.constant 0 : i32
    %11 = arith.cmpi ne, %10, %c0_i32_9 : i32
    scf.if %11 {
      %c0_10 = arith.constant 0 : index
      %c0_11 = arith.constant 0 : index
      %12 = vector.load %arg7[%c0_10, %c0_11] : memref<32x128xf32, #tpu.memory_space<vmem>>, vector<32x128xf32>
      %cst_12 = arith.constant 1.000000e+00 : f32
      %13 = vector.broadcast %cst_12 : f32 to vector<32x128xf32>
      %14 = arith.mulf %12, %13 : vector<32x128xf32>
      %c0_13 = arith.constant 0 : index
      %c0_14 = arith.constant 0 : index
      %15 = vector.load %arg5[%c0_13, %c0_14] : memref<1x128xf32, #tpu.memory_space<vmem>>, vector<1x128xf32>
      %16 = vector.broadcast %15 : vector<1x128xf32> to vector<32x128xf32>
      %17 = arith.addf %14, %16 : vector<32x128xf32>
      %c0_15 = arith.constant 0 : index
      %c0_16 = arith.constant 0 : index
      %18 = vector.load %arg6[%c0_15, %c0_16] : memref<32x128xf32, #tpu.memory_space<vmem>>, vector<32x128xf32>
      tpu.vector_store %arg6[%c0_15, %c0_16], %17 {strides = array<i32>} : memref<32x128xf32, #tpu.memory_space<vmem>>, vector<32x128xf32>,
    } else {
    }
    return
  }
  func.func @transform_0(%arg0: i32, %arg1: i32, %arg2: i32) -> (i32, i32) {
    %c0_i32 = arith.constant 0 : i32
    return %arg0, %arg2 : i32, i32
  }
  func.func @transform_1(%arg0: i32, %arg1: i32, %arg2: i32) -> (i32, i32) {
    %c0_i32 = arith.constant 0 : i32
    return %arg2, %arg1 : i32, i32
  }
  func.func @transform_2(%arg0: i32, %arg1: i32, %arg2: i32) -> (i32, i32) {
    %c0_i32 = arith.constant 0 : i32
    %c0_i32_0 = arith.constant 0 : i32
    return %c0_i32, %arg1 : i32, i32
  }
  func.func @transform_3(%arg0: i32, %arg1: i32, %arg2: i32) -> (i32, i32) {
    %c0_i32 = arith.constant 0 : i32
    return %arg0, %arg1 : i32, i32
  }
}

module attributes {stable_mosaic.version = 11 : i64} {
  func.func @_corr_kernel(%arg0: i32, %arg1: i32, %arg2: i32, %arg3: memref<1x16x64xbf16, #tpu.memory_space<vmem>>, %arg4: memref<1x16x64xbf16, #tpu.memory_space<vmem>>, %arg5: memref<1x16x16xf32, #tpu.memory_space<vmem>>) attributes {dimension_semantics = [#tpu.dimension_semantics<parallel>, #tpu.dimension_semantics<parallel>, #tpu.dimension_semantics<parallel>], iteration_bounds = array<i64: 2, 1, 1>, scalar_prefetch = 0 : i64, scratch_operands = 0 : i64, tpu.core_type = #tpu.core_type<tc>, window_params = [{transform_indices = @transform_0, window_bounds = array<i64: 1, 16, 64>}, {transform_indices = @transform_1, window_bounds = array<i64: 1, 16, 64>}, {transform_indices = @transform_2, window_bounds = array<i64: 1, 16, 16>}]} {
    %c0 = arith.constant 0 : index
    %c0_0 = arith.constant 0 : index
    %c0_1 = arith.constant 0 : index
    %0 = vector.load %arg3[%c0, %c0_0, %c0_1] : memref<1x16x64xbf16, #tpu.memory_space<vmem>>, vector<1x16x64xbf16>
    %1 = vector.shape_cast %0 : vector<1x16x64xbf16> to vector<16x64xbf16>
    %c0_2 = arith.constant 0 : index
    %c0_3 = arith.constant 0 : index
    %c0_4 = arith.constant 0 : index
    %2 = vector.load %arg4[%c0_2, %c0_3, %c0_4] : memref<1x16x64xbf16, #tpu.memory_space<vmem>>, vector<1x16x64xbf16>
    %3 = vector.shape_cast %2 : vector<1x16x64xbf16> to vector<16x64xbf16>
    %cst = arith.constant dense<0.000000e+00> : vector<16x16xf32>
    %4 = tpu.matmul %1, %3, %cst {dimension_numbers = #tpu.dot_dimension_numbers<[1], [1], [0], [0], [0, 0, 1, 0], [], []>} : vector<16x64xbf16>, vector<16x64xbf16>, vector<16x16xf32> -> vector<16x16xf32>
    %cst_5 = arith.constant 1.250000e-01 : f32
    %5 = vector.broadcast %cst_5 : f32 to vector<16x16xf32>
    %6 = arith.mulf %4, %5 : vector<16x16xf32>
    %c0_6 = arith.constant 0 : index
    %c0_7 = arith.constant 0 : index
    %c0_8 = arith.constant 0 : index
    %7 = vector.load %arg5[%c0_6, %c0_7, %c0_8] : memref<1x16x16xf32, #tpu.memory_space<vmem>>, vector<1x16x16xf32>
    %8 = vector.shape_cast %7 : vector<1x16x16xf32> to vector<16x16xf32>
    %9 = vector.shape_cast %6 : vector<16x16xf32> to vector<1x16x16xf32>
    tpu.vector_store %arg5[%c0_6, %c0_7, %c0_8], %9 {strides = array<i32>} : memref<1x16x16xf32, #tpu.memory_space<vmem>>, vector<1x16x16xf32>,
    return
  }
  func.func @transform_0(%arg0: i32, %arg1: i32, %arg2: i32) -> (i32, i32, i32) {
    %c0_i32 = arith.constant 0 : i32
    %c0_i32_0 = arith.constant 0 : i32
    return %arg0, %arg1, %c0_i32 : i32, i32, i32
  }
  func.func @transform_1(%arg0: i32, %arg1: i32, %arg2: i32) -> (i32, i32, i32) {
    %c0_i32 = arith.constant 0 : i32
    %c0_i32_0 = arith.constant 0 : i32
    return %arg0, %arg2, %c0_i32 : i32, i32, i32
  }
  func.func @transform_2(%arg0: i32, %arg1: i32, %arg2: i32) -> (i32, i32, i32) {
    %c0_i32 = arith.constant 0 : i32
    return %arg0, %arg1, %arg2 : i32, i32, i32
  }
}

module attributes {stable_mosaic.version = 11 : i64} {
  func.func @_mm_kernel(%arg0: i32, %arg1: i32, %arg2: i32, %arg3: memref<32x128xbf16, #tpu.memory_space<vmem>>, %arg4: memref<128x256xbf16, #tpu.memory_space<vmem>>, %arg5: memref<1x256xf32, #tpu.memory_space<vmem>>, %arg6: memref<32x256xf32, #tpu.memory_space<vmem>>, %arg7: memref<32x256xf32, #tpu.memory_space<vmem>>) attributes {dimension_semantics = [#tpu.dimension_semantics<parallel>, #tpu.dimension_semantics<parallel>, #tpu.dimension_semantics<arbitrary>], iteration_bounds = array<i64: 1, 1, 1>, scalar_prefetch = 0 : i64, scratch_operands = 1 : i64, tpu.core_type = #tpu.core_type<tc>, window_params = [{transform_indices = @transform_0, window_bounds = array<i64: 32, 128>}, {transform_indices = @transform_1, window_bounds = array<i64: 128, 256>}, {transform_indices = @transform_2, window_bounds = array<i64: 1, 256>}, {transform_indices = @transform_3, window_bounds = array<i64: 32, 256>}]} {
    %c0_i32 = arith.constant 0 : i32
    %0 = arith.cmpi eq, %arg2, %c0_i32 : i32
    %1 = arith.extui %0 : i1 to i32
    %c0_i32_0 = arith.constant 0 : i32
    %2 = arith.cmpi ne, %1, %c0_i32_0 : i32
    scf.if %2 {
      %cst_10 = arith.constant 0.000000e+00 : f32
      %12 = vector.broadcast %cst_10 : f32 to vector<32x256xf32>
      %c0_11 = arith.constant 0 : index
      %c0_12 = arith.constant 0 : index
      %13 = vector.load %arg7[%c0_11, %c0_12] : memref<32x256xf32, #tpu.memory_space<vmem>>, vector<32x256xf32>
      tpu.vector_store %arg7[%c0_11, %c0_12], %12 {strides = array<i32>} : memref<32x256xf32, #tpu.memory_space<vmem>>, vector<32x256xf32>,
    } else {
    }
    %c0 = arith.constant 0 : index
    %c0_1 = arith.constant 0 : index
    %3 = vector.load %arg7[%c0, %c0_1] : memref<32x256xf32, #tpu.memory_space<vmem>>, vector<32x256xf32>
    %c0_2 = arith.constant 0 : index
    %c0_3 = arith.constant 0 : index
    %4 = vector.load %arg3[%c0_2, %c0_3] : memref<32x128xbf16, #tpu.memory_space<vmem>>, vector<32x128xbf16>
    %c0_4 = arith.constant 0 : index
    %c0_5 = arith.constant 0 : index
    %5 = vector.load %arg4[%c0_4, %c0_5] : memref<128x256xbf16, #tpu.memory_space<vmem>>, vector<128x256xbf16>
    %cst = arith.constant dense<0.000000e+00> : vector<32x256xf32>
    %6 = tpu.matmul %4, %5, %cst {dimension_numbers = #tpu.dot_dimension_numbers<[1], [0], [0], [1], [0, 0, 1, 1], [], []>} : vector<32x128xbf16>, vector<128x256xbf16>, vector<32x256xf32> -> vector<32x256xf32>
    %7 = arith.addf %3, %6 : vector<32x256xf32>
    %c0_6 = arith.constant 0 : index
    %c0_7 = arith.constant 0 : index
    %8 = vector.load %arg7[%c0_6, %c0_7] : memref<32x256xf32, #tpu.memory_space<vmem>>, vector<32x256xf32>
    tpu.vector_store %arg7[%c0_6, %c0_7], %7 {strides = array<i32>} : memref<32x256xf32, #tpu.memory_space<vmem>>, vector<32x256xf32>,
    %c0_i32_8 = arith.constant 0 : i32
    %9 = arith.cmpi eq, %arg2, %c0_i32_8 : i32
    %10 = arith.extui %9 : i1 to i32
    %c0_i32_9 = arith.constant 0 : i32
    %11 = arith.cmpi ne, %10, %c0_i32_9 : i32
    scf.if %11 {
      %c0_10 = arith.constant 0 : index
      %c0_11 = arith.constant 0 : index
      %12 = vector.load %arg7[%c0_10, %c0_11] : memref<32x256xf32, #tpu.memory_space<vmem>>, vector<32x256xf32>
      %cst_12 = arith.constant 1.000000e+00 : f32
      %13 = vector.broadcast %cst_12 : f32 to vector<32x256xf32>
      %14 = arith.mulf %12, %13 : vector<32x256xf32>
      %c0_13 = arith.constant 0 : index
      %c0_14 = arith.constant 0 : index
      %15 = vector.load %arg5[%c0_13, %c0_14] : memref<1x256xf32, #tpu.memory_space<vmem>>, vector<1x256xf32>
      %16 = vector.broadcast %15 : vector<1x256xf32> to vector<32x256xf32>
      %17 = arith.addf %14, %16 : vector<32x256xf32>
      %cst_15 = arith.constant 0.000000e+00 : f32
      %18 = vector.broadcast %cst_15 : f32 to vector<32x256xf32>
      %19 = arith.maximumf %17, %18 : vector<32x256xf32>
      %c0_16 = arith.constant 0 : index
      %c0_17 = arith.constant 0 : index
      %20 = vector.load %arg6[%c0_16, %c0_17] : memref<32x256xf32, #tpu.memory_space<vmem>>, vector<32x256xf32>
      tpu.vector_store %arg6[%c0_16, %c0_17], %19 {strides = array<i32>} : memref<32x256xf32, #tpu.memory_space<vmem>>, vector<32x256xf32>,
    } else {
    }
    return
  }
  func.func @transform_0(%arg0: i32, %arg1: i32, %arg2: i32) -> (i32, i32) {
    %c0_i32 = arith.constant 0 : i32
    return %arg0, %arg2 : i32, i32
  }
  func.func @transform_1(%arg0: i32, %arg1: i32, %arg2: i32) -> (i32, i32) {
    %c0_i32 = arith.constant 0 : i32
    return %arg2, %arg1 : i32, i32
  }
  func.func @transform_2(%arg0: i32, %arg1: i32, %arg2: i32) -> (i32, i32) {
    %c0_i32 = arith.constant 0 : i32
    %c0_i32_0 = arith.constant 0 : i32
    return %c0_i32, %arg1 : i32, i32
  }
  func.func @transform_3(%arg0: i32, %arg1: i32, %arg2: i32) -> (i32, i32) {
    %c0_i32 = arith.constant 0 : i32
    return %arg0, %arg1 : i32, i32
  }
}

module attributes {stable_mosaic.version = 11 : i64} {
  func.func @_mm_kernel(%arg0: i32, %arg1: i32, %arg2: i32, %arg3: memref<32x384xbf16, #tpu.memory_space<vmem>>, %arg4: memref<384x256xbf16, #tpu.memory_space<vmem>>, %arg5: memref<1x256xf32, #tpu.memory_space<vmem>>, %arg6: memref<32x256xf32, #tpu.memory_space<vmem>>, %arg7: memref<32x256xf32, #tpu.memory_space<vmem>>) attributes {dimension_semantics = [#tpu.dimension_semantics<parallel>, #tpu.dimension_semantics<parallel>, #tpu.dimension_semantics<arbitrary>], iteration_bounds = array<i64: 1, 1, 6>, scalar_prefetch = 0 : i64, scratch_operands = 1 : i64, tpu.core_type = #tpu.core_type<tc>, window_params = [{transform_indices = @transform_0, window_bounds = array<i64: 32, 384>}, {transform_indices = @transform_1, window_bounds = array<i64: 384, 256>}, {transform_indices = @transform_2, window_bounds = array<i64: 1, 256>}, {transform_indices = @transform_3, window_bounds = array<i64: 32, 256>}]} {
    %c0_i32 = arith.constant 0 : i32
    %0 = arith.cmpi eq, %arg2, %c0_i32 : i32
    %1 = arith.extui %0 : i1 to i32
    %c0_i32_0 = arith.constant 0 : i32
    %2 = arith.cmpi ne, %1, %c0_i32_0 : i32
    scf.if %2 {
      %cst_9 = arith.constant 0.000000e+00 : f32
      %12 = vector.broadcast %cst_9 : f32 to vector<32x256xf32>
      %c0_10 = arith.constant 0 : index
      %c0_11 = arith.constant 0 : index
      %13 = vector.load %arg7[%c0_10, %c0_11] : memref<32x256xf32, #tpu.memory_space<vmem>>, vector<32x256xf32>
      tpu.vector_store %arg7[%c0_10, %c0_11], %12 {strides = array<i32>} : memref<32x256xf32, #tpu.memory_space<vmem>>, vector<32x256xf32>,
    } else {
    }
    %c0 = arith.constant 0 : index
    %c0_1 = arith.constant 0 : index
    %3 = vector.load %arg7[%c0, %c0_1] : memref<32x256xf32, #tpu.memory_space<vmem>>, vector<32x256xf32>
    %c0_2 = arith.constant 0 : index
    %c0_3 = arith.constant 0 : index
    %4 = vector.load %arg3[%c0_2, %c0_3] : memref<32x384xbf16, #tpu.memory_space<vmem>>, vector<32x384xbf16>
    %c0_4 = arith.constant 0 : index
    %c0_5 = arith.constant 0 : index
    %5 = vector.load %arg4[%c0_4, %c0_5] : memref<384x256xbf16, #tpu.memory_space<vmem>>, vector<384x256xbf16>
    %cst = arith.constant dense<0.000000e+00> : vector<32x256xf32>
    %6 = tpu.matmul %4, %5, %cst {dimension_numbers = #tpu.dot_dimension_numbers<[1], [0], [0], [1], [0, 0, 1, 1], [], []>} : vector<32x384xbf16>, vector<384x256xbf16>, vector<32x256xf32> -> vector<32x256xf32>
    %7 = arith.addf %3, %6 : vector<32x256xf32>
    %c0_6 = arith.constant 0 : index
    %c0_7 = arith.constant 0 : index
    %8 = vector.load %arg7[%c0_6, %c0_7] : memref<32x256xf32, #tpu.memory_space<vmem>>, vector<32x256xf32>
    tpu.vector_store %arg7[%c0_6, %c0_7], %7 {strides = array<i32>} : memref<32x256xf32, #tpu.memory_space<vmem>>, vector<32x256xf32>,
    %c5_i32 = arith.constant 5 : i32
    %9 = arith.cmpi eq, %arg2, %c5_i32 : i32
    %10 = arith.extui %9 : i1 to i32
    %c0_i32_8 = arith.constant 0 : i32
    %11 = arith.cmpi ne, %10, %c0_i32_8 : i32
    scf.if %11 {
      %c0_9 = arith.constant 0 : index
      %c0_10 = arith.constant 0 : index
      %12 = vector.load %arg7[%c0_9, %c0_10] : memref<32x256xf32, #tpu.memory_space<vmem>>, vector<32x256xf32>
      %cst_11 = arith.constant 1.000000e+00 : f32
      %13 = vector.broadcast %cst_11 : f32 to vector<32x256xf32>
      %14 = arith.mulf %12, %13 : vector<32x256xf32>
      %c0_12 = arith.constant 0 : index
      %c0_13 = arith.constant 0 : index
      %15 = vector.load %arg5[%c0_12, %c0_13] : memref<1x256xf32, #tpu.memory_space<vmem>>, vector<1x256xf32>
      %16 = vector.broadcast %15 : vector<1x256xf32> to vector<32x256xf32>
      %17 = arith.addf %14, %16 : vector<32x256xf32>
      %cst_14 = arith.constant 0.000000e+00 : f32
      %18 = vector.broadcast %cst_14 : f32 to vector<32x256xf32>
      %19 = arith.maximumf %17, %18 : vector<32x256xf32>
      %c0_15 = arith.constant 0 : index
      %c0_16 = arith.constant 0 : index
      %20 = vector.load %arg6[%c0_15, %c0_16] : memref<32x256xf32, #tpu.memory_space<vmem>>, vector<32x256xf32>
      tpu.vector_store %arg6[%c0_15, %c0_16], %19 {strides = array<i32>} : memref<32x256xf32, #tpu.memory_space<vmem>>, vector<32x256xf32>,
    } else {
    }
    return
  }
  func.func @transform_0(%arg0: i32, %arg1: i32, %arg2: i32) -> (i32, i32) {
    %c0_i32 = arith.constant 0 : i32
    return %arg0, %arg2 : i32, i32
  }
  func.func @transform_1(%arg0: i32, %arg1: i32, %arg2: i32) -> (i32, i32) {
    %c0_i32 = arith.constant 0 : i32
    return %arg2, %arg1 : i32, i32
  }
  func.func @transform_2(%arg0: i32, %arg1: i32, %arg2: i32) -> (i32, i32) {
    %c0_i32 = arith.constant 0 : i32
    %c0_i32_0 = arith.constant 0 : i32
    return %c0_i32, %arg1 : i32, i32
  }
  func.func @transform_3(%arg0: i32, %arg1: i32, %arg2: i32) -> (i32, i32) {
    %c0_i32 = arith.constant 0 : i32
    return %arg0, %arg1 : i32, i32
  }
}

module attributes {stable_mosaic.version = 11 : i64} {
  func.func @_mm_kernel(%arg0: i32, %arg1: i32, %arg2: i32, %arg3: memref<32x128xbf16, #tpu.memory_space<vmem>>, %arg4: memref<128x128xbf16, #tpu.memory_space<vmem>>, %arg5: memref<1x128xf32, #tpu.memory_space<vmem>>, %arg6: memref<32x128xf32, #tpu.memory_space<vmem>>, %arg7: memref<32x128xf32, #tpu.memory_space<vmem>>) attributes {dimension_semantics = [#tpu.dimension_semantics<parallel>, #tpu.dimension_semantics<parallel>, #tpu.dimension_semantics<arbitrary>], iteration_bounds = array<i64: 1, 1, 1>, scalar_prefetch = 0 : i64, scratch_operands = 1 : i64, tpu.core_type = #tpu.core_type<tc>, window_params = [{transform_indices = @transform_0, window_bounds = array<i64: 32, 128>}, {transform_indices = @transform_1, window_bounds = array<i64: 128, 128>}, {transform_indices = @transform_2, window_bounds = array<i64: 1, 128>}, {transform_indices = @transform_3, window_bounds = array<i64: 32, 128>}]} {
    %c0_i32 = arith.constant 0 : i32
    %0 = arith.cmpi eq, %arg2, %c0_i32 : i32
    %1 = arith.extui %0 : i1 to i32
    %c0_i32_0 = arith.constant 0 : i32
    %2 = arith.cmpi ne, %1, %c0_i32_0 : i32
    scf.if %2 {
      %cst_10 = arith.constant 0.000000e+00 : f32
      %12 = vector.broadcast %cst_10 : f32 to vector<32x128xf32>
      %c0_11 = arith.constant 0 : index
      %c0_12 = arith.constant 0 : index
      %13 = vector.load %arg7[%c0_11, %c0_12] : memref<32x128xf32, #tpu.memory_space<vmem>>, vector<32x128xf32>
      tpu.vector_store %arg7[%c0_11, %c0_12], %12 {strides = array<i32>} : memref<32x128xf32, #tpu.memory_space<vmem>>, vector<32x128xf32>,
    } else {
    }
    %c0 = arith.constant 0 : index
    %c0_1 = arith.constant 0 : index
    %3 = vector.load %arg7[%c0, %c0_1] : memref<32x128xf32, #tpu.memory_space<vmem>>, vector<32x128xf32>
    %c0_2 = arith.constant 0 : index
    %c0_3 = arith.constant 0 : index
    %4 = vector.load %arg3[%c0_2, %c0_3] : memref<32x128xbf16, #tpu.memory_space<vmem>>, vector<32x128xbf16>
    %c0_4 = arith.constant 0 : index
    %c0_5 = arith.constant 0 : index
    %5 = vector.load %arg4[%c0_4, %c0_5] : memref<128x128xbf16, #tpu.memory_space<vmem>>, vector<128x128xbf16>
    %cst = arith.constant dense<0.000000e+00> : vector<32x128xf32>
    %6 = tpu.matmul %4, %5, %cst {dimension_numbers = #tpu.dot_dimension_numbers<[1], [0], [0], [1], [0, 0, 1, 1], [], []>} : vector<32x128xbf16>, vector<128x128xbf16>, vector<32x128xf32> -> vector<32x128xf32>
    %7 = arith.addf %3, %6 : vector<32x128xf32>
    %c0_6 = arith.constant 0 : index
    %c0_7 = arith.constant 0 : index
    %8 = vector.load %arg7[%c0_6, %c0_7] : memref<32x128xf32, #tpu.memory_space<vmem>>, vector<32x128xf32>
    tpu.vector_store %arg7[%c0_6, %c0_7], %7 {strides = array<i32>} : memref<32x128xf32, #tpu.memory_space<vmem>>, vector<32x128xf32>,
    %c0_i32_8 = arith.constant 0 : i32
    %9 = arith.cmpi eq, %arg2, %c0_i32_8 : i32
    %10 = arith.extui %9 : i1 to i32
    %c0_i32_9 = arith.constant 0 : i32
    %11 = arith.cmpi ne, %10, %c0_i32_9 : i32
    scf.if %11 {
      %c0_10 = arith.constant 0 : index
      %c0_11 = arith.constant 0 : index
      %12 = vector.load %arg7[%c0_10, %c0_11] : memref<32x128xf32, #tpu.memory_space<vmem>>, vector<32x128xf32>
      %cst_12 = arith.constant 1.000000e+00 : f32
      %13 = vector.broadcast %cst_12 : f32 to vector<32x128xf32>
      %14 = arith.mulf %12, %13 : vector<32x128xf32>
      %c0_13 = arith.constant 0 : index
      %c0_14 = arith.constant 0 : index
      %15 = vector.load %arg5[%c0_13, %c0_14] : memref<1x128xf32, #tpu.memory_space<vmem>>, vector<1x128xf32>
      %16 = vector.broadcast %15 : vector<1x128xf32> to vector<32x128xf32>
      %17 = arith.addf %14, %16 : vector<32x128xf32>
      %cst_15 = arith.constant 0.000000e+00 : f32
      %18 = vector.broadcast %cst_15 : f32 to vector<32x128xf32>
      %19 = arith.maximumf %17, %18 : vector<32x128xf32>
      %c0_16 = arith.constant 0 : index
      %c0_17 = arith.constant 0 : index
      %20 = vector.load %arg6[%c0_16, %c0_17] : memref<32x128xf32, #tpu.memory_space<vmem>>, vector<32x128xf32>
      tpu.vector_store %arg6[%c0_16, %c0_17], %19 {strides = array<i32>} : memref<32x128xf32, #tpu.memory_space<vmem>>, vector<32x128xf32>,
    } else {
    }
    return
  }
  func.func @transform_0(%arg0: i32, %arg1: i32, %arg2: i32) -> (i32, i32) {
    %c0_i32 = arith.constant 0 : i32
    return %arg0, %arg2 : i32, i32
  }
  func.func @transform_1(%arg0: i32, %arg1: i32, %arg2: i32) -> (i32, i32) {
    %c0_i32 = arith.constant 0 : i32
    return %arg2, %arg1 : i32, i32
  }
  func.func @transform_2(%arg0: i32, %arg1: i32, %arg2: i32) -> (i32, i32) {
    %c0_i32 = arith.constant 0 : i32
    %c0_i32_0 = arith.constant 0 : i32
    return %c0_i32, %arg1 : i32, i32
  }
  func.func @transform_3(%arg0: i32, %arg1: i32, %arg2: i32) -> (i32, i32) {
    %c0_i32 = arith.constant 0 : i32
    return %arg0, %arg1 : i32, i32
  }
}

module attributes {stable_mosaic.version = 11 : i64} {
  func.func @_mm_kernel(%arg0: i32, %arg1: i32, %arg2: i32, %arg3: memref<32x384xbf16, #tpu.memory_space<vmem>>, %arg4: memref<384x128xbf16, #tpu.memory_space<vmem>>, %arg5: memref<1x128xf32, #tpu.memory_space<vmem>>, %arg6: memref<32x128xf32, #tpu.memory_space<vmem>>, %arg7: memref<32x128xf32, #tpu.memory_space<vmem>>) attributes {dimension_semantics = [#tpu.dimension_semantics<parallel>, #tpu.dimension_semantics<parallel>, #tpu.dimension_semantics<arbitrary>], iteration_bounds = array<i64: 1, 1, 3>, scalar_prefetch = 0 : i64, scratch_operands = 1 : i64, tpu.core_type = #tpu.core_type<tc>, window_params = [{transform_indices = @transform_0, window_bounds = array<i64: 32, 384>}, {transform_indices = @transform_1, window_bounds = array<i64: 384, 128>}, {transform_indices = @transform_2, window_bounds = array<i64: 1, 128>}, {transform_indices = @transform_3, window_bounds = array<i64: 32, 128>}]} {
    %c0_i32 = arith.constant 0 : i32
    %0 = arith.cmpi eq, %arg2, %c0_i32 : i32
    %1 = arith.extui %0 : i1 to i32
    %c0_i32_0 = arith.constant 0 : i32
    %2 = arith.cmpi ne, %1, %c0_i32_0 : i32
    scf.if %2 {
      %cst_9 = arith.constant 0.000000e+00 : f32
      %12 = vector.broadcast %cst_9 : f32 to vector<32x128xf32>
      %c0_10 = arith.constant 0 : index
      %c0_11 = arith.constant 0 : index
      %13 = vector.load %arg7[%c0_10, %c0_11] : memref<32x128xf32, #tpu.memory_space<vmem>>, vector<32x128xf32>
      tpu.vector_store %arg7[%c0_10, %c0_11], %12 {strides = array<i32>} : memref<32x128xf32, #tpu.memory_space<vmem>>, vector<32x128xf32>,
    } else {
    }
    %c0 = arith.constant 0 : index
    %c0_1 = arith.constant 0 : index
    %3 = vector.load %arg7[%c0, %c0_1] : memref<32x128xf32, #tpu.memory_space<vmem>>, vector<32x128xf32>
    %c0_2 = arith.constant 0 : index
    %c0_3 = arith.constant 0 : index
    %4 = vector.load %arg3[%c0_2, %c0_3] : memref<32x384xbf16, #tpu.memory_space<vmem>>, vector<32x384xbf16>
    %c0_4 = arith.constant 0 : index
    %c0_5 = arith.constant 0 : index
    %5 = vector.load %arg4[%c0_4, %c0_5] : memref<384x128xbf16, #tpu.memory_space<vmem>>, vector<384x128xbf16>
    %cst = arith.constant dense<0.000000e+00> : vector<32x128xf32>
    %6 = tpu.matmul %4, %5, %cst {dimension_numbers = #tpu.dot_dimension_numbers<[1], [0], [0], [1], [0, 0, 1, 1], [], []>} : vector<32x384xbf16>, vector<384x128xbf16>, vector<32x128xf32> -> vector<32x128xf32>
    %7 = arith.addf %3, %6 : vector<32x128xf32>
    %c0_6 = arith.constant 0 : index
    %c0_7 = arith.constant 0 : index
    %8 = vector.load %arg7[%c0_6, %c0_7] : memref<32x128xf32, #tpu.memory_space<vmem>>, vector<32x128xf32>
    tpu.vector_store %arg7[%c0_6, %c0_7], %7 {strides = array<i32>} : memref<32x128xf32, #tpu.memory_space<vmem>>, vector<32x128xf32>,
    %c2_i32 = arith.constant 2 : i32
    %9 = arith.cmpi eq, %arg2, %c2_i32 : i32
    %10 = arith.extui %9 : i1 to i32
    %c0_i32_8 = arith.constant 0 : i32
    %11 = arith.cmpi ne, %10, %c0_i32_8 : i32
    scf.if %11 {
      %c0_9 = arith.constant 0 : index
      %c0_10 = arith.constant 0 : index
      %12 = vector.load %arg7[%c0_9, %c0_10] : memref<32x128xf32, #tpu.memory_space<vmem>>, vector<32x128xf32>
      %cst_11 = arith.constant 1.000000e+00 : f32
      %13 = vector.broadcast %cst_11 : f32 to vector<32x128xf32>
      %14 = arith.mulf %12, %13 : vector<32x128xf32>
      %c0_12 = arith.constant 0 : index
      %c0_13 = arith.constant 0 : index
      %15 = vector.load %arg5[%c0_12, %c0_13] : memref<1x128xf32, #tpu.memory_space<vmem>>, vector<1x128xf32>
      %16 = vector.broadcast %15 : vector<1x128xf32> to vector<32x128xf32>
      %17 = arith.addf %14, %16 : vector<32x128xf32>
      %cst_14 = arith.constant 0.000000e+00 : f32
      %18 = vector.broadcast %cst_14 : f32 to vector<32x128xf32>
      %19 = arith.maximumf %17, %18 : vector<32x128xf32>
      %c0_15 = arith.constant 0 : index
      %c0_16 = arith.constant 0 : index
      %20 = vector.load %arg6[%c0_15, %c0_16] : memref<32x128xf32, #tpu.memory_space<vmem>>, vector<32x128xf32>
      tpu.vector_store %arg6[%c0_15, %c0_16], %19 {strides = array<i32>} : memref<32x128xf32, #tpu.memory_space<vmem>>, vector<32x128xf32>,
    } else {
    }
    return
  }
  func.func @transform_0(%arg0: i32, %arg1: i32, %arg2: i32) -> (i32, i32) {
    %c0_i32 = arith.constant 0 : i32
    return %arg0, %arg2 : i32, i32
  }
  func.func @transform_1(%arg0: i32, %arg1: i32, %arg2: i32) -> (i32, i32) {
    %c0_i32 = arith.constant 0 : i32
    return %arg2, %arg1 : i32, i32
  }
  func.func @transform_2(%arg0: i32, %arg1: i32, %arg2: i32) -> (i32, i32) {
    %c0_i32 = arith.constant 0 : i32
    %c0_i32_0 = arith.constant 0 : i32
    return %c0_i32, %arg1 : i32, i32
  }
  func.func @transform_3(%arg0: i32, %arg1: i32, %arg2: i32) -> (i32, i32) {
    %c0_i32 = arith.constant 0 : i32
    return %arg0, %arg1 : i32, i32
  }
}

module attributes {stable_mosaic.version = 11 : i64} {
  func.func @_mm_kernel(%arg0: i32, %arg1: i32, %arg2: i32, %arg3: memref<32x384xbf16, #tpu.memory_space<vmem>>, %arg4: memref<384x128xbf16, #tpu.memory_space<vmem>>, %arg5: memref<1x128xf32, #tpu.memory_space<vmem>>, %arg6: memref<32x128xf32, #tpu.memory_space<vmem>>, %arg7: memref<32x128xf32, #tpu.memory_space<vmem>>) attributes {dimension_semantics = [#tpu.dimension_semantics<parallel>, #tpu.dimension_semantics<parallel>, #tpu.dimension_semantics<arbitrary>], iteration_bounds = array<i64: 1, 1, 6>, scalar_prefetch = 0 : i64, scratch_operands = 1 : i64, tpu.core_type = #tpu.core_type<tc>, window_params = [{transform_indices = @transform_0, window_bounds = array<i64: 32, 384>}, {transform_indices = @transform_1, window_bounds = array<i64: 384, 128>}, {transform_indices = @transform_2, window_bounds = array<i64: 1, 128>}, {transform_indices = @transform_3, window_bounds = array<i64: 32, 128>}]} {
    %c0_i32 = arith.constant 0 : i32
    %0 = arith.cmpi eq, %arg2, %c0_i32 : i32
    %1 = arith.extui %0 : i1 to i32
    %c0_i32_0 = arith.constant 0 : i32
    %2 = arith.cmpi ne, %1, %c0_i32_0 : i32
    scf.if %2 {
      %cst_9 = arith.constant 0.000000e+00 : f32
      %12 = vector.broadcast %cst_9 : f32 to vector<32x128xf32>
      %c0_10 = arith.constant 0 : index
      %c0_11 = arith.constant 0 : index
      %13 = vector.load %arg7[%c0_10, %c0_11] : memref<32x128xf32, #tpu.memory_space<vmem>>, vector<32x128xf32>
      tpu.vector_store %arg7[%c0_10, %c0_11], %12 {strides = array<i32>} : memref<32x128xf32, #tpu.memory_space<vmem>>, vector<32x128xf32>,
    } else {
    }
    %c0 = arith.constant 0 : index
    %c0_1 = arith.constant 0 : index
    %3 = vector.load %arg7[%c0, %c0_1] : memref<32x128xf32, #tpu.memory_space<vmem>>, vector<32x128xf32>
    %c0_2 = arith.constant 0 : index
    %c0_3 = arith.constant 0 : index
    %4 = vector.load %arg3[%c0_2, %c0_3] : memref<32x384xbf16, #tpu.memory_space<vmem>>, vector<32x384xbf16>
    %c0_4 = arith.constant 0 : index
    %c0_5 = arith.constant 0 : index
    %5 = vector.load %arg4[%c0_4, %c0_5] : memref<384x128xbf16, #tpu.memory_space<vmem>>, vector<384x128xbf16>
    %cst = arith.constant dense<0.000000e+00> : vector<32x128xf32>
    %6 = tpu.matmul %4, %5, %cst {dimension_numbers = #tpu.dot_dimension_numbers<[1], [0], [0], [1], [0, 0, 1, 1], [], []>} : vector<32x384xbf16>, vector<384x128xbf16>, vector<32x128xf32> -> vector<32x128xf32>
    %7 = arith.addf %3, %6 : vector<32x128xf32>
    %c0_6 = arith.constant 0 : index
    %c0_7 = arith.constant 0 : index
    %8 = vector.load %arg7[%c0_6, %c0_7] : memref<32x128xf32, #tpu.memory_space<vmem>>, vector<32x128xf32>
    tpu.vector_store %arg7[%c0_6, %c0_7], %7 {strides = array<i32>} : memref<32x128xf32, #tpu.memory_space<vmem>>, vector<32x128xf32>,
    %c5_i32 = arith.constant 5 : i32
    %9 = arith.cmpi eq, %arg2, %c5_i32 : i32
    %10 = arith.extui %9 : i1 to i32
    %c0_i32_8 = arith.constant 0 : i32
    %11 = arith.cmpi ne, %10, %c0_i32_8 : i32
    scf.if %11 {
      %c0_9 = arith.constant 0 : index
      %c0_10 = arith.constant 0 : index
      %12 = vector.load %arg7[%c0_9, %c0_10] : memref<32x128xf32, #tpu.memory_space<vmem>>, vector<32x128xf32>
      %cst_11 = arith.constant 1.000000e+00 : f32
      %13 = vector.broadcast %cst_11 : f32 to vector<32x128xf32>
      %14 = arith.mulf %12, %13 : vector<32x128xf32>
      %c0_12 = arith.constant 0 : index
      %c0_13 = arith.constant 0 : index
      %15 = vector.load %arg5[%c0_12, %c0_13] : memref<1x128xf32, #tpu.memory_space<vmem>>, vector<1x128xf32>
      %16 = vector.broadcast %15 : vector<1x128xf32> to vector<32x128xf32>
      %17 = arith.addf %14, %16 : vector<32x128xf32>
      %cst_14 = arith.constant 0.000000e+00 : f32
      %18 = vector.broadcast %cst_14 : f32 to vector<32x128xf32>
      %19 = arith.maximumf %17, %18 : vector<32x128xf32>
      %c0_15 = arith.constant 0 : index
      %c0_16 = arith.constant 0 : index
      %20 = vector.load %arg6[%c0_15, %c0_16] : memref<32x128xf32, #tpu.memory_space<vmem>>, vector<32x128xf32>
      tpu.vector_store %arg6[%c0_15, %c0_16], %19 {strides = array<i32>} : memref<32x128xf32, #tpu.memory_space<vmem>>, vector<32x128xf32>,
    } else {
    }
    return
  }
  func.func @transform_0(%arg0: i32, %arg1: i32, %arg2: i32) -> (i32, i32) {
    %c0_i32 = arith.constant 0 : i32
    return %arg0, %arg2 : i32, i32
  }
  func.func @transform_1(%arg0: i32, %arg1: i32, %arg2: i32) -> (i32, i32) {
    %c0_i32 = arith.constant 0 : i32
    return %arg2, %arg1 : i32, i32
  }
  func.func @transform_2(%arg0: i32, %arg1: i32, %arg2: i32) -> (i32, i32) {
    %c0_i32 = arith.constant 0 : i32
    %c0_i32_0 = arith.constant 0 : i32
    return %c0_i32, %arg1 : i32, i32
  }
  func.func @transform_3(%arg0: i32, %arg1: i32, %arg2: i32) -> (i32, i32) {
    %c0_i32 = arith.constant 0 : i32
    return %arg0, %arg1 : i32, i32
  }
}

module attributes {stable_mosaic.version = 11 : i64} {
  func.func @_mm_kernel(%arg0: i32, %arg1: i32, %arg2: i32, %arg3: memref<32x256xbf16, #tpu.memory_space<vmem>>, %arg4: memref<256x128xbf16, #tpu.memory_space<vmem>>, %arg5: memref<1x128xf32, #tpu.memory_space<vmem>>, %arg6: memref<32x128xf32, #tpu.memory_space<vmem>>, %arg7: memref<32x128xf32, #tpu.memory_space<vmem>>) attributes {dimension_semantics = [#tpu.dimension_semantics<parallel>, #tpu.dimension_semantics<parallel>, #tpu.dimension_semantics<arbitrary>], iteration_bounds = array<i64: 1, 1, 5>, scalar_prefetch = 0 : i64, scratch_operands = 1 : i64, tpu.core_type = #tpu.core_type<tc>, window_params = [{transform_indices = @transform_0, window_bounds = array<i64: 32, 256>}, {transform_indices = @transform_1, window_bounds = array<i64: 256, 128>}, {transform_indices = @transform_2, window_bounds = array<i64: 1, 128>}, {transform_indices = @transform_3, window_bounds = array<i64: 32, 128>}]} {
    %c0_i32 = arith.constant 0 : i32
    %0 = arith.cmpi eq, %arg2, %c0_i32 : i32
    %1 = arith.extui %0 : i1 to i32
    %c0_i32_0 = arith.constant 0 : i32
    %2 = arith.cmpi ne, %1, %c0_i32_0 : i32
    scf.if %2 {
      %cst_9 = arith.constant 0.000000e+00 : f32
      %12 = vector.broadcast %cst_9 : f32 to vector<32x128xf32>
      %c0_10 = arith.constant 0 : index
      %c0_11 = arith.constant 0 : index
      %13 = vector.load %arg7[%c0_10, %c0_11] : memref<32x128xf32, #tpu.memory_space<vmem>>, vector<32x128xf32>
      tpu.vector_store %arg7[%c0_10, %c0_11], %12 {strides = array<i32>} : memref<32x128xf32, #tpu.memory_space<vmem>>, vector<32x128xf32>,
    } else {
    }
    %c0 = arith.constant 0 : index
    %c0_1 = arith.constant 0 : index
    %3 = vector.load %arg7[%c0, %c0_1] : memref<32x128xf32, #tpu.memory_space<vmem>>, vector<32x128xf32>
    %c0_2 = arith.constant 0 : index
    %c0_3 = arith.constant 0 : index
    %4 = vector.load %arg3[%c0_2, %c0_3] : memref<32x256xbf16, #tpu.memory_space<vmem>>, vector<32x256xbf16>
    %c0_4 = arith.constant 0 : index
    %c0_5 = arith.constant 0 : index
    %5 = vector.load %arg4[%c0_4, %c0_5] : memref<256x128xbf16, #tpu.memory_space<vmem>>, vector<256x128xbf16>
    %cst = arith.constant dense<0.000000e+00> : vector<32x128xf32>
    %6 = tpu.matmul %4, %5, %cst {dimension_numbers = #tpu.dot_dimension_numbers<[1], [0], [0], [1], [0, 0, 1, 1], [], []>} : vector<32x256xbf16>, vector<256x128xbf16>, vector<32x128xf32> -> vector<32x128xf32>
    %7 = arith.addf %3, %6 : vector<32x128xf32>
    %c0_6 = arith.constant 0 : index
    %c0_7 = arith.constant 0 : index
    %8 = vector.load %arg7[%c0_6, %c0_7] : memref<32x128xf32, #tpu.memory_space<vmem>>, vector<32x128xf32>
    tpu.vector_store %arg7[%c0_6, %c0_7], %7 {strides = array<i32>} : memref<32x128xf32, #tpu.memory_space<vmem>>, vector<32x128xf32>,
    %c4_i32 = arith.constant 4 : i32
    %9 = arith.cmpi eq, %arg2, %c4_i32 : i32
    %10 = arith.extui %9 : i1 to i32
    %c0_i32_8 = arith.constant 0 : i32
    %11 = arith.cmpi ne, %10, %c0_i32_8 : i32
    scf.if %11 {
      %c0_9 = arith.constant 0 : index
      %c0_10 = arith.constant 0 : index
      %12 = vector.load %arg7[%c0_9, %c0_10] : memref<32x128xf32, #tpu.memory_space<vmem>>, vector<32x128xf32>
      %cst_11 = arith.constant 1.000000e+00 : f32
      %13 = vector.broadcast %cst_11 : f32 to vector<32x128xf32>
      %14 = arith.mulf %12, %13 : vector<32x128xf32>
      %c0_12 = arith.constant 0 : index
      %c0_13 = arith.constant 0 : index
      %15 = vector.load %arg5[%c0_12, %c0_13] : memref<1x128xf32, #tpu.memory_space<vmem>>, vector<1x128xf32>
      %16 = vector.broadcast %15 : vector<1x128xf32> to vector<32x128xf32>
      %17 = arith.addf %14, %16 : vector<32x128xf32>
      %18 = arith.negf %17 : vector<32x128xf32>
      %19 = math.exp %18 : vector<32x128xf32>
      %cst_14 = arith.constant 1.000000e+00 : f32
      %20 = vector.broadcast %cst_14 : f32 to vector<32x128xf32>
      %21 = arith.addf %20, %19 : vector<32x128xf32>
      %22 = arith.divf %20, %21 : vector<32x128xf32>
      %c0_15 = arith.constant 0 : index
      %c0_16 = arith.constant 0 : index
      %23 = vector.load %arg6[%c0_15, %c0_16] : memref<32x128xf32, #tpu.memory_space<vmem>>, vector<32x128xf32>
      tpu.vector_store %arg6[%c0_15, %c0_16], %22 {strides = array<i32>} : memref<32x128xf32, #tpu.memory_space<vmem>>, vector<32x128xf32>,
    } else {
    }
    return
  }
  func.func @transform_0(%arg0: i32, %arg1: i32, %arg2: i32) -> (i32, i32) {
    %c0_i32 = arith.constant 0 : i32
    return %arg0, %arg2 : i32, i32
  }
  func.func @transform_1(%arg0: i32, %arg1: i32, %arg2: i32) -> (i32, i32) {
    %c0_i32 = arith.constant 0 : i32
    return %arg2, %arg1 : i32, i32
  }
  func.func @transform_2(%arg0: i32, %arg1: i32, %arg2: i32) -> (i32, i32) {
    %c0_i32 = arith.constant 0 : i32
    %c0_i32_0 = arith.constant 0 : i32
    return %c0_i32, %arg1 : i32, i32
  }
  func.func @transform_3(%arg0: i32, %arg1: i32, %arg2: i32) -> (i32, i32) {
    %c0_i32 = arith.constant 0 : i32
    return %arg0, %arg1 : i32, i32
  }
}

module attributes {stable_mosaic.version = 11 : i64} {
  func.func @_mm_gru_kernel(%arg0: i32, %arg1: i32, %arg2: i32, %arg3: memref<32x256xbf16, #tpu.memory_space<vmem>>, %arg4: memref<256x128xbf16, #tpu.memory_space<vmem>>, %arg5: memref<1x128xf32, #tpu.memory_space<vmem>>, %arg6: memref<32x128xf32, #tpu.memory_space<vmem>>, %arg7: memref<32x128xf32, #tpu.memory_space<vmem>>, %arg8: memref<32x128xf32, #tpu.memory_space<vmem>>, %arg9: memref<32x128xf32, #tpu.memory_space<vmem>>) attributes {dimension_semantics = [#tpu.dimension_semantics<parallel>, #tpu.dimension_semantics<parallel>, #tpu.dimension_semantics<arbitrary>], iteration_bounds = array<i64: 1, 1, 5>, scalar_prefetch = 0 : i64, scratch_operands = 1 : i64, tpu.core_type = #tpu.core_type<tc>, window_params = [{transform_indices = @transform_0, window_bounds = array<i64: 32, 256>}, {transform_indices = @transform_1, window_bounds = array<i64: 256, 128>}, {transform_indices = @transform_2, window_bounds = array<i64: 1, 128>}, {transform_indices = @transform_3, window_bounds = array<i64: 32, 128>}, {transform_indices = @transform_4, window_bounds = array<i64: 32, 128>}, {transform_indices = @transform_5, window_bounds = array<i64: 32, 128>}]} {
    %c0_i32 = arith.constant 0 : i32
    %0 = arith.cmpi eq, %arg2, %c0_i32 : i32
    %1 = arith.extui %0 : i1 to i32
    %c0_i32_0 = arith.constant 0 : i32
    %2 = arith.cmpi ne, %1, %c0_i32_0 : i32
    scf.if %2 {
      %cst_9 = arith.constant 0.000000e+00 : f32
      %12 = vector.broadcast %cst_9 : f32 to vector<32x128xf32>
      %c0_10 = arith.constant 0 : index
      %c0_11 = arith.constant 0 : index
      %13 = vector.load %arg9[%c0_10, %c0_11] : memref<32x128xf32, #tpu.memory_space<vmem>>, vector<32x128xf32>
      tpu.vector_store %arg9[%c0_10, %c0_11], %12 {strides = array<i32>} : memref<32x128xf32, #tpu.memory_space<vmem>>, vector<32x128xf32>,
    } else {
    }
    %c0 = arith.constant 0 : index
    %c0_1 = arith.constant 0 : index
    %3 = vector.load %arg9[%c0, %c0_1] : memref<32x128xf32, #tpu.memory_space<vmem>>, vector<32x128xf32>
    %c0_2 = arith.constant 0 : index
    %c0_3 = arith.constant 0 : index
    %4 = vector.load %arg3[%c0_2, %c0_3] : memref<32x256xbf16, #tpu.memory_space<vmem>>, vector<32x256xbf16>
    %c0_4 = arith.constant 0 : index
    %c0_5 = arith.constant 0 : index
    %5 = vector.load %arg4[%c0_4, %c0_5] : memref<256x128xbf16, #tpu.memory_space<vmem>>, vector<256x128xbf16>
    %cst = arith.constant dense<0.000000e+00> : vector<32x128xf32>
    %6 = tpu.matmul %4, %5, %cst {dimension_numbers = #tpu.dot_dimension_numbers<[1], [0], [0], [1], [0, 0, 1, 1], [], []>} : vector<32x256xbf16>, vector<256x128xbf16>, vector<32x128xf32> -> vector<32x128xf32>
    %7 = arith.addf %3, %6 : vector<32x128xf32>
    %c0_6 = arith.constant 0 : index
    %c0_7 = arith.constant 0 : index
    %8 = vector.load %arg9[%c0_6, %c0_7] : memref<32x128xf32, #tpu.memory_space<vmem>>, vector<32x128xf32>
    tpu.vector_store %arg9[%c0_6, %c0_7], %7 {strides = array<i32>} : memref<32x128xf32, #tpu.memory_space<vmem>>, vector<32x128xf32>,
    %c4_i32 = arith.constant 4 : i32
    %9 = arith.cmpi eq, %arg2, %c4_i32 : i32
    %10 = arith.extui %9 : i1 to i32
    %c0_i32_8 = arith.constant 0 : i32
    %11 = arith.cmpi ne, %10, %c0_i32_8 : i32
    scf.if %11 {
      %c0_9 = arith.constant 0 : index
      %c0_10 = arith.constant 0 : index
      %12 = vector.load %arg9[%c0_9, %c0_10] : memref<32x128xf32, #tpu.memory_space<vmem>>, vector<32x128xf32>
      %cst_11 = arith.constant 1.000000e+00 : f32
      %13 = vector.broadcast %cst_11 : f32 to vector<32x128xf32>
      %14 = arith.mulf %12, %13 : vector<32x128xf32>
      %c0_12 = arith.constant 0 : index
      %c0_13 = arith.constant 0 : index
      %15 = vector.load %arg5[%c0_12, %c0_13] : memref<1x128xf32, #tpu.memory_space<vmem>>, vector<1x128xf32>
      %16 = vector.broadcast %15 : vector<1x128xf32> to vector<32x128xf32>
      %17 = arith.addf %14, %16 : vector<32x128xf32>
      %18 = math.tanh %17 : vector<32x128xf32>
      %c0_14 = arith.constant 0 : index
      %c0_15 = arith.constant 0 : index
      %19 = vector.load %arg7[%c0_14, %c0_15] : memref<32x128xf32, #tpu.memory_space<vmem>>, vector<32x128xf32>
      %cst_16 = arith.constant 1.000000e+00 : f32
      %20 = vector.broadcast %cst_16 : f32 to vector<32x128xf32>
      %21 = arith.subf %20, %19 : vector<32x128xf32>
      %c0_17 = arith.constant 0 : index
      %c0_18 = arith.constant 0 : index
      %22 = vector.load %arg6[%c0_17, %c0_18] : memref<32x128xf32, #tpu.memory_space<vmem>>, vector<32x128xf32>
      %23 = arith.mulf %21, %22 : vector<32x128xf32>
      %24 = arith.mulf %19, %18 : vector<32x128xf32>
      %25 = arith.addf %23, %24 : vector<32x128xf32>
      %c0_19 = arith.constant 0 : index
      %c0_20 = arith.constant 0 : index
      %26 = vector.load %arg8[%c0_19, %c0_20] : memref<32x128xf32, #tpu.memory_space<vmem>>, vector<32x128xf32>
      tpu.vector_store %arg8[%c0_19, %c0_20], %25 {strides = array<i32>} : memref<32x128xf32, #tpu.memory_space<vmem>>, vector<32x128xf32>,
    } else {
    }
    return
  }
  func.func @transform_0(%arg0: i32, %arg1: i32, %arg2: i32) -> (i32, i32) {
    %c0_i32 = arith.constant 0 : i32
    return %arg0, %arg2 : i32, i32
  }
  func.func @transform_1(%arg0: i32, %arg1: i32, %arg2: i32) -> (i32, i32) {
    %c0_i32 = arith.constant 0 : i32
    return %arg2, %arg1 : i32, i32
  }
  func.func @transform_2(%arg0: i32, %arg1: i32, %arg2: i32) -> (i32, i32) {
    %c0_i32 = arith.constant 0 : i32
    %c0_i32_0 = arith.constant 0 : i32
    return %c0_i32, %arg1 : i32, i32
  }
  func.func @transform_3(%arg0: i32, %arg1: i32, %arg2: i32) -> (i32, i32) {
    %c0_i32 = arith.constant 0 : i32
    return %arg0, %arg1 : i32, i32
  }
  func.func @transform_4(%arg0: i32, %arg1: i32, %arg2: i32) -> (i32, i32) {
    %c0_i32 = arith.constant 0 : i32
    return %arg0, %arg1 : i32, i32
  }
  func.func @transform_5(%arg0: i32, %arg1: i32, %arg2: i32) -> (i32, i32) {
    %c0_i32 = arith.constant 0 : i32
    return %arg0, %arg1 : i32, i32
  }
}

module attributes {stable_mosaic.version = 11 : i64} {
  func.func @_mm_kernel(%arg0: i32, %arg1: i32, %arg2: i32, %arg3: memref<32x128xbf16, #tpu.memory_space<vmem>>, %arg4: memref<128x512xbf16, #tpu.memory_space<vmem>>, %arg5: memref<1x512xf32, #tpu.memory_space<vmem>>, %arg6: memref<32x512xf32, #tpu.memory_space<vmem>>, %arg7: memref<32x512xf32, #tpu.memory_space<vmem>>) attributes {dimension_semantics = [#tpu.dimension_semantics<parallel>, #tpu.dimension_semantics<parallel>, #tpu.dimension_semantics<arbitrary>], iteration_bounds = array<i64: 1, 1, 5>, scalar_prefetch = 0 : i64, scratch_operands = 1 : i64, tpu.core_type = #tpu.core_type<tc>, window_params = [{transform_indices = @transform_0, window_bounds = array<i64: 32, 128>}, {transform_indices = @transform_1, window_bounds = array<i64: 128, 512>}, {transform_indices = @transform_2, window_bounds = array<i64: 1, 512>}, {transform_indices = @transform_3, window_bounds = array<i64: 32, 512>}]} {
    %c0_i32 = arith.constant 0 : i32
    %0 = arith.cmpi eq, %arg2, %c0_i32 : i32
    %1 = arith.extui %0 : i1 to i32
    %c0_i32_0 = arith.constant 0 : i32
    %2 = arith.cmpi ne, %1, %c0_i32_0 : i32
    scf.if %2 {
      %cst_9 = arith.constant 0.000000e+00 : f32
      %12 = vector.broadcast %cst_9 : f32 to vector<32x512xf32>
      %c0_10 = arith.constant 0 : index
      %c0_11 = arith.constant 0 : index
      %13 = vector.load %arg7[%c0_10, %c0_11] : memref<32x512xf32, #tpu.memory_space<vmem>>, vector<32x512xf32>
      tpu.vector_store %arg7[%c0_10, %c0_11], %12 {strides = array<i32>} : memref<32x512xf32, #tpu.memory_space<vmem>>, vector<32x512xf32>,
    } else {
    }
    %c0 = arith.constant 0 : index
    %c0_1 = arith.constant 0 : index
    %3 = vector.load %arg7[%c0, %c0_1] : memref<32x512xf32, #tpu.memory_space<vmem>>, vector<32x512xf32>
    %c0_2 = arith.constant 0 : index
    %c0_3 = arith.constant 0 : index
    %4 = vector.load %arg3[%c0_2, %c0_3] : memref<32x128xbf16, #tpu.memory_space<vmem>>, vector<32x128xbf16>
    %c0_4 = arith.constant 0 : index
    %c0_5 = arith.constant 0 : index
    %5 = vector.load %arg4[%c0_4, %c0_5] : memref<128x512xbf16, #tpu.memory_space<vmem>>, vector<128x512xbf16>
    %cst = arith.constant dense<0.000000e+00> : vector<32x512xf32>
    %6 = tpu.matmul %4, %5, %cst {dimension_numbers = #tpu.dot_dimension_numbers<[1], [0], [0], [1], [0, 0, 1, 1], [], []>} : vector<32x128xbf16>, vector<128x512xbf16>, vector<32x512xf32> -> vector<32x512xf32>
    %7 = arith.addf %3, %6 : vector<32x512xf32>
    %c0_6 = arith.constant 0 : index
    %c0_7 = arith.constant 0 : index
    %8 = vector.load %arg7[%c0_6, %c0_7] : memref<32x512xf32, #tpu.memory_space<vmem>>, vector<32x512xf32>
    tpu.vector_store %arg7[%c0_6, %c0_7], %7 {strides = array<i32>} : memref<32x512xf32, #tpu.memory_space<vmem>>, vector<32x512xf32>,
    %c4_i32 = arith.constant 4 : i32
    %9 = arith.cmpi eq, %arg2, %c4_i32 : i32
    %10 = arith.extui %9 : i1 to i32
    %c0_i32_8 = arith.constant 0 : i32
    %11 = arith.cmpi ne, %10, %c0_i32_8 : i32
    scf.if %11 {
      %c0_9 = arith.constant 0 : index
      %c0_10 = arith.constant 0 : index
      %12 = vector.load %arg7[%c0_9, %c0_10] : memref<32x512xf32, #tpu.memory_space<vmem>>, vector<32x512xf32>
      %cst_11 = arith.constant 1.000000e+00 : f32
      %13 = vector.broadcast %cst_11 : f32 to vector<32x512xf32>
      %14 = arith.mulf %12, %13 : vector<32x512xf32>
      %c0_12 = arith.constant 0 : index
      %c0_13 = arith.constant 0 : index
      %15 = vector.load %arg5[%c0_12, %c0_13] : memref<1x512xf32, #tpu.memory_space<vmem>>, vector<1x512xf32>
      %16 = vector.broadcast %15 : vector<1x512xf32> to vector<32x512xf32>
      %17 = arith.addf %14, %16 : vector<32x512xf32>
      %cst_14 = arith.constant 0.000000e+00 : f32
      %18 = vector.broadcast %cst_14 : f32 to vector<32x512xf32>
      %19 = arith.maximumf %17, %18 : vector<32x512xf32>
      %c0_15 = arith.constant 0 : index
      %c0_16 = arith.constant 0 : index
      %20 = vector.load %arg6[%c0_15, %c0_16] : memref<32x512xf32, #tpu.memory_space<vmem>>, vector<32x512xf32>
      tpu.vector_store %arg6[%c0_15, %c0_16], %19 {strides = array<i32>} : memref<32x512xf32, #tpu.memory_space<vmem>>, vector<32x512xf32>,
    } else {
    }
    return
  }
  func.func @transform_0(%arg0: i32, %arg1: i32, %arg2: i32) -> (i32, i32) {
    %c0_i32 = arith.constant 0 : i32
    return %arg0, %arg2 : i32, i32
  }
  func.func @transform_1(%arg0: i32, %arg1: i32, %arg2: i32) -> (i32, i32) {
    %c0_i32 = arith.constant 0 : i32
    return %arg2, %arg1 : i32, i32
  }
  func.func @transform_2(%arg0: i32, %arg1: i32, %arg2: i32) -> (i32, i32) {
    %c0_i32 = arith.constant 0 : i32
    %c0_i32_0 = arith.constant 0 : i32
    return %c0_i32, %arg1 : i32, i32
  }
  func.func @transform_3(%arg0: i32, %arg1: i32, %arg2: i32) -> (i32, i32) {
    %c0_i32 = arith.constant 0 : i32
    return %arg0, %arg1 : i32, i32
  }
}

module attributes {stable_mosaic.version = 11 : i64} {
  func.func @_mm_kernel(%arg0: i32, %arg1: i32, %arg2: i32, %arg3: memref<32x384xbf16, #tpu.memory_space<vmem>>, %arg4: memref<384x128xbf16, #tpu.memory_space<vmem>>, %arg5: memref<1x128xf32, #tpu.memory_space<vmem>>, %arg6: memref<32x128xf32, #tpu.memory_space<vmem>>, %arg7: memref<32x128xf32, #tpu.memory_space<vmem>>) attributes {dimension_semantics = [#tpu.dimension_semantics<parallel>, #tpu.dimension_semantics<parallel>, #tpu.dimension_semantics<arbitrary>], iteration_bounds = array<i64: 1, 1, 6>, scalar_prefetch = 0 : i64, scratch_operands = 1 : i64, tpu.core_type = #tpu.core_type<tc>, window_params = [{transform_indices = @transform_0, window_bounds = array<i64: 32, 384>}, {transform_indices = @transform_1, window_bounds = array<i64: 384, 128>}, {transform_indices = @transform_2, window_bounds = array<i64: 1, 128>}, {transform_indices = @transform_3, window_bounds = array<i64: 32, 128>}]} {
    %c0_i32 = arith.constant 0 : i32
    %0 = arith.cmpi eq, %arg2, %c0_i32 : i32
    %1 = arith.extui %0 : i1 to i32
    %c0_i32_0 = arith.constant 0 : i32
    %2 = arith.cmpi ne, %1, %c0_i32_0 : i32
    scf.if %2 {
      %cst_9 = arith.constant 0.000000e+00 : f32
      %12 = vector.broadcast %cst_9 : f32 to vector<32x128xf32>
      %c0_10 = arith.constant 0 : index
      %c0_11 = arith.constant 0 : index
      %13 = vector.load %arg7[%c0_10, %c0_11] : memref<32x128xf32, #tpu.memory_space<vmem>>, vector<32x128xf32>
      tpu.vector_store %arg7[%c0_10, %c0_11], %12 {strides = array<i32>} : memref<32x128xf32, #tpu.memory_space<vmem>>, vector<32x128xf32>,
    } else {
    }
    %c0 = arith.constant 0 : index
    %c0_1 = arith.constant 0 : index
    %3 = vector.load %arg7[%c0, %c0_1] : memref<32x128xf32, #tpu.memory_space<vmem>>, vector<32x128xf32>
    %c0_2 = arith.constant 0 : index
    %c0_3 = arith.constant 0 : index
    %4 = vector.load %arg3[%c0_2, %c0_3] : memref<32x384xbf16, #tpu.memory_space<vmem>>, vector<32x384xbf16>
    %c0_4 = arith.constant 0 : index
    %c0_5 = arith.constant 0 : index
    %5 = vector.load %arg4[%c0_4, %c0_5] : memref<384x128xbf16, #tpu.memory_space<vmem>>, vector<384x128xbf16>
    %cst = arith.constant dense<0.000000e+00> : vector<32x128xf32>
    %6 = tpu.matmul %4, %5, %cst {dimension_numbers = #tpu.dot_dimension_numbers<[1], [0], [0], [1], [0, 0, 1, 1], [], []>} : vector<32x384xbf16>, vector<384x128xbf16>, vector<32x128xf32> -> vector<32x128xf32>
    %7 = arith.addf %3, %6 : vector<32x128xf32>
    %c0_6 = arith.constant 0 : index
    %c0_7 = arith.constant 0 : index
    %8 = vector.load %arg7[%c0_6, %c0_7] : memref<32x128xf32, #tpu.memory_space<vmem>>, vector<32x128xf32>
    tpu.vector_store %arg7[%c0_6, %c0_7], %7 {strides = array<i32>} : memref<32x128xf32, #tpu.memory_space<vmem>>, vector<32x128xf32>,
    %c5_i32 = arith.constant 5 : i32
    %9 = arith.cmpi eq, %arg2, %c5_i32 : i32
    %10 = arith.extui %9 : i1 to i32
    %c0_i32_8 = arith.constant 0 : i32
    %11 = arith.cmpi ne, %10, %c0_i32_8 : i32
    scf.if %11 {
      %c0_9 = arith.constant 0 : index
      %c0_10 = arith.constant 0 : index
      %12 = vector.load %arg7[%c0_9, %c0_10] : memref<32x128xf32, #tpu.memory_space<vmem>>, vector<32x128xf32>
      %cst_11 = arith.constant 1.000000e+00 : f32
      %13 = vector.broadcast %cst_11 : f32 to vector<32x128xf32>
      %14 = arith.mulf %12, %13 : vector<32x128xf32>
      %c0_12 = arith.constant 0 : index
      %c0_13 = arith.constant 0 : index
      %15 = vector.load %arg5[%c0_12, %c0_13] : memref<1x128xf32, #tpu.memory_space<vmem>>, vector<1x128xf32>
      %16 = vector.broadcast %15 : vector<1x128xf32> to vector<32x128xf32>
      %17 = arith.addf %14, %16 : vector<32x128xf32>
      %c0_14 = arith.constant 0 : index
      %c0_15 = arith.constant 0 : index
      %18 = vector.load %arg6[%c0_14, %c0_15] : memref<32x128xf32, #tpu.memory_space<vmem>>, vector<32x128xf32>
      tpu.vector_store %arg6[%c0_14, %c0_15], %17 {strides = array<i32>} : memref<32x128xf32, #tpu.memory_space<vmem>>, vector<32x128xf32>,
    } else {
    }
    return
  }
  func.func @transform_0(%arg0: i32, %arg1: i32, %arg2: i32) -> (i32, i32) {
    %c0_i32 = arith.constant 0 : i32
    return %arg0, %arg2 : i32, i32
  }
  func.func @transform_1(%arg0: i32, %arg1: i32, %arg2: i32) -> (i32, i32) {
    %c0_i32 = arith.constant 0 : i32
    return %arg2, %arg1 : i32, i32
  }
  func.func @transform_2(%arg0: i32, %arg1: i32, %arg2: i32) -> (i32, i32) {
    %c0_i32 = arith.constant 0 : i32
    %c0_i32_0 = arith.constant 0 : i32
    return %c0_i32, %arg1 : i32, i32
  }
  func.func @transform_3(%arg0: i32, %arg1: i32, %arg2: i32) -> (i32, i32) {
    %c0_i32 = arith.constant 0 : i32
    return %arg0, %arg1 : i32, i32
  }
}

module attributes {stable_mosaic.version = 11 : i64} {
  func.func @_mm_kernel(%arg0: i32, %arg1: i32, %arg2: i32, %arg3: memref<32x256xbf16, #tpu.memory_space<vmem>>, %arg4: memref<256x128xbf16, #tpu.memory_space<vmem>>, %arg5: memref<1x128xf32, #tpu.memory_space<vmem>>, %arg6: memref<32x128xf32, #tpu.memory_space<vmem>>, %arg7: memref<32x128xf32, #tpu.memory_space<vmem>>) attributes {dimension_semantics = [#tpu.dimension_semantics<parallel>, #tpu.dimension_semantics<parallel>, #tpu.dimension_semantics<arbitrary>], iteration_bounds = array<i64: 1, 5, 1>, scalar_prefetch = 0 : i64, scratch_operands = 1 : i64, tpu.core_type = #tpu.core_type<tc>, window_params = [{transform_indices = @transform_0, window_bounds = array<i64: 32, 256>}, {transform_indices = @transform_1, window_bounds = array<i64: 256, 128>}, {transform_indices = @transform_2, window_bounds = array<i64: 1, 128>}, {transform_indices = @transform_3, window_bounds = array<i64: 32, 128>}]} {
    %c0_i32 = arith.constant 0 : i32
    %0 = arith.cmpi eq, %arg2, %c0_i32 : i32
    %1 = arith.extui %0 : i1 to i32
    %c0_i32_0 = arith.constant 0 : i32
    %2 = arith.cmpi ne, %1, %c0_i32_0 : i32
    scf.if %2 {
      %cst_10 = arith.constant 0.000000e+00 : f32
      %12 = vector.broadcast %cst_10 : f32 to vector<32x128xf32>
      %c0_11 = arith.constant 0 : index
      %c0_12 = arith.constant 0 : index
      %13 = vector.load %arg7[%c0_11, %c0_12] : memref<32x128xf32, #tpu.memory_space<vmem>>, vector<32x128xf32>
      tpu.vector_store %arg7[%c0_11, %c0_12], %12 {strides = array<i32>} : memref<32x128xf32, #tpu.memory_space<vmem>>, vector<32x128xf32>,
    } else {
    }
    %c0 = arith.constant 0 : index
    %c0_1 = arith.constant 0 : index
    %3 = vector.load %arg7[%c0, %c0_1] : memref<32x128xf32, #tpu.memory_space<vmem>>, vector<32x128xf32>
    %c0_2 = arith.constant 0 : index
    %c0_3 = arith.constant 0 : index
    %4 = vector.load %arg3[%c0_2, %c0_3] : memref<32x256xbf16, #tpu.memory_space<vmem>>, vector<32x256xbf16>
    %c0_4 = arith.constant 0 : index
    %c0_5 = arith.constant 0 : index
    %5 = vector.load %arg4[%c0_4, %c0_5] : memref<256x128xbf16, #tpu.memory_space<vmem>>, vector<256x128xbf16>
    %cst = arith.constant dense<0.000000e+00> : vector<32x128xf32>
    %6 = tpu.matmul %4, %5, %cst {dimension_numbers = #tpu.dot_dimension_numbers<[1], [0], [0], [1], [0, 0, 1, 1], [], []>} : vector<32x256xbf16>, vector<256x128xbf16>, vector<32x128xf32> -> vector<32x128xf32>
    %7 = arith.addf %3, %6 : vector<32x128xf32>
    %c0_6 = arith.constant 0 : index
    %c0_7 = arith.constant 0 : index
    %8 = vector.load %arg7[%c0_6, %c0_7] : memref<32x128xf32, #tpu.memory_space<vmem>>, vector<32x128xf32>
    tpu.vector_store %arg7[%c0_6, %c0_7], %7 {strides = array<i32>} : memref<32x128xf32, #tpu.memory_space<vmem>>, vector<32x128xf32>,
    %c0_i32_8 = arith.constant 0 : i32
    %9 = arith.cmpi eq, %arg2, %c0_i32_8 : i32
    %10 = arith.extui %9 : i1 to i32
    %c0_i32_9 = arith.constant 0 : i32
    %11 = arith.cmpi ne, %10, %c0_i32_9 : i32
    scf.if %11 {
      %c0_10 = arith.constant 0 : index
      %c0_11 = arith.constant 0 : index
      %12 = vector.load %arg7[%c0_10, %c0_11] : memref<32x128xf32, #tpu.memory_space<vmem>>, vector<32x128xf32>
      %cst_12 = arith.constant 1.000000e+00 : f32
      %13 = vector.broadcast %cst_12 : f32 to vector<32x128xf32>
      %14 = arith.mulf %12, %13 : vector<32x128xf32>
      %c0_13 = arith.constant 0 : index
      %c0_14 = arith.constant 0 : index
      %15 = vector.load %arg5[%c0_13, %c0_14] : memref<1x128xf32, #tpu.memory_space<vmem>>, vector<1x128xf32>
      %16 = vector.broadcast %15 : vector<1x128xf32> to vector<32x128xf32>
      %17 = arith.addf %14, %16 : vector<32x128xf32>
      %c0_15 = arith.constant 0 : index
      %c0_16 = arith.constant 0 : index
      %18 = vector.load %arg6[%c0_15, %c0_16] : memref<32x128xf32, #tpu.memory_space<vmem>>, vector<32x128xf32>
      tpu.vector_store %arg6[%c0_15, %c0_16], %17 {strides = array<i32>} : memref<32x128xf32, #tpu.memory_space<vmem>>, vector<32x128xf32>,
    } else {
    }
    return
  }
  func.func @transform_0(%arg0: i32, %arg1: i32, %arg2: i32) -> (i32, i32) {
    %c0_i32 = arith.constant 0 : i32
    return %arg0, %arg2 : i32, i32
  }
  func.func @transform_1(%arg0: i32, %arg1: i32, %arg2: i32) -> (i32, i32) {
    %c0_i32 = arith.constant 0 : i32
    return %arg2, %arg1 : i32, i32
  }
  func.func @transform_2(%arg0: i32, %arg1: i32, %arg2: i32) -> (i32, i32) {
    %c0_i32 = arith.constant 0 : i32
    %c0_i32_0 = arith.constant 0 : i32
    return %c0_i32, %arg1 : i32, i32
  }
  func.func @transform_3(%arg0: i32, %arg1: i32, %arg2: i32) -> (i32, i32) {
    %c0_i32 = arith.constant 0 : i32
    return %arg0, %arg1 : i32, i32
  }
}

</mosaic_0001>

<bundles_post_ra>
// kernel: _lambda_.31
= control target key start
LH: loop header
LB: loop body
LE: loop exit
PB: predicated region body
PF: predicated region fallthrough
CT: control target
= control target key end

     0   :  { %s516_s9 = smov 0   ;;  %s518_s10 = smov 0   ;;  %s552_s0 = inlined_call_operand.vmem [shape: bf16[2,16,64], index: 0, kind: input, shape index: {}]   ;;  %s553_s1 = inlined_call_operand.vmem [shape: bf16[2,16,64], index: 1, kind: input, shape index: {}]   ;;  %s554_s2 = inlined_call_operand.vmem [shape: f32[2,16,16], index: 2, kind: output, shape index: {}]  }
   0x1   :  { %s520_s11 = smov 0  }
   0x2 LB: > { %s31_s12 = sadd.s32 1, %s493_s10  ;;  %p424_p0 = scmp.ge.s32.totalorder %s497_s11, 1  ;;  %s497_s11 = sphi %s520_s11, %s12_s11   ;;  %s493_s10 = sphi %s518_s10, %s556_s10   ;;  %s489_s9 = sphi %s516_s9, %s555_s9  }
   0x3   : > { %p33_p1 = scmp.ge.s32.totalorder %s31_s12, 2  ;;  %p159_p2 = scmp.lt.s32.totalorder %s497_s11, 3 }
   0x5   : > { %s558_s12 = smov (%p33_p1, %s31_s12), 0  ;;  %p160_p3 = pnand %p424_p0, %p159_p2 }
   0x6   : > { %p202_p4 = scmp.lt.s32.totalorder (!%p160_p3), %s489_s9, 1  ;;  %v499_v0 = vmov (!%p160_p3), 0.0   ;;  %vm500_vm0 = vmmov (!%p160_p3), 0   ;;  %vm249_vm1 = vcmask (!%p160_p3), 523264   ;;  %vm299_vm2 = vcmask (!%p160_p3), 130048  }
   0x7   : > { %163 = sbr.rel (%p160_p3) target bundleno = 243 (0xf3), region = 28  ;;  %441 = vmatprep.subr.bf16.mxu0 (!%p160_p3), %v499_v0  ;;  %443 = vmatprep.mubr.msk.bf16.mxu0 (!%p160_p3), %vm500_vm0, %v499_v0 }
   0xe   : > { %s560_s9 = smov (!%p202_p4, %s489_s9), 1 }
   0xf   : > { %s436_s13 = sshll.u32 %s560_s9, 3  ;;  %s438_s20 = sshll.u32 %s560_s9, 4 }
  0x10   : > { %s209_s16 = scalar_lea.vmem %s552_s0, %s436_s13  ;;  %s219_s19 = scalar_lea.vmem %s553_s1, %s436_s13 }
  0x11   : > { %v473_v1 = vld [vmem:[%s219_s19] sm:$0xff]   ;;  %s232_s23 = scalar_lea.vmem %s554_s2, %s438_s20 }
  0x12   : > { %v254_v2 = vsel %vm249_vm1, %v473_v1, 0  ;;  %v474_v3 = vld [vmem:[%s209_s16] sm:$0xff]  }
  0x13   : > { %442 = vmatpush3.bf16.xpose.msra.mxu0 %v254_v2 }
  0x1a   : > { %444 = vmatmul.mubr.msk.bf16.vlgmr.msra.gmra.mrb[0].mxu0 %vm249_vm1, %v474_v3 }
  0xed   : > { %v290_v4 = vpop.f32.mrb[0].mxu0 }
  0xee   : > { %v297_v5 = vmul.f32 0.125, %v290_v4  ;;  %v445_v6 = vpop.f32.mrb[1].mxu0 }
  0xef   : > { %v293_v7 = vpop.f32.mrb[2].mxu0 }
  0xf0   : > { %300 = vst.msk [vmem:[%s232_s23] sm:$0xff] %vm299_vm2, %v297_v5  ;;  %v298_v8 = vmul.f32 0.125, %v293_v7  ;;  %v446_v9 = vpop.f32.mrb[3].mxu0 }
  0xf2   : > { %301 = vst.msk [vmem:[%s232_s23 + $0x8] sm:$0xff] %vm299_vm2, %v298_v8 }
  0xf3 PF: > { %s12_s11 = sadd.s32 1, %s497_s11   ;;  %s555_s9 = smov %s493_s10 }
  0xf4   : > { %p9_p5 = scmp.ge.s32.totalorder %s12_s11, 4   ;;  %s556_s10 = smov %s558_s12 }
  0xf6   :  { %11 = sbr.rel (!%p9_p5) target bundleno = 2 (0x2), region = 61 }

// kernel: _lambda_.28
= control target key start
LH: loop header
LB: loop body
LE: loop exit
PB: predicated region body
PF: predicated region fallthrough
CT: control target
= control target key end

     0   :  { %s444_s1 = inlined_call_operand.vmem [shape: bf16[256,128], index: 1, kind: input, shape index: {}]   ;;  %s445_s0 = inlined_call_operand.vmem [shape: bf16[32,256], index: 0, kind: input, shape index: {}]   ;;  %s446_s2 = inlined_call_operand.vmem [shape: f32[1,128], index: 2, kind: input, shape index: {}]   ;;  %s447_s3 = inlined_call_operand.vmem [shape: f32[32,128], index: 3, kind: output, shape index: {}]  }
   0x1   :  { %v327_v0 = vld [vmem:[%s444_s1 + $0x40] sm:$0xff]   ;;  %v329_v2 = vld [vmem:[%s444_s1 + $0x48] sm:$0xff]   ;;  %v331_v4 = vld [vmem:[%s444_s1 + $0x50] sm:$0xff]  }
   0x2   :  { %v328_v1 = vld [vmem:[%s444_s1] sm:$0xff]   ;;  %283 = vmatprep.subr.bf16.mxu0 %v327_v0  ;;  %311 = vmatprep.subr.bf16.mxu1 %v327_v0  ;;  %v330_v3 = vld [vmem:[%s444_s1 + $0x8] sm:$0xff]   ;;  %v332_v5 = vld [vmem:[%s444_s1 + $0x10] sm:$0xff]  }
   0x3   :  { %284 = vmatpush3.bf16.msra.mxu0 %v328_v1  ;;  %319 = vmatpush3.bf16.msra.mxu1 %v328_v1  ;;  %v333_v6 = vld [vmem:[%s444_s1 + $0x58] sm:$0xff]   ;;  %v335_v8 = vld [vmem:[%s444_s1 + $0x60] sm:$0xff]   ;;  %v337_v10 = vld [vmem:[%s444_s1 + $0x68] sm:$0xff]  }
   0x4   :  { %285 = vmatprep.subr.bf16.mxu0 %v329_v2  ;;  %312 = vmatprep.subr.bf16.mxu1 %v329_v2  ;;  %v334_v7 = vld [vmem:[%s444_s1 + $0x18] sm:$0xff]   ;;  %v336_v9 = vld [vmem:[%s444_s1 + $0x20] sm:$0xff]   ;;  %v338_v13 = vld [vmem:[%s444_s1 + $0x28] sm:$0xff]  }
   0x5   :  { %v345_v11 = vld [vmem:[%s445_s0 + $0x4] ss:$8 sps:$4 sm:$0xff]   ;;  %v348_v12 = vld [vmem:[%s445_s0 + $0x14] ss:$8 sps:$4 sm:$0xff]   ;;  %v343_v18 = vld [vmem:[%s445_s0] ss:$8 sps:$4 sm:$0xff]  }
   0x6   :  { %v339_v14 = vld [vmem:[%s444_s1 + $0x70] sm:$0xff]   ;;  %211 = vmatprep.mubr.bf16.mxu0 %v345_v11  ;;  %219 = vmatprep.mubr.bf16.mxu1 %v348_v12  ;;  %v341_v16 = vld [vmem:[%s444_s1 + $0x78] sm:$0xff]   ;;  %v282_v23 = vld [vmem:[%s446_s2] ss:$0 sm:$0xff] }
   0x7   :  { %286 = vmatpush3.bf16.msra.mxu0 %v330_v3  ;;  %320 = vmatpush3.bf16.msra.mxu1 %v330_v3  ;;  %v340_v15 = vld [vmem:[%s444_s1 + $0x30] sm:$0xff]   ;;  %v342_v17 = vld [vmem:[%s444_s1 + $0x38] sm:$0xff]  }
   0x8   :  { %287 = vmatprep.subr.bf16.mxu0 %v331_v4  ;;  %313 = vmatprep.subr.bf16.mxu1 %v331_v4  ;;  %v346_v19 = vld [vmem:[%s445_s0 + $0x10] ss:$8 sps:$4 sm:$0xff]  }
   0xb   :  { %288 = vmatpush3.bf16.msra.mxu0 %v332_v5  ;;  %321 = vmatpush3.bf16.msra.mxu1 %v332_v5 }
   0xc   :  { %289 = vmatprep.subr.bf16.mxu0 %v333_v6  ;;  %314 = vmatprep.subr.bf16.mxu1 %v333_v6 }
   0xf   :  { %290 = vmatpush3.bf16.msra.mxu0 %v334_v7  ;;  %322 = vmatpush3.bf16.msra.mxu1 %v334_v7 }
  0x10   :  { %291 = vmatprep.subr.bf16.mxu0 %v335_v8  ;;  %315 = vmatprep.subr.bf16.mxu1 %v335_v8 }
  0x13   :  { %292 = vmatpush3.bf16.msra.mxu0 %v336_v9  ;;  %323 = vmatpush3.bf16.msra.mxu1 %v336_v9 }
  0x14   :  { %293 = vmatprep.subr.bf16.mxu0 %v337_v10  ;;  %316 = vmatprep.subr.bf16.mxu1 %v337_v10 }
  0x17   :  { %294 = vmatpush3.bf16.msra.mxu0 %v338_v13  ;;  %324 = vmatpush3.bf16.msra.mxu1 %v338_v13 }
  0x18   :  { %295 = vmatprep.subr.bf16.mxu0 %v339_v14  ;;  %317 = vmatprep.subr.bf16.mxu1 %v339_v14 }
  0x1b   :  { %296 = vmatpush3.bf16.msra.mxu0 %v340_v15  ;;  %325 = vmatpush3.bf16.msra.mxu1 %v340_v15 }
  0x1c   :  { %297 = vmatprep.subr.bf16.mxu0 %v341_v16  ;;  %318 = vmatprep.subr.bf16.mxu1 %v341_v16 }
  0x1f   :  { %298 = vmatpush3.bf16.msra.mxu0 %v342_v17  ;;  %326 = vmatpush3.bf16.msra.mxu1 %v342_v17 }
  0x22   :  { %212 = vmatmul.mubr.bf16.vlgmr.msra.gmra.mrb[0].mxu0 %v343_v18  ;;  %220 = vmatmul.mubr.bf16.vlgmr.msra.gmra.mrb[0].mxu1 %v346_v19 }
  0xf5   :  { %v299_v20 = vpop.f32.mrb[0].mxu0  ;;  %v305_v21 = vpop.f32.mrb[0].mxu1 }
  0xf6   :  { %v300_v22 = vpop.f32.mrb[1].mxu0  ;;  %v306_v24 = vpop.f32.mrb[1].mxu1 }
  0xf7   :  { %v301_v25 = vadd.f32 %v300_v22, %v299_v20  ;;  %v307_v26 = vadd.f32 %v306_v24, %v305_v21  ;;  %v302_v27 = vpop.f32.mrb[2].mxu0  ;;  %v308_v28 = vpop.f32.mrb[2].mxu1 }
  0xf8   :  { %v303_v29 = vpop.f32.mrb[3].mxu0  ;;  %v309_v30 = vpop.f32.mrb[3].mxu1 }
  0xf9   :  { %v250_v31 = vadd.f32 %v301_v25, %v282_v23  ;;  %v252_v32 = vadd.f32 %v307_v26, %v282_v23  ;;  %v304_v33 = vadd.f32 %v303_v29, %v302_v27  ;;  %v310_v34 = vadd.f32 %v309_v30, %v308_v28 }
  0xfb   :  { %254 = vst [vmem:[%s447_s3] sm:$0xff] %v250_v31  ;;  %256 = vst [vmem:[%s447_s3 + $0x10] sm:$0xff] %v252_v32  ;;  %v251_v35 = vadd.f32 %v304_v33, %v282_v23  ;;  %v253_v36 = vadd.f32 %v310_v34, %v282_v23 }
  0xfd   :  { %255 = vst [vmem:[%s447_s3 + $0x8] sm:$0xff] %v251_v35  ;;  %257 = vst [vmem:[%s447_s3 + $0x18] sm:$0xff] %v253_v36 }

// kernel: _lambda_.32
= control target key start
LH: loop header
LB: loop body
LE: loop exit
PB: predicated region body
PF: predicated region fallthrough
CT: control target
= control target key end

     0   :  { %v328_v1 = vmov 0   ;;  %v229_v19 = vlaneseq  ;;  %s430_s1 = inlined_call_operand.vmem [shape: bf16[128,256], index: 1, kind: input, shape index: {}]   ;;  %s431_s0 = inlined_call_operand.vmem [shape: bf16[32,128], index: 0, kind: input, shape index: {}]   ;;  %s432_s2 = inlined_call_operand.vmem [shape: f32[1,256], index: 2, kind: input, shape index: {}]   ;;  %s433_s3 = inlined_call_operand.vmem [shape: f32[32,256], index: 3, kind: output, shape index: {}]  }
   0x1   :  { %v302_v0 = vld [vmem:[%s430_s1 + $0x4] ss:$8 sps:$4 sm:$0xff]   ;;  %179 = vmatprep.mubr.bf16.mxu0 %v328_v1  ;;  %189 = vmatprep.mubr.bf16.mxu1 %v328_v1  ;;  %v304_v2 = vld [vmem:[%s430_s1] ss:$8 sps:$4 sm:$0xff]   ;;  %v305_v3 = vld [vmem:[%s430_s1 + $0x14] ss:$8 sps:$4 sm:$0xff]  }
   0x2   :  { %147 = vmatprep.subr.bf16.mxu0 %v302_v0  ;;  %285 = vmatprep.subr.bf16.mxu1 %v302_v0  ;;  %v307_v4 = vld [vmem:[%s430_s1 + $0x10] ss:$8 sps:$4 sm:$0xff]   ;;  %v308_v5 = vld [vmem:[%s430_s1 + $0x24] ss:$8 sps:$4 sm:$0xff]   ;;  %v310_v6 = vld [vmem:[%s430_s1 + $0x20] ss:$8 sps:$4 sm:$0xff]  }
   0x3   :  { %148 = vmatpush1.bf16.msra.mxu0 %v304_v2  ;;  %293 = vmatpush1.bf16.msra.mxu1 %v304_v2  ;;  %v311_v7 = vld [vmem:[%s430_s1 + $0x34] ss:$8 sps:$4 sm:$0xff]   ;;  %v313_v8 = vld [vmem:[%s430_s1 + $0x30] ss:$8 sps:$4 sm:$0xff]   ;;  %v314_v9 = vld [vmem:[%s430_s1 + $0x44] ss:$8 sps:$4 sm:$0xff]  }
   0x4   :  { %149 = vmatprep.subr.bf16.mxu0 %v305_v3  ;;  %286 = vmatprep.subr.bf16.mxu1 %v305_v3  ;;  %v316_v10 = vld [vmem:[%s430_s1 + $0x40] ss:$8 sps:$4 sm:$0xff]   ;;  %v317_v11 = vld [vmem:[%s430_s1 + $0x54] ss:$8 sps:$4 sm:$0xff]   ;;  %v319_v12 = vld [vmem:[%s430_s1 + $0x50] ss:$8 sps:$4 sm:$0xff]  }
   0x5   :  { %v320_v13 = vld [vmem:[%s430_s1 + $0x64] ss:$8 sps:$4 sm:$0xff]   ;;  %v322_v14 = vld [vmem:[%s430_s1 + $0x60] ss:$8 sps:$4 sm:$0xff]   ;;  %v323_v15 = vld [vmem:[%s430_s1 + $0x74] ss:$8 sps:$4 sm:$0xff]  }
   0x6   :  { %v325_v16 = vld [vmem:[%s430_s1 + $0x70] ss:$8 sps:$4 sm:$0xff]   ;;  %v326_v17 = vld [vmem:[%s431_s0] sm:$0xff]   ;;  %v327_v18 = vld [vmem:[%s431_s0 + $0x8] sm:$0xff]   ;;  %v230_v20 = vshrl.u32 %v229_v19, 7 }
   0x7   :  { %150 = vmatpush1.bf16.msra.mxu0 %v307_v4  ;;  %294 = vmatpush1.bf16.msra.mxu1 %v307_v4  ;;  %v227_v22 = vld [vmem:[%s432_s2] sm:$0x3] }
   0x8   :  { %151 = vmatprep.subr.bf16.mxu0 %v308_v5  ;;  %287 = vmatprep.subr.bf16.mxu1 %v308_v5  ;;  %v231_v21 = vsub.s32 0, %v230_v20  ;;  %v235_v23 = vsub.s32 1, %v230_v20 }
   0xa   :  { %v232_v24 = vrot.slane %v227_v22, %v231_v21  ;;  %v236_v25 = vrot.slane %v227_v22, %v235_v23 }
   0xb   :  { %152 = vmatpush1.bf16.msra.mxu0 %v310_v6  ;;  %295 = vmatpush1.bf16.msra.mxu1 %v310_v6 }
   0xc   :  { %153 = vmatprep.subr.bf16.mxu0 %v311_v7  ;;  %288 = vmatprep.subr.bf16.mxu1 %v311_v7 }
   0xf   :  { %154 = vmatpush1.bf16.msra.mxu0 %v313_v8  ;;  %296 = vmatpush1.bf16.msra.mxu1 %v313_v8 }
  0x10   :  { %155 = vmatprep.subr.bf16.mxu0 %v314_v9  ;;  %289 = vmatprep.subr.bf16.mxu1 %v314_v9 }
  0x13   :  { %156 = vmatpush1.bf16.msra.mxu0 %v316_v10  ;;  %297 = vmatpush1.bf16.msra.mxu1 %v316_v10 }
  0x14   :  { %157 = vmatprep.subr.bf16.mxu0 %v317_v11  ;;  %290 = vmatprep.subr.bf16.mxu1 %v317_v11 }
  0x17   :  { %158 = vmatpush1.bf16.msra.mxu0 %v319_v12  ;;  %298 = vmatpush1.bf16.msra.mxu1 %v319_v12 }
  0x18   :  { %159 = vmatprep.subr.bf16.mxu0 %v320_v13  ;;  %291 = vmatprep.subr.bf16.mxu1 %v320_v13 }
  0x1b   :  { %160 = vmatpush1.bf16.msra.mxu0 %v322_v14  ;;  %299 = vmatpush1.bf16.msra.mxu1 %v322_v14 }
  0x1c   :  { %161 = vmatprep.subr.bf16.mxu0 %v323_v15  ;;  %292 = vmatprep.subr.bf16.mxu1 %v323_v15 }
  0x1f   :  { %162 = vmatpush1.bf16.msra.mxu0 %v325_v16  ;;  %300 = vmatpush1.bf16.msra.mxu1 %v325_v16 }
  0x22   :  { %180 = vmatmul.mubr.bf16.vlgmr.msra.gmra.mrb[0].mxu0 %v326_v17  ;;  %190 = vmatmul.mubr.bf16.vlgmr.msra.gmra.mrb[0].mxu1 %v327_v18 }
  0xf5   :  { %v181_v26 = vpop.f32.mrb[0].mxu0  ;;  %v191_v27 = vpop.f32.mrb[0].mxu1 }
  0xf6   :  { %v239_v28 = vadd.f32 %v232_v24, %v181_v26  ;;  %v243_v29 = vadd.f32 %v232_v24, %v191_v27  ;;  %v183_v30 = vpop.f32.mrb[1].mxu0  ;;  %v193_v31 = vpop.f32.mrb[1].mxu1 }
  0xf7   :  { %v240_v32 = vadd.f32 %v236_v25, %v183_v30  ;;  %v244_v33 = vadd.f32 %v236_v25, %v193_v31  ;;  %v185_v34 = vpop.f32.mrb[2].mxu0  ;;  %v195_v35 = vpop.f32.mrb[2].mxu1 }
  0xf8   :  { %v247_v36 = vmax.f32 %v239_v28, 0.0  ;;  %v251_v37 = vmax.f32 %v243_v29, 0.0  ;;  %v241_v38 = vadd.f32 %v232_v24, %v185_v34  ;;  %v245_v39 = vadd.f32 %v232_v24, %v195_v35  ;;  %v187_v40 = vpop.f32.mrb[3].mxu0  ;;  %v197_v41 = vpop.f32.mrb[3].mxu1 }
  0xf9   :  { %v248_v42 = vmax.f32 %v240_v32, 0.0  ;;  %v252_v43 = vmax.f32 %v244_v33, 0.0  ;;  %v242_v44 = vadd.f32 %v236_v25, %v187_v40  ;;  %v246_v45 = vadd.f32 %v236_v25, %v197_v41 }
  0xfa   :  { %255 = vst [vmem:[%s433_s3] sm:$0xff] %v247_v36  ;;  %259 = vst [vmem:[%s433_s3 + $0x20] sm:$0xff] %v251_v37  ;;  %v249_v46 = vmax.f32 %v241_v38, 0.0  ;;  %v253_v47 = vmax.f32 %v245_v39, 0.0 }
  0xfb   :  { %256 = vst [vmem:[%s433_s3 + $0x8] sm:$0xff] %v248_v42  ;;  %260 = vst [vmem:[%s433_s3 + $0x28] sm:$0xff] %v252_v43  ;;  %v250_v48 = vmax.f32 %v242_v44, 0.0  ;;  %v254_v49 = vmax.f32 %v246_v45, 0.0 }
  0xfc   :  { %257 = vst [vmem:[%s433_s3 + $0x10] sm:$0xff] %v249_v46  ;;  %261 = vst [vmem:[%s433_s3 + $0x30] sm:$0xff] %v253_v47 }
  0xfd   :  { %258 = vst [vmem:[%s433_s3 + $0x18] sm:$0xff] %v250_v48  ;;  %262 = vst [vmem:[%s433_s3 + $0x38] sm:$0xff] %v254_v49 }

// kernel: _lambda_.33
= control target key start
LH: loop header
LB: loop body
LE: loop exit
PB: predicated region body
PF: predicated region fallthrough
CT: control target
= control target key end

     0   :  { %s1232_s12 = smov 0   ;;  %s1234_s13 = smov 0   ;;  %s1386_s0 = inlined_call_operand.vmem [shape: bf16[32,2304], index: 0, kind: input, shape index: {}]   ;;  %s1387_s1 = inlined_call_operand.vmem [shape: bf16[2304,256], index: 1, kind: input, shape index: {}]   ;;  %s1388_s2 = inlined_call_operand.vmem [shape: f32[1,256], index: 2, kind: input, shape index: {}]   ;;  %s1389_s3 = inlined_call_operand.vmem [shape: f32[32,256], index: 3, kind: output, shape index: {}]  }
   0x1   :  { %s1236_s14 = smov 0   ;;  %s1238_s15 = smov 0  }
   0x2   :  { %s1240_s16 = smov 0  }
   0x3 LB: > { %s25_s17 = sadd.s32 1, %s1204_s15  ;;  %p48_p1 = scmp.ne.s32.totalorder %s1196_s13, %s1192_s12  ;;  %s1208_s16 = sphi %s1240_s16, %s13_s16   ;;  %s1204_s15 = sphi %s1238_s15, %s1393_s15   ;;  %s1200_s14 = sphi %s1236_s14, %s1392_s14   ;;  %s1196_s13 = sphi %s1234_s13, %s1391_s13   ;;  %s1192_s12 = sphi %s1232_s12, %s1390_s12  }
   0x4   : > { %p26_p0 = scmp.ge.s32.totalorder %s25_s17, 6  ;;  %p49_p2 = scmp.eq.s32.totalorder %s1208_s16, 0 }
   0x5   : > { %s41_s19 = sadd.s32 1, %s1196_s13  ;;  %p963_p5 = scmp.ge.s32.totalorder %s1208_s16, 6 }
   0x6   : > { %s1395_s17 = smov (%p26_p0, %s25_s17), 0  ;;  %p50_p3 = por %p49_p2, %p48_p1 }
   0x7   : > { %s37_s18 = ssub.s32 %s1204_s15, %s1395_s17  ;;  %164 = sbr.rel (%p963_p5) target bundleno = 23 (0x17), region = 20 }
   0x8   : > { %p39_p4 = scmp.eq.s32.totalorder %s37_s18, 0 }
   0xa   : > { %s1267_s20 = scalar_select %p39_p4, %s1196_s13, %s41_s19  }
   0xe   : > { %167 = sbr.rel (!%p50_p3) target bundleno = 23 (0x17), region = 24  ;;  %s169_s21 = sand.u32 (%p50_p3), 1, %s1196_s13  }
   0xf   : > { %s1036_s22 = smul.u32 (%p50_p3), 12, %s1204_s15 }
  0x10   : > { %s1046_s23 = smul.u32 (%p50_p3), 48, %s169_s21 }
  0x11   : > { %s177_s26 = scalar_lea.vmem (%p50_p3), %s1386_s0, %s1036_s22 }
  0x12   : > { %v192_v0 = vld [vmem:[%s177_s26] sm:$0xff] (%p50_p3)  ;;  %v194_v1 = vld [vmem:[%s177_s26 + $0x48] sm:$0xff] (%p50_p3)  ;;  %v196_v2 = vld [vmem:[%s177_s26 + $0x90] sm:$0xff] (%p50_p3)  ;;  %s171_s27 = scalar_lea.vmem (%p50_p3), [#allocation3], %s1046_s23 }
  0x13   : > { %193 = vst [vmem:[%s171_s27] sm:$0xff] (%p50_p3), %v192_v0  ;;  %195 = vst [vmem:[%s171_s27 + $0xc] sm:$0xff] (%p50_p3), %v194_v1  ;;  %v198_v3 = vld [vmem:[%s177_s26 + $0xd8] sm:$0xff] (%p50_p3)  ;;  %v965_v4 = vld [vmem:[%s177_s26 + $0x8] sm:$0xf] (%p50_p3) }
  0x14   : > { %197 = vst [vmem:[%s171_s27 + $0x18] sm:$0xff] (%p50_p3), %v196_v2  ;;  %v967_v5 = vld [vmem:[%s177_s26 + $0x50] sm:$0xf] (%p50_p3)  ;;  %199 = vst [vmem:[%s171_s27 + $0x24] sm:$0xff] (%p50_p3), %v198_v3  ;;  %v969_v6 = vld [vmem:[%s177_s26 + $0x98] sm:$0xf] (%p50_p3) }
  0x15   : > { %966 = vst [vmem:[%s171_s27 + $0x8] sm:$0xf] %v965_v4  ;;  %968 = vst [vmem:[%s171_s27 + $0x14] sm:$0xf] %v967_v5  ;;  %v971_v7 = vld [vmem:[%s177_s26 + $0xe0] sm:$0xf] }
  0x16   : > { %970 = vst [vmem:[%s171_s27 + $0x20] sm:$0xf] %v969_v6  ;;  %972 = vst [vmem:[%s171_s27 + $0x2c] sm:$0xf] %v971_v7 }
  0x17 PF: > { %p973_p6 = scmp.ge.s32.totalorder %s1208_s16, 1  ;;  %p234_p7 = scmp.lt.s32.totalorder %s1208_s16, 7 }
  0x19   : > { %p235_p8 = pnand %p973_p6, %p234_p7 }
  0x1a   : > { %s241_s28 = sand.u32 (!%p235_p8), 1, %s1192_s12   ;;  %s285_s29 = smul.u32 (!%p235_p8), 48, %s1200_s14 }
  0x1b   : > { %238 = sbr.rel (%p235_p8) target bundleno = 346 (0x15a), region = 54  ;;  %p976_p10 = scmp.ne.s32.totalorder (!%p235_p8), %s1200_s14, 0 }
  0x1c   : > { %s1047_s30 = smul.u32 (!%p235_p8), 48, %s241_s28  ;;  %p287_p9 = scmp.lt.s32.totalorder (!%p235_p8), %s285_s29, 287 }
  0x1e   : > { %s1284_s8 = scalar_lea.vmem (!%p235_p8), [#allocation3], %s1047_s30 }
  0x22   : > { %s1397_s29 = smov (!%p287_p9, %s285_s29), 287  ;;  %318 = sbr.rel (%p976_p10) target bundleno = 41 (0x29), region = 62 }
  0x23   : > { %s1037_s4 = sshll.u32 %s1397_s29, 3  ;;  %v1210_v8 = vmov (!%p976_p10), 0.0  }
  0x24   : > { %s1282_s7 = scalar_lea.vmem %s1387_s1, %s1037_s4  ;;  %319 = vst [vmem:[#allocation2] sm:$0xff] (!%p976_p10), %v1210_v8  ;;  %320 = vst [vmem:[#allocation2 + $0x8] sm:$0xff] (!%p976_p10), %v1210_v8 }
  0x25   : > { %321 = vst [vmem:[#allocation2 + $0x10] sm:$0xff] (!%p976_p10), %v1210_v8  ;;  %322 = vst [vmem:[#allocation2 + $0x18] sm:$0xff] (!%p976_p10), %v1210_v8 }
  0x26   : > { %323 = vst [vmem:[#allocation2 + $0x20] sm:$0xff] (!%p976_p10), %v1210_v8  ;;  %324 = vst [vmem:[#allocation2 + $0x28] sm:$0xff] (!%p976_p10), %v1210_v8 }
  0x27   : > { %325 = vst [vmem:[#allocation2 + $0x30] sm:$0xff] (!%p976_p10), %v1210_v8  ;;  %326 = vst [vmem:[#allocation2 + $0x38] sm:$0xff] (!%p976_p10), %v1210_v8 }
  0x29 PF: > { %v1090_v9 = vld [vmem:[%s1282_s7 + $0x4] ss:$8 sps:$4 sm:$0xff]   ;;  %v1092_v10 = vld [vmem:[%s1282_s7] ss:$8 sps:$4 sm:$0xff]   ;;  %v1211_v11 = vmov 0   ;;  %p1031_p11 = scmp.ne.s32.totalorder %s1200_s14, 5 }
  0x2a   : > { %748 = vmatprep.mubr.bf16.mxu0 %v1211_v11  ;;  %663 = vmatprep.subr.bf16.mxu1 %v1090_v9  ;;  %v1093_v12 = vld [vmem:[%s1282_s7 + $0x14] ss:$8 sps:$4 sm:$0xff]   ;;  %v1095_v13 = vld [vmem:[%s1282_s7 + $0x10] ss:$8 sps:$4 sm:$0xff]   ;;  %v1096_v14 = vld [vmem:[%s1282_s7 + $0x24] ss:$8 sps:$4 sm:$0xff]  }
  0x2b   : > { %664 = vmatpush1.bf16.msra.mxu1 %v1092_v10  ;;  %v1098_v15 = vld [vmem:[%s1282_s7 + $0x20] ss:$8 sps:$4 sm:$0xff]   ;;  %v1099_v16 = vld [vmem:[%s1282_s7 + $0x34] ss:$8 sps:$4 sm:$0xff]   ;;  %v1101_v17 = vld [vmem:[%s1282_s7 + $0x30] ss:$8 sps:$4 sm:$0xff]  }
  0x2c   : > { %665 = vmatprep.subr.bf16.mxu1 %v1093_v12  ;;  %v1114_v18 = vld [vmem:[%s1282_s7 + $0x104] ss:$8 sps:$4 sm:$0xff]   ;;  %v1116_v19 = vld [vmem:[%s1282_s7 + $0x100] ss:$8 sps:$4 sm:$0xff]   ;;  %v1120_v21 = vld [vmem:[%s1282_s7 + $0x114] ss:$8 sps:$4 sm:$0xff]  }
  0x2d   : > { %v1102_v20 = vld [vmem:[%s1282_s7 + $0x44] ss:$8 sps:$4 sm:$0xff]   ;;  %716 = vmatprep.subr.bf16.mxu0 %v1114_v18  ;;  %v1122_v22 = vld [vmem:[%s1282_s7 + $0x110] ss:$8 sps:$4 sm:$0xff]   ;;  %v1104_v23 = vld [vmem:[%s1282_s7 + $0x40] ss:$8 sps:$4 sm:$0xff]  }
  0x2e   : > { %717 = vmatpush1.bf16.msra.mxu0 %v1116_v19  ;;  %v1105_v24 = vld [vmem:[%s1282_s7 + $0x54] ss:$8 sps:$4 sm:$0xff]   ;;  %v1126_v25 = vld [vmem:[%s1282_s7 + $0x124] ss:$8 sps:$4 sm:$0xff]   ;;  %v1128_v26 = vld [vmem:[%s1282_s7 + $0x120] ss:$8 sps:$4 sm:$0xff]  }
  0x2f   : > { %666 = vmatpush1.bf16.msra.mxu1 %v1095_v13  ;;  %718 = vmatprep.subr.bf16.mxu0 %v1120_v21  ;;  %v1107_v27 = vld [vmem:[%s1282_s7 + $0x50] ss:$8 sps:$4 sm:$0xff]   ;;  %v1132_v28 = vld [vmem:[%s1282_s7 + $0x134] ss:$8 sps:$4 sm:$0xff]   ;;  %v1108_v29 = vld [vmem:[%s1282_s7 + $0x64] ss:$8 sps:$4 sm:$0xff]  }
  0x30   : > { %667 = vmatprep.subr.bf16.mxu1 %v1096_v14  ;;  %v1134_v30 = vld [vmem:[%s1282_s7 + $0x130] ss:$8 sps:$4 sm:$0xff]   ;;  %v1110_v31 = vld [vmem:[%s1282_s7 + $0x60] ss:$8 sps:$4 sm:$0xff]   ;;  %v1138_v32 = vld [vmem:[%s1282_s7 + $0x144] ss:$8 sps:$4 sm:$0xff]  }
  0x31   : > { %v1111_v33 = vld [vmem:[%s1282_s7 + $0x74] ss:$8 sps:$4 sm:$0xff]   ;;  %v1140_v34 = vld [vmem:[%s1282_s7 + $0x140] ss:$8 sps:$4 sm:$0xff]   ;;  %v1113_v35 = vld [vmem:[%s1282_s7 + $0x70] ss:$8 sps:$4 sm:$0xff]  }
  0x32   : > { %719 = vmatpush1.bf16.msra.mxu0 %v1122_v22  ;;  %v1144_v36 = vld [vmem:[%s1282_s7 + $0x154] ss:$8 sps:$4 sm:$0xff]   ;;  %v1117_v37 = vld [vmem:[%s1282_s7 + $0x84] ss:$8 sps:$4 sm:$0xff]   ;;  %v1146_v38 = vld [vmem:[%s1282_s7 + $0x150] ss:$8 sps:$4 sm:$0xff]  }
  0x33   : > { %668 = vmatpush1.bf16.msra.mxu1 %v1098_v15  ;;  %720 = vmatprep.subr.bf16.mxu0 %v1126_v25  ;;  %v1119_v39 = vld [vmem:[%s1282_s7 + $0x80] ss:$8 sps:$4 sm:$0xff]   ;;  %v1150_v40 = vld [vmem:[%s1282_s7 + $0x164] ss:$8 sps:$4 sm:$0xff]   ;;  %v1123_v41 = vld [vmem:[%s1282_s7 + $0x94] ss:$8 sps:$4 sm:$0xff]  }
  0x34   : > { %669 = vmatprep.subr.bf16.mxu1 %v1099_v16  ;;  %v1125_v42 = vld [vmem:[%s1282_s7 + $0x90] ss:$8 sps:$4 sm:$0xff]   ;;  %v1152_v43 = vld [vmem:[%s1282_s7 + $0x160] ss:$8 sps:$4 sm:$0xff]   ;;  %v1156_v45 = vld [vmem:[%s1282_s7 + $0x174] ss:$8 sps:$4 sm:$0xff]  }
  0x35   : > { %v1165_v44 = vld [vmem:[%s1284_s8 + $0x4] ss:$12 sps:$4 sm:$0xff]   ;;  %v1162_v50 = vld [vmem:[%s1284_s8 + $0x8] ss:$12 sps:$4 sm:$0xff]   ;;  %v1166_v55 = vld [vmem:[%s1284_s8 + $0x20] ss:$12 sps:$4 sm:$0xff]  }
  0x36   : > { %721 = vmatpush1.bf16.msra.mxu0 %v1128_v26  ;;  %v1129_v46 = vld [vmem:[%s1282_s7 + $0xa4] ss:$8 sps:$4 sm:$0xff]   ;;  %695 = vmatprep.mubr.bf16.mxu1 %v1165_v44  ;;  %v1158_v47 = vld [vmem:[%s1282_s7 + $0x170] ss:$8 sps:$4 sm:$0xff]   ;;  %v1131_v48 = vld [vmem:[%s1282_s7 + $0xa0] ss:$8 sps:$4 sm:$0xff]  }
  0x37   : > { %670 = vmatpush1.bf16.msra.mxu1 %v1101_v17  ;;  %722 = vmatprep.subr.bf16.mxu0 %v1132_v28  ;;  %v1135_v49 = vld [vmem:[%s1282_s7 + $0xb4] ss:$8 sps:$4 sm:$0xff]   ;;  %v1137_v51 = vld [vmem:[%s1282_s7 + $0xb0] ss:$8 sps:$4 sm:$0xff]   ;;  %v1141_v52 = vld [vmem:[%s1282_s7 + $0xc4] ss:$8 sps:$4 sm:$0xff]  }
  0x38   : > { %671 = vmatprep.subr.bf16.mxu1 %v1102_v20  ;;  %v1143_v53 = vld [vmem:[%s1282_s7 + $0xc0] ss:$8 sps:$4 sm:$0xff]   ;;  %v1147_v54 = vld [vmem:[%s1282_s7 + $0xd4] ss:$8 sps:$4 sm:$0xff]   ;;  %v1149_v56 = vld [vmem:[%s1282_s7 + $0xd0] ss:$8 sps:$4 sm:$0xff]  }
  0x39   : > { %v1153_v57 = vld [vmem:[%s1282_s7 + $0xe4] ss:$8 sps:$4 sm:$0xff]   ;;  %v1155_v58 = vld [vmem:[%s1282_s7 + $0xe0] ss:$8 sps:$4 sm:$0xff]   ;;  %v1159_v59 = vld [vmem:[%s1282_s7 + $0xf4] ss:$8 sps:$4 sm:$0xff]  }
  0x3a   : > { %723 = vmatpush1.bf16.msra.mxu0 %v1134_v30  ;;  %v1161_v60 = vld [vmem:[%s1282_s7 + $0xf0] ss:$8 sps:$4 sm:$0xff]   ;;  %v327_v8 = vld [vmem:[#allocation2] sm:$0xff] }
  0x3b   : > { %672 = vmatpush1.bf16.msra.mxu1 %v1104_v23  ;;  %724 = vmatprep.subr.bf16.mxu0 %v1138_v32  ;;  %v1163_v61 = vld [vmem:[%s1284_s8] ss:$12 sps:$4 sm:$0xff]   ;;  %v1167_v62 = vld [vmem:[%s1284_s8 + $0x1c] ss:$12 sps:$4 sm:$0xff]   ;;  %v1169_v63 = vld [vmem:[%s1284_s8 + $0x18] ss:$12 sps:$4 sm:$0xff]  }
  0x3c   : > { %673 = vmatprep.subr.bf16.mxu1 %v1105_v24  ;;  %v329_v14 = vld [vmem:[#allocation2 + $0x10] sm:$0xff]  ;;  %v330_v18 = vld [vmem:[#allocation2 + $0x18] sm:$0xff]  ;;  %v331_v24 = vld [vmem:[#allocation2 + $0x20] sm:$0xff] }
  0x3d   : > { %v333_v30 = vld [vmem:[#allocation2 + $0x30] sm:$0xff] }
  0x3e   : > { %725 = vmatpush1.bf16.msra.mxu0 %v1140_v34  ;;  %v334_v34 = vld [vmem:[#allocation2 + $0x38] sm:$0xff] }
  0x3f   : > { %674 = vmatpush1.bf16.msra.mxu1 %v1107_v27  ;;  %726 = vmatprep.subr.bf16.mxu0 %v1144_v36  ;;  %v332_v27 = vld [vmem:[#allocation2 + $0x28] sm:$0xff] }
  0x40   : > { %675 = vmatprep.subr.bf16.mxu1 %v1108_v29 }
  0x42   : > { %727 = vmatpush1.bf16.msra.mxu0 %v1146_v38 }
  0x43   : > { %676 = vmatpush1.bf16.msra.mxu1 %v1110_v31  ;;  %728 = vmatprep.subr.bf16.mxu0 %v1150_v40  ;;  %v799_v40 = vlaneseq (!%p1031_p11) }
  0x44   : > { %677 = vmatprep.subr.bf16.mxu1 %v1111_v33 }
  0x46   : > { %729 = vmatpush1.bf16.msra.mxu0 %v1152_v43 }
  0x47   : > { %678 = vmatpush1.bf16.msra.mxu1 %v1113_v35  ;;  %730 = vmatprep.subr.bf16.mxu0 %v1156_v45 }
  0x48   : > { %679 = vmatprep.subr.bf16.mxu1 %v1117_v37 }
  0x4a   : > { %731 = vmatpush1.bf16.msra.mxu0 %v1158_v47 }
  0x4b   : > { %680 = vmatpush1.bf16.msra.mxu1 %v1119_v39 }
  0x4c   : > { %681 = vmatprep.subr.bf16.mxu1 %v1123_v41  ;;  %v800_v41 = vshrl.u32 (!%p1031_p11), %v799_v40, 7 }
  0x4d   : > { %749 = vmatmul.mubr.bf16.vlgmr.msra.gmra.mrb[0].mxu0 %v1162_v50 }
  0x4e   : > { %758 = vmatprep.mubr.bf16.mxu0 %v1211_v11  ;;  %v328_v11 = vld [vmem:[#allocation2 + $0x8] sm:$0xff]  ;;  %v801_v44 = vsub.s32 (!%p1031_p11), 0, %v800_v41 }
  0x4f   : > { %682 = vmatpush1.bf16.msra.mxu1 %v1125_v42  ;;  %v797_v42 = vld [vmem:[%s1388_s2] sm:$0x3] (!%p1031_p11) }
  0x50   : > { %683 = vmatprep.subr.bf16.mxu1 %v1129_v46  ;;  %v805_v46 = vsub.s32 (!%p1031_p11), 1, %v800_v41  ;;  %v802_v50 = vrot.slane (!%p1031_p11), %v797_v42, %v801_v44 }
  0x53   : > { %684 = vmatpush1.bf16.msra.mxu1 %v1131_v48 }
  0x54   : > { %685 = vmatprep.subr.bf16.mxu1 %v1135_v49 }
  0x55   : > { %759 = vmatmul.mubr.bf16.gmra.mrb[4].mxu0 %v1166_v55 }
  0x57   : > { %686 = vmatpush1.bf16.msra.mxu1 %v1137_v51  ;;  %v806_v51 = vrot.slane (!%p1031_p11), %v797_v42, %v805_v46 }
  0x58   : > { %687 = vmatprep.subr.bf16.mxu1 %v1141_v52 }
  0x5b   : > { %688 = vmatpush1.bf16.msra.mxu1 %v1143_v53 }
  0x5c   : > { %689 = vmatprep.subr.bf16.mxu1 %v1147_v54 }
  0x5f   : > { %690 = vmatpush1.bf16.msra.mxu1 %v1149_v56 }
  0x60   : > { %691 = vmatprep.subr.bf16.mxu1 %v1153_v57 }
  0x63   : > { %692 = vmatpush1.bf16.msra.mxu1 %v1155_v58 }
  0x64   : > { %693 = vmatprep.subr.bf16.mxu1 %v1159_v59 }
  0x67   : > { %694 = vmatpush1.bf16.msra.mxu1 %v1161_v60 }
  0x6a   : > { %696 = vmatmul.mubr.bf16.vlgmr.msra.gmra.mrb[0].mxu1 %v1163_v61 }
  0x6b   : > { %705 = vmatprep.mubr.bf16.mxu1 %v1167_v62 }
  0x72   : > { %706 = vmatmul.mubr.bf16.gmra.mrb[4].mxu1 %v1169_v63 }
 0x120   : > { %v750_v0 = vpop.f32.mrb[0].mxu0 }
 0x121   : > { %v752_v1 = vpop.f32.mrb[1].mxu0 }
 0x122   : > { %v754_v2 = vpop.f32.mrb[2].mxu0 }
 0x123   : > { %v756_v3 = vpop.f32.mrb[3].mxu0 }
 0x128   : > { %v760_v4 = vpop.f32.mrb[4].mxu0 }
 0x129   : > { %v762_v5 = vpop.f32.mrb[5].mxu0 }
 0x12a   : > { %v764_v6 = vpop.f32.mrb[6].mxu0 }
 0x12b   : > { %v766_v7 = vpop.f32.mrb[7].mxu0 }
 0x13d   : > { %v697_v9 = vpop.f32.mrb[0].mxu1 }
 0x13e   : > { %v751_v10 = vadd.f32 %v750_v0, %v697_v9  ;;  %v699_v12 = vpop.f32.mrb[1].mxu1 }
 0x13f   : > { %v753_v13 = vadd.f32 %v752_v1, %v699_v12  ;;  %v701_v15 = vpop.f32.mrb[2].mxu1 }
 0x140   : > { %v769_v16 = vadd.f32 %v751_v10, %v327_v8  ;;  %v755_v17 = vadd.f32 %v754_v2, %v701_v15  ;;  %v703_v19 = vpop.f32.mrb[3].mxu1 }
 0x141   : > { %v770_v20 = vadd.f32 %v753_v13, %v328_v11  ;;  %v757_v21 = vadd.f32 %v756_v3, %v703_v19 }
 0x142   : > { %777 = vst [vmem:[#allocation2] sm:$0xff] %v769_v16  ;;  %v771_v22 = vadd.f32 %v755_v17, %v329_v14 }
 0x143   : > { %778 = vst [vmem:[#allocation2 + $0x8] sm:$0xff] %v770_v20  ;;  %v772_v23 = vadd.f32 %v757_v21, %v330_v18 }
 0x144   : > { %779 = vst [vmem:[#allocation2 + $0x10] sm:$0xff] %v771_v22 }
 0x145   : > { %780 = vst [vmem:[#allocation2 + $0x18] sm:$0xff] %v772_v23  ;;  %v707_v25 = vpop.f32.mrb[4].mxu1 }
 0x146   : > { %v761_v26 = vadd.f32 %v760_v4, %v707_v25  ;;  %v709_v28 = vpop.f32.mrb[5].mxu1 }
 0x147   : > { %v763_v29 = vadd.f32 %v762_v5, %v709_v28  ;;  %v711_v31 = vpop.f32.mrb[6].mxu1  ;;  %788 = sbr.rel (%p1031_p11) target bundleno = 346 (0x15a), region = 66 }
 0x148   : > { %v773_v32 = vadd.f32 %v761_v26, %v331_v24  ;;  %v765_v33 = vadd.f32 %v764_v6, %v711_v31  ;;  %v713_v35 = vpop.f32.mrb[7].mxu1 }
 0x149   : > { %v774_v36 = vadd.f32 %v763_v29, %v332_v27  ;;  %v767_v37 = vadd.f32 %v766_v7, %v713_v35  ;;  %v789_v43 = vld [vmem:[#allocation2] sm:$0xff] (!%p1031_p11) }
 0x14a   : > { %781 = vst [vmem:[#allocation2 + $0x20] sm:$0xff] %v773_v32  ;;  %v775_v38 = vadd.f32 %v765_v33, %v333_v30  ;;  %v790_v45 = vld [vmem:[#allocation2 + $0x8] sm:$0xff] (!%p1031_p11)  ;;  %v809_v55 = vadd.f32 (!%p1031_p11), %v802_v50, %v789_v43 }
 0x14b   : > { %782 = vst [vmem:[#allocation2 + $0x28] sm:$0xff] %v774_v36  ;;  %v776_v39 = vadd.f32 %v767_v37, %v334_v34  ;;  %v791_v47 = vld [vmem:[#allocation2 + $0x10] sm:$0xff] (!%p1031_p11)  ;;  %v810_v56 = vadd.f32 (!%p1031_p11), %v806_v51, %v790_v45 }
 0x14c   : > { %783 = vst [vmem:[#allocation2 + $0x30] sm:$0xff] %v775_v38  ;;  %v792_v48 = vld [vmem:[#allocation2 + $0x18] sm:$0xff] (!%p1031_p11)  ;;  %v811_v57 = vadd.f32 (!%p1031_p11), %v802_v50, %v791_v47  ;;  %v817_v63 = vmax.f32 (!%p1031_p11), %v809_v55, 0.0 }
 0x14d   : > { %784 = vst [vmem:[#allocation2 + $0x38] sm:$0xff] %v776_v39  ;;  %v812_v58 = vadd.f32 (!%p1031_p11), %v806_v51, %v792_v48  ;;  %v818_v0 = vmax.f32 (!%p1031_p11), %v810_v56, 0.0 }
 0x14e   : > { %v819_v1 = vmax.f32 %v811_v57, 0.0  ;;  %825 = vst [vmem:[%s1389_s3] sm:$0xff] %v817_v63 }
 0x14f   : > { %v820_v2 = vmax.f32 %v812_v58, 0.0  ;;  %826 = vst [vmem:[%s1389_s3 + $0x8] sm:$0xff] %v818_v0 }
 0x150   : > { %827 = vst [vmem:[%s1389_s3 + $0x10] sm:$0xff] %v819_v1 }
 0x151   : > { %v793_v49 = vld [vmem:[#allocation2 + $0x20] sm:$0xff]  ;;  %828 = vst [vmem:[%s1389_s3 + $0x18] sm:$0xff] %v820_v2 }
 0x152   : > { %v794_v52 = vld [vmem:[#allocation2 + $0x28] sm:$0xff]  ;;  %v813_v59 = vadd.f32 %v802_v50, %v793_v49 }
 0x153   : > { %v795_v53 = vld [vmem:[#allocation2 + $0x30] sm:$0xff]  ;;  %v814_v60 = vadd.f32 %v806_v51, %v794_v52 }
 0x154   : > { %v796_v54 = vld [vmem:[#allocation2 + $0x38] sm:$0xff]  ;;  %v815_v61 = vadd.f32 %v802_v50, %v795_v53  ;;  %v821_v3 = vmax.f32 %v813_v59, 0.0 }
 0x155   : > { %v816_v62 = vadd.f32 %v806_v51, %v796_v54  ;;  %v822_v4 = vmax.f32 %v814_v60, 0.0 }
 0x156   : > { %v823_v5 = vmax.f32 %v815_v61, 0.0  ;;  %829 = vst [vmem:[%s1389_s3 + $0x20] sm:$0xff] %v821_v3 }
 0x157   : > { %v824_v6 = vmax.f32 %v816_v62, 0.0  ;;  %830 = vst [vmem:[%s1389_s3 + $0x28] sm:$0xff] %v822_v4 }
 0x158   : > { %831 = vst [vmem:[%s1389_s3 + $0x30] sm:$0xff] %v823_v5 }
 0x159   : > { %832 = vst [vmem:[%s1389_s3 + $0x38] sm:$0xff] %v824_v6 }
 0x15a PF: > { %s13_s16 = sadd.s32 1, %s1208_s16   ;;  %s1390_s12 = smov %s1196_s13 }
 0x15b   : > { %p10_p12 = scmp.ge.s32.totalorder %s13_s16, 8   ;;  %s1391_s13 = smov %s1267_s20 }
 0x15c   : > { %s1392_s14 = smov %s1204_s15  ;;  %s1393_s15 = smov %s1395_s17 }
 0x15d   :  { %12 = sbr.rel (!%p10_p12) target bundleno = 3 (0x3), region = 113 }

// kernel: _lambda_.34
= control target key start
LH: loop header
LB: loop body
LE: loop exit
PB: predicated region body
PF: predicated region fallthrough
CT: control target
= control target key end

     0   :  { %s310_s1 = inlined_call_operand.vmem [shape: bf16[128,128], index: 1, kind: input, shape index: {}]   ;;  %s311_s0 = inlined_call_operand.vmem [shape: bf16[32,128], index: 0, kind: input, shape index: {}]   ;;  %s312_s2 = inlined_call_operand.vmem [shape: f32[1,128], index: 2, kind: input, shape index: {}]   ;;  %s313_s3 = inlined_call_operand.vmem [shape: f32[32,128], index: 3, kind: output, shape index: {}]  }
   0x1   :  { %v235_v0 = vld [vmem:[%s310_s1] sm:$0xff]   ;;  %v236_v1 = vld [vmem:[%s310_s1 + $0x8] sm:$0xff]   ;;  %v237_v2 = vld [vmem:[%s310_s1 + $0x10] sm:$0xff]  }
   0x2   :  { %215 = vmatprep.subr.bf16.mxu0 %v235_v0  ;;  %v238_v3 = vld [vmem:[%s310_s1 + $0x18] sm:$0xff]   ;;  %v243_v4 = vld [vmem:[%s311_s0] sm:$0xff]   ;;  %v240_v6 = vld [vmem:[%s310_s1 + $0x28] sm:$0xff]  }
   0x3   :  { %216 = vmatpush3.bf16.msra.mxu0 %v235_v0  ;;  %231 = vmatprep.mubr.bf16.mxu0 %v243_v4  ;;  %v239_v5 = vld [vmem:[%s310_s1 + $0x20] sm:$0xff]   ;;  %v241_v7 = vld [vmem:[%s310_s1 + $0x30] sm:$0xff]   ;;  %v242_v8 = vld [vmem:[%s310_s1 + $0x38] sm:$0xff]  }
   0x4   :  { %217 = vmatprep.subr.bf16.mxu0 %v236_v1  ;;  %v244_v9 = vld [vmem:[%s311_s0 + $0x8] sm:$0xff]   ;;  %v204_v10 = vld [vmem:[%s312_s2] ss:$0 sm:$0xff] }
   0x7   :  { %218 = vmatpush3.bf16.msra.mxu0 %v236_v1 }
   0x8   :  { %219 = vmatprep.subr.bf16.mxu0 %v237_v2 }
   0xb   :  { %220 = vmatpush3.bf16.msra.mxu0 %v237_v2 }
   0xc   :  { %221 = vmatprep.subr.bf16.mxu0 %v238_v3 }
   0xf   :  { %222 = vmatpush3.bf16.msra.mxu0 %v238_v3 }
  0x10   :  { %223 = vmatprep.subr.bf16.mxu0 %v239_v5 }
  0x13   :  { %224 = vmatpush3.bf16.msra.mxu0 %v239_v5 }
  0x14   :  { %225 = vmatprep.subr.bf16.mxu0 %v240_v6 }
  0x17   :  { %226 = vmatpush3.bf16.msra.mxu0 %v240_v6 }
  0x18   :  { %227 = vmatprep.subr.bf16.mxu0 %v241_v7 }
  0x1b   :  { %228 = vmatpush3.bf16.msra.mxu0 %v241_v7 }
  0x1c   :  { %229 = vmatprep.subr.bf16.mxu0 %v242_v8 }
  0x1f   :  { %230 = vmatpush3.bf16.msra.mxu0 %v242_v8 }
  0x22   :  { %232 = vmatmul.mubr.bf16.vlgmr.msra.gmra.mrb[0].mxu0 %v244_v9 }
  0xf5   :  { %v233_v11 = vpop.f32.mrb[0].mxu0 }
  0xf6   :  { %v180_v12 = vadd.f32 %v233_v11, %v204_v10  ;;  %v141_v13 = vpop.f32.mrb[1].mxu0 }
  0xf7   :  { %v178_v14 = vadd.f32 %v204_v10, %v141_v13  ;;  %v234_v15 = vpop.f32.mrb[2].mxu0 }
  0xf8   :  { %v184_v16 = vmax.f32 %v180_v12, 0.0  ;;  %v181_v17 = vadd.f32 %v234_v15, %v204_v10  ;;  %v144_v18 = vpop.f32.mrb[3].mxu0 }
  0xf9   :  { %v182_v19 = vmax.f32 %v178_v14, 0.0  ;;  %v179_v20 = vadd.f32 %v204_v10, %v144_v18 }
  0xfa   :  { %188 = vst [vmem:[%s313_s3 + $0x10] sm:$0xff] %v184_v16  ;;  %v185_v21 = vmax.f32 %v181_v17, 0.0 }
  0xfb   :  { %186 = vst [vmem:[%s313_s3] sm:$0xff] %v182_v19  ;;  %v183_v22 = vmax.f32 %v179_v20, 0.0 }
  0xfc   :  { %189 = vst [vmem:[%s313_s3 + $0x18] sm:$0xff] %v185_v21 }
  0xfd   :  { %187 = vst [vmem:[%s313_s3 + $0x8] sm:$0xff] %v183_v22 }

// kernel: _lambda_.35
= control target key start
LH: loop header
LB: loop body
LE: loop exit
PB: predicated region body
PF: predicated region fallthrough
CT: control target
= control target key end

     0   :  { %s1036_s12 = smov 0   ;;  %s1038_s13 = smov 0   ;;  %s1152_s0 = inlined_call_operand.vmem [shape: bf16[32,1152], index: 0, kind: input, shape index: {}]   ;;  %s1153_s1 = inlined_call_operand.vmem [shape: bf16[1152,128], index: 1, kind: input, shape index: {}]   ;;  %s1154_s2 = inlined_call_operand.vmem [shape: f32[1,128], index: 2, kind: input, shape index: {}]   ;;  %s1155_s3 = inlined_call_operand.vmem [shape: f32[32,128], index: 3, kind: output, shape index: {}]  }
   0x1   :  { %s1040_s14 = smov 0   ;;  %s1042_s15 = smov 0  }
   0x2   :  { %s1044_s16 = smov 0  }
   0x3 LB: > { %s25_s17 = sadd.s32 1, %s1009_s15  ;;  %p48_p1 = scmp.ne.s32.totalorder %s1001_s13, %s997_s12  ;;  %s1013_s16 = sphi %s1044_s16, %s13_s16   ;;  %s1009_s15 = sphi %s1042_s15, %s1159_s15   ;;  %s1005_s14 = sphi %s1040_s14, %s1158_s14   ;;  %s1001_s13 = sphi %s1038_s13, %s1157_s13   ;;  %s997_s12 = sphi %s1036_s12, %s1156_s12  }
   0x4   : > { %p26_p0 = scmp.ge.s32.totalorder %s25_s17, 3  ;;  %p49_p2 = scmp.eq.s32.totalorder %s1013_s16, 0 }
   0x5   : > { %s41_s19 = sadd.s32 1, %s1001_s13  ;;  %p792_p5 = scmp.ge.s32.totalorder %s1013_s16, 3 }
   0x6   : > { %s1161_s17 = smov (%p26_p0, %s25_s17), 0  ;;  %p50_p3 = por %p49_p2, %p48_p1 }
   0x7   : > { %s37_s18 = ssub.s32 %s1009_s15, %s1161_s17  ;;  %162 = sbr.rel (%p792_p5) target bundleno = 23 (0x17), region = 20 }
   0x8   : > { %p39_p4 = scmp.eq.s32.totalorder %s37_s18, 0 }
   0xa   : > { %s1071_s20 = scalar_select %p39_p4, %s1001_s13, %s41_s19  }
   0xe   : > { %165 = sbr.rel (!%p50_p3) target bundleno = 23 (0x17), region = 24  ;;  %s167_s21 = sand.u32 (%p50_p3), 1, %s1001_s13  }
   0xf   : > { %s841_s22 = smul.u32 (%p50_p3), 12, %s1009_s15 }
  0x10   : > { %s900_s23 = smul.u32 (%p50_p3), 48, %s167_s21 }
  0x11   : > { %s175_s26 = scalar_lea.vmem (%p50_p3), %s1152_s0, %s841_s22 }
  0x12   : > { %v190_v0 = vld [vmem:[%s175_s26] sm:$0xff] (%p50_p3)  ;;  %v194_v2 = vld [vmem:[%s175_s26 + $0x48] sm:$0xff] (%p50_p3)  ;;  %s169_s27 = scalar_lea.vmem (%p50_p3), [#allocation3], %s900_s23  ;;  %v798_v6 = vld [vmem:[%s175_s26 + $0x50] sm:$0xf] (%p50_p3) }
  0x13   : > { %v192_v1 = vld [vmem:[%s175_s26 + $0x24] sm:$0xff] (%p50_p3)  ;;  %191 = vst [vmem:[%s169_s27] sm:$0xff] (%p50_p3), %v190_v0  ;;  %195 = vst [vmem:[%s169_s27 + $0x18] sm:$0xff] (%p50_p3), %v194_v2  ;;  %v196_v3 = vld [vmem:[%s175_s26 + $0x6c] sm:$0xff] (%p50_p3) }
  0x14   : > { %193 = vst [vmem:[%s169_s27 + $0xc] sm:$0xff] (%p50_p3), %v192_v1  ;;  %v794_v4 = vld [vmem:[%s175_s26 + $0x8] sm:$0xf] (%p50_p3)  ;;  %v796_v5 = vld [vmem:[%s175_s26 + $0x2c] sm:$0xf] (%p50_p3)  ;;  %197 = vst [vmem:[%s169_s27 + $0x24] sm:$0xff] (%p50_p3), %v196_v3 }
  0x15   : > { %795 = vst [vmem:[%s169_s27 + $0x8] sm:$0xf] %v794_v4  ;;  %797 = vst [vmem:[%s169_s27 + $0x14] sm:$0xf] %v796_v5  ;;  %v800_v7 = vld [vmem:[%s175_s26 + $0x74] sm:$0xf] }
  0x16   : > { %799 = vst [vmem:[%s169_s27 + $0x20] sm:$0xf] %v798_v6  ;;  %801 = vst [vmem:[%s169_s27 + $0x2c] sm:$0xf] %v800_v7 }
  0x17 PF: > { %p802_p6 = scmp.ge.s32.totalorder %s1013_s16, 1  ;;  %p229_p7 = scmp.lt.s32.totalorder %s1013_s16, 4 }
  0x19   : > { %p230_p8 = pnand %p802_p6, %p229_p7 }
  0x1a   : > { %s236_s28 = sand.u32 (!%p230_p8), 1, %s997_s12   ;;  %s275_s29 = smul.u32 (!%p230_p8), 48, %s1005_s14 }
  0x1b   : > { %233 = sbr.rel (%p230_p8) target bundleno = 316 (0x13c), region = 54  ;;  %p804_p10 = scmp.ne.s32.totalorder (!%p230_p8), %s1005_s14, 0 }
  0x1c   : > { %s901_s30 = smul.u32 (!%p230_p8), 48, %s236_s28  ;;  %p276_p9 = scmp.lt.s32.totalorder (!%p230_p8), %s275_s29, 143 }
  0x1e   : > { %s1088_s8 = scalar_lea.vmem (!%p230_p8), [#allocation3], %s901_s30 }
  0x22   : > { %s1163_s29 = smov (!%p276_p9, %s275_s29), 143  ;;  %300 = sbr.rel (%p804_p10) target bundleno = 41 (0x29), region = 62 }
  0x23   : > { %s803_s4 = sshll.u32 %s1163_s29, 2  ;;  %v1015_v8 = vmov (!%p804_p10), 0.0  }
  0x24   : > { %s1086_s7 = scalar_lea.vmem %s1153_s1, %s803_s4  ;;  %301 = vst [vmem:[#allocation2] sm:$0xff] (!%p804_p10), %v1015_v8  ;;  %302 = vst [vmem:[#allocation2 + $0x8] sm:$0xff] (!%p804_p10), %v1015_v8 }
  0x25   : > { %303 = vst [vmem:[#allocation2 + $0x10] sm:$0xff] (!%p804_p10), %v1015_v8  ;;  %304 = vst [vmem:[#allocation2 + $0x18] sm:$0xff] (!%p804_p10), %v1015_v8 }
  0x29 PF: > { %v943_v9 = vld [vmem:[%s1086_s7 + $0x40] sm:$0xff]   ;;  %v946_v12 = vld [vmem:[%s1086_s7 + $0x48] sm:$0xff]   ;;  %v949_v15 = vld [vmem:[%s1086_s7 + $0x50] sm:$0xff]   ;;  %p835_p11 = scmp.ne.s32.totalorder %s1005_s14, 2 }
  0x2a   : > { %v944_v10 = vld [vmem:[%s1086_s7] sm:$0xff]   ;;  %842 = vmatprep.subr.bf16.mxu0 %v943_v9  ;;  %v947_v13 = vld [vmem:[%s1086_s7 + $0x8] sm:$0xff]   ;;  %v950_v16 = vld [vmem:[%s1086_s7 + $0x10] sm:$0xff]  }
  0x2b   : > { %v945_v11 = vld [vmem:[%s1086_s7 + $0x80] sm:$0xff]   ;;  %843 = vmatpush3.bf16.msra.mxu0 %v944_v10  ;;  %v948_v14 = vld [vmem:[%s1086_s7 + $0x88] sm:$0xff]   ;;  %v951_v17 = vld [vmem:[%s1086_s7 + $0x90] sm:$0xff]  }
  0x2c   : > { %880 = vmatprep.subr.bf16.mxu1 %v945_v11  ;;  %844 = vmatprep.subr.bf16.mxu0 %v946_v12  ;;  %v952_v18 = vld [vmem:[%s1086_s7 + $0x58] sm:$0xff]   ;;  %v955_v21 = vld [vmem:[%s1086_s7 + $0x60] sm:$0xff]   ;;  %v958_v24 = vld [vmem:[%s1086_s7 + $0x68] sm:$0xff]  }
  0x2d   : > { %881 = vmatpush3.bf16.msra.mxu1 %v945_v11  ;;  %v953_v19 = vld [vmem:[%s1086_s7 + $0x18] sm:$0xff]   ;;  %v957_v22 = vld [vmem:[%s1086_s7 + $0xa0] sm:$0xff]   ;;  %v960_v25 = vld [vmem:[%s1086_s7 + $0xa8] sm:$0xff]  }
  0x2e   : > { %882 = vmatprep.subr.bf16.mxu1 %v948_v14  ;;  %v954_v20 = vld [vmem:[%s1086_s7 + $0x98] sm:$0xff]   ;;  %v956_v23 = vld [vmem:[%s1086_s7 + $0x20] sm:$0xff]   ;;  %v959_v26 = vld [vmem:[%s1086_s7 + $0x28] sm:$0xff]  }
  0x2f   : > { %845 = vmatpush3.bf16.msra.mxu0 %v947_v13  ;;  %v961_v27 = vld [vmem:[%s1086_s7 + $0x70] sm:$0xff]   ;;  %v964_v30 = vld [vmem:[%s1086_s7 + $0x78] sm:$0xff]   ;;  %v305_v45 = vld [vmem:[#allocation2] sm:$0xff] }
  0x30   : > { %846 = vmatprep.subr.bf16.mxu0 %v949_v15  ;;  %v962_v28 = vld [vmem:[%s1086_s7 + $0x30] sm:$0xff]   ;;  %v966_v31 = vld [vmem:[%s1086_s7 + $0xb8] sm:$0xff]   ;;  %v306_v50 = vld [vmem:[#allocation2 + $0x8] sm:$0xff] }
  0x31   : > { %883 = vmatpush3.bf16.msra.mxu1 %v948_v14  ;;  %v963_v29 = vld [vmem:[%s1086_s7 + $0xb0] sm:$0xff]   ;;  %v965_v34 = vld [vmem:[%s1086_s7 + $0x38] sm:$0xff]   ;;  %v836_v4 = vld [vmem:[%s1154_s2] ss:$0 sm:$0xff] (!%p835_p11) }
  0x32   : > { %884 = vmatprep.subr.bf16.mxu1 %v951_v17  ;;  %v969_v32 = vld [vmem:[%s1088_s8 + $0x4] ss:$12 sps:$4 sm:$0xff]   ;;  %v970_v33 = vld [vmem:[%s1088_s8 + $0x8] ss:$12 sps:$4 sm:$0xff]   ;;  %v967_v35 = vld [vmem:[%s1088_s8] ss:$12 sps:$4 sm:$0xff]  }
  0x33   : > { %847 = vmatpush3.bf16.msra.mxu0 %v950_v16  ;;  %573 = vmatprep.mubr.bf16.mxu0 %v969_v32  ;;  %v972_v36 = vld [vmem:[%s1088_s8 + $0x1c] ss:$12 sps:$4 sm:$0xff]   ;;  %v971_v37 = vld [vmem:[%s1088_s8 + $0x20] ss:$12 sps:$4 sm:$0xff]   ;;  %v974_v38 = vld [vmem:[%s1088_s8 + $0x18] ss:$12 sps:$4 sm:$0xff]  }
  0x34   : > { %848 = vmatprep.subr.bf16.mxu0 %v952_v18  ;;  %896 = vmatprep.mubr.bf16.mxu1 %v970_v33  ;;  %v307_v59 = vld [vmem:[#allocation2 + $0x10] sm:$0xff]  ;;  %v308_v63 = vld [vmem:[#allocation2 + $0x18] sm:$0xff] }
  0x35   : > { %885 = vmatpush3.bf16.msra.mxu1 %v951_v17 }
  0x36   : > { %886 = vmatprep.subr.bf16.mxu1 %v954_v20 }
  0x37   : > { %849 = vmatpush3.bf16.msra.mxu0 %v953_v19 }
  0x38   : > { %850 = vmatprep.subr.bf16.mxu0 %v955_v21 }
  0x39   : > { %887 = vmatpush3.bf16.msra.mxu1 %v954_v20 }
  0x3a   : > { %888 = vmatprep.subr.bf16.mxu1 %v957_v22 }
  0x3b   : > { %851 = vmatpush3.bf16.msra.mxu0 %v956_v23 }
  0x3c   : > { %852 = vmatprep.subr.bf16.mxu0 %v958_v24 }
  0x3d   : > { %889 = vmatpush3.bf16.msra.mxu1 %v957_v22 }
  0x3e   : > { %890 = vmatprep.subr.bf16.mxu1 %v960_v25 }
  0x3f   : > { %853 = vmatpush3.bf16.msra.mxu0 %v959_v26 }
  0x40   : > { %854 = vmatprep.subr.bf16.mxu0 %v961_v27 }
  0x41   : > { %891 = vmatpush3.bf16.msra.mxu1 %v960_v25 }
  0x42   : > { %892 = vmatprep.subr.bf16.mxu1 %v963_v29 }
  0x43   : > { %855 = vmatpush3.bf16.msra.mxu0 %v962_v28 }
  0x44   : > { %856 = vmatprep.subr.bf16.mxu0 %v964_v30 }
  0x45   : > { %893 = vmatpush3.bf16.msra.mxu1 %v963_v29 }
  0x46   : > { %894 = vmatprep.subr.bf16.mxu1 %v966_v31 }
  0x47   : > { %857 = vmatpush3.bf16.msra.mxu0 %v965_v34 }
  0x49   : > { %895 = vmatpush3.bf16.msra.mxu1 %v966_v31 }
  0x4a   : > { %574 = vmatmul.mubr.bf16.vlgmr.msra.gmra.mrb[0].mxu0 %v967_v35 }
  0x4b   : > { %581 = vmatprep.mubr.bf16.mxu0 %v972_v36 }
  0x4c   : > { %897 = vmatmul.mubr.bf16.vlgmr.msra.gmra.mrb[0].mxu1 %v971_v37 }
  0x52   : > { %582 = vmatmul.mubr.bf16.gmra.mrb[4].mxu0 %v974_v38 }
 0x11d   : > { %v858_v39 = vpop.f32.mrb[0].mxu0 }
 0x11e   : > { %v859_v40 = vpop.f32.mrb[1].mxu0 }
 0x11f   : > { %v860_v41 = vadd.f32 %v859_v40, %v858_v39  ;;  %v861_v42 = vpop.f32.mrb[2].mxu0  ;;  %v898_v43 = vpop.f32.mrb[0].mxu1 }
 0x120   : > { %v862_v44 = vpop.f32.mrb[3].mxu0  ;;  %v624_v46 = vpop.f32.mrb[1].mxu1 }
 0x121   : > { %v863_v47 = vadd.f32 %v862_v44, %v861_v42  ;;  %v625_v48 = vadd.f32 %v860_v41, %v624_v46  ;;  %v899_v49 = vpop.f32.mrb[2].mxu1 }
 0x122   : > { %v627_v51 = vpop.f32.mrb[3].mxu1 }
 0x123   : > { %v639_v52 = vadd.f32 %v625_v48, %v305_v45  ;;  %v628_v53 = vadd.f32 %v863_v47, %v627_v51 }
 0x125   : > { %643 = vst [vmem:[#allocation2] sm:$0xff] %v639_v52  ;;  %v640_v54 = vadd.f32 %v628_v53, %v306_v50  ;;  %v864_v55 = vpop.f32.mrb[4].mxu0 }
 0x126   : > { %v865_v56 = vpop.f32.mrb[5].mxu0 }
 0x127   : > { %644 = vst [vmem:[#allocation2 + $0x8] sm:$0xff] %v640_v54  ;;  %v866_v57 = vadd.f32 %v865_v56, %v864_v55  ;;  %v867_v58 = vpop.f32.mrb[6].mxu0 }
 0x128   : > { %v868_v60 = vpop.f32.mrb[7].mxu0 }
 0x129   : > { %v633_v61 = vadd.f32 %v898_v43, %v866_v57  ;;  %v869_v62 = vadd.f32 %v868_v60, %v867_v58  ;;  %650 = sbr.rel (%p835_p11) target bundleno = 316 (0x13c), region = 66 }
 0x12b   : > { %v641_v0 = vadd.f32 %v633_v61, %v307_v59  ;;  %v636_v1 = vadd.f32 %v899_v49, %v869_v62 }
 0x12c   : > { %v651_v3 = vld [vmem:[#allocation2] sm:$0xff] (!%p835_p11) }
 0x12d   : > { %645 = vst [vmem:[#allocation2 + $0x10] sm:$0xff] %v641_v0  ;;  %v642_v2 = vadd.f32 %v636_v1, %v308_v63  ;;  %v662_v6 = vadd.f32 (!%p835_p11), %v836_v4, %v651_v3 }
 0x12e   : > { %v652_v5 = vld [vmem:[#allocation2 + $0x8] sm:$0xff] (!%p835_p11) }
 0x12f   : > { %646 = vst [vmem:[#allocation2 + $0x18] sm:$0xff] %v642_v2  ;;  %v663_v7 = vadd.f32 (!%p835_p11), %v836_v4, %v652_v5  ;;  %v666_v12 = vmax.f32 (!%p835_p11), %v662_v6, 0.0 }
 0x131   : > { %v667_v13 = vmax.f32 %v663_v7, 0.0  ;;  %670 = vst [vmem:[%s1155_s3] sm:$0xff] %v666_v12 }
 0x133   : > { %671 = vst [vmem:[%s1155_s3 + $0x8] sm:$0xff] %v667_v13 }
 0x134   : > { %v653_v8 = vld [vmem:[#allocation2 + $0x10] sm:$0xff] }
 0x135   : > { %v664_v10 = vadd.f32 %v836_v4, %v653_v8 }
 0x136   : > { %v654_v9 = vld [vmem:[#allocation2 + $0x18] sm:$0xff] }
 0x137   : > { %v665_v11 = vadd.f32 %v836_v4, %v654_v9  ;;  %v668_v14 = vmax.f32 %v664_v10, 0.0 }
 0x139   : > { %v669_v15 = vmax.f32 %v665_v11, 0.0  ;;  %672 = vst [vmem:[%s1155_s3 + $0x10] sm:$0xff] %v668_v14 }
 0x13b   : > { %673 = vst [vmem:[%s1155_s3 + $0x18] sm:$0xff] %v669_v15 }
 0x13c PF: > { %s13_s16 = sadd.s32 1, %s1013_s16   ;;  %s1156_s12 = smov %s1001_s13 }
 0x13d   : > { %p10_p12 = scmp.ge.s32.totalorder %s13_s16, 5   ;;  %s1157_s13 = smov %s1071_s20 }
 0x13e   : > { %s1158_s14 = smov %s1009_s15  ;;  %s1159_s15 = smov %s1161_s17 }
 0x13f   :  { %12 = sbr.rel (!%p10_p12) target bundleno = 3 (0x3), region = 113 }

// kernel: _lambda_.36
= control target key start
LH: loop header
LB: loop body
LE: loop exit
PB: predicated region body
PF: predicated region fallthrough
CT: control target
= control target key end

     0   :  { %s1036_s12 = smov 0   ;;  %s1038_s13 = smov 0   ;;  %s1152_s0 = inlined_call_operand.vmem [shape: bf16[32,2304], index: 0, kind: input, shape index: {}]   ;;  %s1153_s1 = inlined_call_operand.vmem [shape: bf16[2304,128], index: 1, kind: input, shape index: {}]   ;;  %s1154_s2 = inlined_call_operand.vmem [shape: f32[1,128], index: 2, kind: input, shape index: {}]   ;;  %s1155_s3 = inlined_call_operand.vmem [shape: f32[32,128], index: 3, kind: output, shape index: {}]  }
   0x1   :  { %s1040_s14 = smov 0   ;;  %s1042_s15 = smov 0  }
   0x2   :  { %s1044_s16 = smov 0  }
   0x3 LB: > { %s25_s17 = sadd.s32 1, %s1009_s15  ;;  %p48_p1 = scmp.ne.s32.totalorder %s1001_s13, %s997_s12  ;;  %s1013_s16 = sphi %s1044_s16, %s13_s16   ;;  %s1009_s15 = sphi %s1042_s15, %s1159_s15   ;;  %s1005_s14 = sphi %s1040_s14, %s1158_s14   ;;  %s1001_s13 = sphi %s1038_s13, %s1157_s13   ;;  %s997_s12 = sphi %s1036_s12, %s1156_s12  }
   0x4   : > { %p26_p0 = scmp.ge.s32.totalorder %s25_s17, 6  ;;  %p49_p2 = scmp.eq.s32.totalorder %s1013_s16, 0 }
   0x5   : > { %s41_s19 = sadd.s32 1, %s1001_s13  ;;  %p792_p5 = scmp.ge.s32.totalorder %s1013_s16, 6 }
   0x6   : > { %s1161_s17 = smov (%p26_p0, %s25_s17), 0  ;;  %p50_p3 = por %p49_p2, %p48_p1 }
   0x7   : > { %s37_s18 = ssub.s32 %s1009_s15, %s1161_s17  ;;  %162 = sbr.rel (%p792_p5) target bundleno = 23 (0x17), region = 20 }
   0x8   : > { %p39_p4 = scmp.eq.s32.totalorder %s37_s18, 0 }
   0xa   : > { %s1071_s20 = scalar_select %p39_p4, %s1001_s13, %s41_s19  }
   0xe   : > { %165 = sbr.rel (!%p50_p3) target bundleno = 23 (0x17), region = 24  ;;  %s167_s21 = sand.u32 (%p50_p3), 1, %s1001_s13  }
   0xf   : > { %s841_s22 = smul.u32 (%p50_p3), 12, %s1009_s15 }
  0x10   : > { %s900_s23 = smul.u32 (%p50_p3), 48, %s167_s21 }
  0x11   : > { %s175_s26 = scalar_lea.vmem (%p50_p3), %s1152_s0, %s841_s22 }
  0x12   : > { %v190_v0 = vld [vmem:[%s175_s26] sm:$0xff] (%p50_p3)  ;;  %v192_v1 = vld [vmem:[%s175_s26 + $0x48] sm:$0xff] (%p50_p3)  ;;  %v194_v2 = vld [vmem:[%s175_s26 + $0x90] sm:$0xff] (%p50_p3)  ;;  %s169_s27 = scalar_lea.vmem (%p50_p3), [#allocation3], %s900_s23 }
  0x13   : > { %191 = vst [vmem:[%s169_s27] sm:$0xff] (%p50_p3), %v190_v0  ;;  %193 = vst [vmem:[%s169_s27 + $0xc] sm:$0xff] (%p50_p3), %v192_v1  ;;  %v196_v3 = vld [vmem:[%s175_s26 + $0xd8] sm:$0xff] (%p50_p3)  ;;  %v794_v4 = vld [vmem:[%s175_s26 + $0x8] sm:$0xf] (%p50_p3) }
  0x14   : > { %195 = vst [vmem:[%s169_s27 + $0x18] sm:$0xff] (%p50_p3), %v194_v2  ;;  %v796_v5 = vld [vmem:[%s175_s26 + $0x50] sm:$0xf] (%p50_p3)  ;;  %197 = vst [vmem:[%s169_s27 + $0x24] sm:$0xff] (%p50_p3), %v196_v3  ;;  %v798_v6 = vld [vmem:[%s175_s26 + $0x98] sm:$0xf] (%p50_p3) }
  0x15   : > { %795 = vst [vmem:[%s169_s27 + $0x8] sm:$0xf] %v794_v4  ;;  %797 = vst [vmem:[%s169_s27 + $0x14] sm:$0xf] %v796_v5  ;;  %v800_v7 = vld [vmem:[%s175_s26 + $0xe0] sm:$0xf] }
  0x16   : > { %799 = vst [vmem:[%s169_s27 + $0x20] sm:$0xf] %v798_v6  ;;  %801 = vst [vmem:[%s169_s27 + $0x2c] sm:$0xf] %v800_v7 }
  0x17 PF: > { %p802_p6 = scmp.ge.s32.totalorder %s1013_s16, 1  ;;  %p229_p7 = scmp.lt.s32.totalorder %s1013_s16, 7 }
  0x19   : > { %p230_p8 = pnand %p802_p6, %p229_p7 }
  0x1a   : > { %s236_s28 = sand.u32 (!%p230_p8), 1, %s997_s12   ;;  %s275_s29 = smul.u32 (!%p230_p8), 48, %s1005_s14 }
  0x1b   : > { %233 = sbr.rel (%p230_p8) target bundleno = 316 (0x13c), region = 54  ;;  %p804_p10 = scmp.ne.s32.totalorder (!%p230_p8), %s1005_s14, 0 }
  0x1c   : > { %s901_s30 = smul.u32 (!%p230_p8), 48, %s236_s28  ;;  %p276_p9 = scmp.lt.s32.totalorder (!%p230_p8), %s275_s29, 287 }
  0x1e   : > { %s1088_s8 = scalar_lea.vmem (!%p230_p8), [#allocation3], %s901_s30 }
  0x22   : > { %s1163_s29 = smov (!%p276_p9, %s275_s29), 287  ;;  %300 = sbr.rel (%p804_p10) target bundleno = 41 (0x29), region = 62 }
  0x23   : > { %s803_s4 = sshll.u32 %s1163_s29, 2  ;;  %v1015_v8 = vmov (!%p804_p10), 0.0  }
  0x24   : > { %s1086_s7 = scalar_lea.vmem %s1153_s1, %s803_s4  ;;  %301 = vst [vmem:[#allocation2] sm:$0xff] (!%p804_p10), %v1015_v8  ;;  %302 = vst [vmem:[#allocation2 + $0x8] sm:$0xff] (!%p804_p10), %v1015_v8 }
  0x25   : > { %303 = vst [vmem:[#allocation2 + $0x10] sm:$0xff] (!%p804_p10), %v1015_v8  ;;  %304 = vst [vmem:[#allocation2 + $0x18] sm:$0xff] (!%p804_p10), %v1015_v8 }
  0x29 PF: > { %v943_v9 = vld [vmem:[%s1086_s7 + $0x40] sm:$0xff]   ;;  %v946_v12 = vld [vmem:[%s1086_s7 + $0x48] sm:$0xff]   ;;  %v949_v15 = vld [vmem:[%s1086_s7 + $0x50] sm:$0xff]   ;;  %p835_p11 = scmp.ne.s32.totalorder %s1005_s14, 5 }
  0x2a   : > { %v944_v10 = vld [vmem:[%s1086_s7] sm:$0xff]   ;;  %842 = vmatprep.subr.bf16.mxu0 %v943_v9  ;;  %v947_v13 = vld [vmem:[%s1086_s7 + $0x8] sm:$0xff]   ;;  %v950_v16 = vld [vmem:[%s1086_s7 + $0x10] sm:$0xff]  }
  0x2b   : > { %v945_v11 = vld [vmem:[%s1086_s7 + $0x80] sm:$0xff]   ;;  %843 = vmatpush3.bf16.msra.mxu0 %v944_v10  ;;  %v948_v14 = vld [vmem:[%s1086_s7 + $0x88] sm:$0xff]   ;;  %v951_v17 = vld [vmem:[%s1086_s7 + $0x90] sm:$0xff]  }
  0x2c   : > { %880 = vmatprep.subr.bf16.mxu1 %v945_v11  ;;  %844 = vmatprep.subr.bf16.mxu0 %v946_v12  ;;  %v952_v18 = vld [vmem:[%s1086_s7 + $0x58] sm:$0xff]   ;;  %v955_v21 = vld [vmem:[%s1086_s7 + $0x60] sm:$0xff]   ;;  %v958_v24 = vld [vmem:[%s1086_s7 + $0x68] sm:$0xff]  }
  0x2d   : > { %881 = vmatpush3.bf16.msra.mxu1 %v945_v11  ;;  %v953_v19 = vld [vmem:[%s1086_s7 + $0x18] sm:$0xff]   ;;  %v957_v22 = vld [vmem:[%s1086_s7 + $0xa0] sm:$0xff]   ;;  %v960_v25 = vld [vmem:[%s1086_s7 + $0xa8] sm:$0xff]  }
  0x2e   : > { %882 = vmatprep.subr.bf16.mxu1 %v948_v14  ;;  %v954_v20 = vld [vmem:[%s1086_s7 + $0x98] sm:$0xff]   ;;  %v956_v23 = vld [vmem:[%s1086_s7 + $0x20] sm:$0xff]   ;;  %v959_v26 = vld [vmem:[%s1086_s7 + $0x28] sm:$0xff]  }
  0x2f   : > { %845 = vmatpush3.bf16.msra.mxu0 %v947_v13  ;;  %v961_v27 = vld [vmem:[%s1086_s7 + $0x70] sm:$0xff]   ;;  %v964_v30 = vld [vmem:[%s1086_s7 + $0x78] sm:$0xff]   ;;  %v305_v45 = vld [vmem:[#allocation2] sm:$0xff] }
  0x30   : > { %846 = vmatprep.subr.bf16.mxu0 %v949_v15  ;;  %v962_v28 = vld [vmem:[%s1086_s7 + $0x30] sm:$0xff]   ;;  %v966_v31 = vld [vmem:[%s1086_s7 + $0xb8] sm:$0xff]   ;;  %v306_v50 = vld [vmem:[#allocation2 + $0x8] sm:$0xff] }
  0x31   : > { %883 = vmatpush3.bf16.msra.mxu1 %v948_v14  ;;  %v963_v29 = vld [vmem:[%s1086_s7 + $0xb0] sm:$0xff]   ;;  %v965_v34 = vld [vmem:[%s1086_s7 + $0x38] sm:$0xff]   ;;  %v836_v4 = vld [vmem:[%s1154_s2] ss:$0 sm:$0xff] (!%p835_p11) }
  0x32   : > { %884 = vmatprep.subr.bf16.mxu1 %v951_v17  ;;  %v969_v32 = vld [vmem:[%s1088_s8 + $0x4] ss:$12 sps:$4 sm:$0xff]   ;;  %v970_v33 = vld [vmem:[%s1088_s8 + $0x8] ss:$12 sps:$4 sm:$0xff]   ;;  %v967_v35 = vld [vmem:[%s1088_s8] ss:$12 sps:$4 sm:$0xff]  }
  0x33   : > { %847 = vmatpush3.bf16.msra.mxu0 %v950_v16  ;;  %573 = vmatprep.mubr.bf16.mxu0 %v969_v32  ;;  %v972_v36 = vld [vmem:[%s1088_s8 + $0x1c] ss:$12 sps:$4 sm:$0xff]   ;;  %v971_v37 = vld [vmem:[%s1088_s8 + $0x20] ss:$12 sps:$4 sm:$0xff]   ;;  %v974_v38 = vld [vmem:[%s1088_s8 + $0x18] ss:$12 sps:$4 sm:$0xff]  }
  0x34   : > { %848 = vmatprep.subr.bf16.mxu0 %v952_v18  ;;  %896 = vmatprep.mubr.bf16.mxu1 %v970_v33  ;;  %v307_v59 = vld [vmem:[#allocation2 + $0x10] sm:$0xff]  ;;  %v308_v63 = vld [vmem:[#allocation2 + $0x18] sm:$0xff] }
  0x35   : > { %885 = vmatpush3.bf16.msra.mxu1 %v951_v17 }
  0x36   : > { %886 = vmatprep.subr.bf16.mxu1 %v954_v20 }
  0x37   : > { %849 = vmatpush3.bf16.msra.mxu0 %v953_v19 }
  0x38   : > { %850 = vmatprep.subr.bf16.mxu0 %v955_v21 }
  0x39   : > { %887 = vmatpush3.bf16.msra.mxu1 %v954_v20 }
  0x3a   : > { %888 = vmatprep.subr.bf16.mxu1 %v957_v22 }
  0x3b   : > { %851 = vmatpush3.bf16.msra.mxu0 %v956_v23 }
  0x3c   : > { %852 = vmatprep.subr.bf16.mxu0 %v958_v24 }
  0x3d   : > { %889 = vmatpush3.bf16.msra.mxu1 %v957_v22 }
  0x3e   : > { %890 = vmatprep.subr.bf16.mxu1 %v960_v25 }
  0x3f   : > { %853 = vmatpush3.bf16.msra.mxu0 %v959_v26 }
  0x40   : > { %854 = vmatprep.subr.bf16.mxu0 %v961_v27 }
  0x41   : > { %891 = vmatpush3.bf16.msra.mxu1 %v960_v25 }
  0x42   : > { %892 = vmatprep.subr.bf16.mxu1 %v963_v29 }
  0x43   : > { %855 = vmatpush3.bf16.msra.mxu0 %v962_v28 }
  0x44   : > { %856 = vmatprep.subr.bf16.mxu0 %v964_v30 }
  0x45   : > { %893 = vmatpush3.bf16.msra.mxu1 %v963_v29 }
  0x46   : > { %894 = vmatprep.subr.bf16.mxu1 %v966_v31 }
  0x47   : > { %857 = vmatpush3.bf16.msra.mxu0 %v965_v34 }
  0x49   : > { %895 = vmatpush3.bf16.msra.mxu1 %v966_v31 }
  0x4a   : > { %574 = vmatmul.mubr.bf16.vlgmr.msra.gmra.mrb[0].mxu0 %v967_v35 }
  0x4b   : > { %581 = vmatprep.mubr.bf16.mxu0 %v972_v36 }
  0x4c   : > { %897 = vmatmul.mubr.bf16.vlgmr.msra.gmra.mrb[0].mxu1 %v971_v37 }
  0x52   : > { %582 = vmatmul.mubr.bf16.gmra.mrb[4].mxu0 %v974_v38 }
 0x11d   : > { %v858_v39 = vpop.f32.mrb[0].mxu0 }
 0x11e   : > { %v859_v40 = vpop.f32.mrb[1].mxu0 }
 0x11f   : > { %v860_v41 = vadd.f32 %v859_v40, %v858_v39  ;;  %v861_v42 = vpop.f32.mrb[2].mxu0  ;;  %v898_v43 = vpop.f32.mrb[0].mxu1 }
 0x120   : > { %v862_v44 = vpop.f32.mrb[3].mxu0  ;;  %v624_v46 = vpop.f32.mrb[1].mxu1 }
 0x121   : > { %v863_v47 = vadd.f32 %v862_v44, %v861_v42  ;;  %v625_v48 = vadd.f32 %v860_v41, %v624_v46  ;;  %v899_v49 = vpop.f32.mrb[2].mxu1 }
 0x122   : > { %v627_v51 = vpop.f32.mrb[3].mxu1 }
 0x123   : > { %v639_v52 = vadd.f32 %v625_v48, %v305_v45  ;;  %v628_v53 = vadd.f32 %v863_v47, %v627_v51 }
 0x125   : > { %643 = vst [vmem:[#allocation2] sm:$0xff] %v639_v52  ;;  %v640_v54 = vadd.f32 %v628_v53, %v306_v50  ;;  %v864_v55 = vpop.f32.mrb[4].mxu0 }
 0x126   : > { %v865_v56 = vpop.f32.mrb[5].mxu0 }
 0x127   : > { %644 = vst [vmem:[#allocation2 + $0x8] sm:$0xff] %v640_v54  ;;  %v866_v57 = vadd.f32 %v865_v56, %v864_v55  ;;  %v867_v58 = vpop.f32.mrb[6].mxu0 }
 0x128   : > { %v868_v60 = vpop.f32.mrb[7].mxu0 }
 0x129   : > { %v633_v61 = vadd.f32 %v898_v43, %v866_v57  ;;  %v869_v62 = vadd.f32 %v868_v60, %v867_v58  ;;  %650 = sbr.rel (%p835_p11) target bundleno = 316 (0x13c), region = 66 }
 0x12b   : > { %v641_v0 = vadd.f32 %v633_v61, %v307_v59  ;;  %v636_v1 = vadd.f32 %v899_v49, %v869_v62 }
 0x12c   : > { %v651_v3 = vld [vmem:[#allocation2] sm:$0xff] (!%p835_p11) }
 0x12d   : > { %645 = vst [vmem:[#allocation2 + $0x10] sm:$0xff] %v641_v0  ;;  %v642_v2 = vadd.f32 %v636_v1, %v308_v63  ;;  %v662_v6 = vadd.f32 (!%p835_p11), %v836_v4, %v651_v3 }
 0x12e   : > { %v652_v5 = vld [vmem:[#allocation2 + $0x8] sm:$0xff] (!%p835_p11) }
 0x12f   : > { %646 = vst [vmem:[#allocation2 + $0x18] sm:$0xff] %v642_v2  ;;  %v663_v7 = vadd.f32 (!%p835_p11), %v836_v4, %v652_v5  ;;  %v666_v12 = vmax.f32 (!%p835_p11), %v662_v6, 0.0 }
 0x131   : > { %v667_v13 = vmax.f32 %v663_v7, 0.0  ;;  %670 = vst [vmem:[%s1155_s3] sm:$0xff] %v666_v12 }
 0x133   : > { %671 = vst [vmem:[%s1155_s3 + $0x8] sm:$0xff] %v667_v13 }
 0x134   : > { %v653_v8 = vld [vmem:[#allocation2 + $0x10] sm:$0xff] }
 0x135   : > { %v664_v10 = vadd.f32 %v836_v4, %v653_v8 }
 0x136   : > { %v654_v9 = vld [vmem:[#allocation2 + $0x18] sm:$0xff] }
 0x137   : > { %v665_v11 = vadd.f32 %v836_v4, %v654_v9  ;;  %v668_v14 = vmax.f32 %v664_v10, 0.0 }
 0x139   : > { %v669_v15 = vmax.f32 %v665_v11, 0.0  ;;  %672 = vst [vmem:[%s1155_s3 + $0x10] sm:$0xff] %v668_v14 }
 0x13b   : > { %673 = vst [vmem:[%s1155_s3 + $0x18] sm:$0xff] %v669_v15 }
 0x13c PF: > { %s13_s16 = sadd.s32 1, %s1013_s16   ;;  %s1156_s12 = smov %s1001_s13 }
 0x13d   : > { %p10_p12 = scmp.ge.s32.totalorder %s13_s16, 8   ;;  %s1157_s13 = smov %s1071_s20 }
 0x13e   : > { %s1158_s14 = smov %s1009_s15  ;;  %s1159_s15 = smov %s1161_s17 }
 0x13f   :  { %12 = sbr.rel (!%p10_p12) target bundleno = 3 (0x3), region = 113 }

// kernel: _lambda_.37
= control target key start
LH: loop header
LB: loop body
LE: loop exit
PB: predicated region body
PF: predicated region fallthrough
CT: control target
= control target key end

     0   :  { %s907_s12 = smov 0   ;;  %s909_s13 = smov 0   ;;  %s1013_s0 = inlined_call_operand.vmem [shape: bf16[32,1280], index: 0, kind: input, shape index: {}]   ;;  %s1014_s1 = inlined_call_operand.vmem [shape: bf16[1280,128], index: 1, kind: input, shape index: {}]   ;;  %s1015_s2 = inlined_call_operand.vmem [shape: f32[1,128], index: 2, kind: input, shape index: {}]   ;;  %s1016_s3 = inlined_call_operand.vmem [shape: f32[32,128], index: 3, kind: output, shape index: {}]  }
   0x1   :  { %s911_s14 = smov 0   ;;  %s913_s15 = smov 0  }
   0x2   :  { %s915_s16 = smov 0  }
   0x3 LB: > { %s25_s17 = sadd.s32 1, %s880_s15  ;;  %p48_p1 = scmp.ne.s32.totalorder %s872_s13, %s868_s12  ;;  %s884_s16 = sphi %s915_s16, %s13_s16   ;;  %s880_s15 = sphi %s913_s15, %s1020_s15   ;;  %s876_s14 = sphi %s911_s14, %s1019_s14   ;;  %s872_s13 = sphi %s909_s13, %s1018_s13   ;;  %s868_s12 = sphi %s907_s12, %s1017_s12  }
   0x4   : > { %p26_p0 = scmp.ge.s32.totalorder %s25_s17, 5  ;;  %p49_p2 = scmp.eq.s32.totalorder %s884_s16, 0 }
   0x5   : > { %s41_s19 = sadd.s32 1, %s872_s13  ;;  %p683_p5 = scmp.ge.s32.totalorder %s884_s16, 5 }
   0x6   : > { %s1022_s17 = smov (%p26_p0, %s25_s17), 0  ;;  %p50_p3 = por %p49_p2, %p48_p1 }
   0x7   : > { %s37_s18 = ssub.s32 %s880_s15, %s1022_s17  ;;  %162 = sbr.rel (%p683_p5) target bundleno = 21 (0x15), region = 20 }
   0x8   : > { %p39_p4 = scmp.eq.s32.totalorder %s37_s18, 0 }
   0xa   : > { %s942_s20 = scalar_select %p39_p4, %s872_s13, %s41_s19  }
   0xe   : > { %165 = sbr.rel (!%p50_p3) target bundleno = 21 (0x15), region = 24  ;;  %s167_s21 = sand.u32 (%p50_p3), 1, %s872_s13  }
   0xf   : > { %s722_s22 = sshll.u32 (%p50_p3), %s880_s15, 3  ;;  %s684_s23 = sshll.u32 (%p50_p3), %s167_s21, 5 }
  0x10   : > { %s175_s26 = scalar_lea.vmem (%p50_p3), %s1013_s0, %s722_s22  ;;  %s169_s27 = scalar_lea.vmem (%p50_p3), [#allocation3], %s684_s23 }
  0x11   : > { %v209_v0 = vld [vmem:[%s175_s26] sm:$0xff] (%p50_p3)  ;;  %v211_v1 = vld [vmem:[%s175_s26 + $0x28] sm:$0xff] (%p50_p3)  ;;  %v213_v2 = vld [vmem:[%s175_s26 + $0x50] sm:$0xff] (%p50_p3) }
  0x12   : > { %210 = vst [vmem:[%s169_s27] sm:$0xff] (%p50_p3), %v209_v0  ;;  %212 = vst [vmem:[%s169_s27 + $0x8] sm:$0xff] (%p50_p3), %v211_v1  ;;  %v215_v3 = vld [vmem:[%s175_s26 + $0x78] sm:$0xff] (%p50_p3) }
  0x13   : > { %214 = vst [vmem:[%s169_s27 + $0x10] sm:$0xff] (%p50_p3), %v213_v2  ;;  %216 = vst [vmem:[%s169_s27 + $0x18] sm:$0xff] (%p50_p3), %v215_v3 }
  0x15 PF: > { %p687_p6 = scmp.ge.s32.totalorder %s884_s16, 1  ;;  %p233_p7 = scmp.lt.s32.totalorder %s884_s16, 6 }
  0x17   : > { %p234_p8 = pnand %p687_p6, %p233_p7 }
  0x18   : > { %s240_s28 = sand.u32 (!%p234_p8), 1, %s868_s12   ;;  %s689_s29 = sshll.u32 (!%p234_p8), %s876_s14, 5 }
  0x19   : > { %237 = sbr.rel (%p234_p8) target bundleno = 330 (0x14a), region = 66  ;;  %s688_s30 = sshll.u32 (!%p234_p8), %s240_s28, 5 }
  0x1a   : > { %p280_p9 = scmp.lt.s32.totalorder (!%p234_p8), %s689_s29, 159  ;;  %s959_s8 = scalar_lea.vmem (!%p234_p8), [#allocation3], %s688_s30 }
  0x1b   : > { %p691_p10 = scmp.ne.s32.totalorder (!%p234_p8), %s876_s14, 0 }
  0x20   : > { %s1024_s29 = smov (!%p280_p9, %s689_s29), 159  ;;  %304 = sbr.rel (%p691_p10) target bundleno = 39 (0x27), region = 74 }
  0x21   : > { %s690_s4 = sshll.u32 %s1024_s29, 2  ;;  %v886_v4 = vmov (!%p691_p10), 0.0  }
  0x22   : > { %s957_s7 = scalar_lea.vmem %s1014_s1, %s690_s4  ;;  %305 = vst [vmem:[#allocation2] sm:$0xff] (!%p691_p10), %v886_v4  ;;  %306 = vst [vmem:[#allocation2 + $0x8] sm:$0xff] (!%p691_p10), %v886_v4 }
  0x23   : > { %307 = vst [vmem:[#allocation2 + $0x10] sm:$0xff] (!%p691_p10), %v886_v4  ;;  %308 = vst [vmem:[#allocation2 + $0x18] sm:$0xff] (!%p691_p10), %v886_v4 }
  0x27 PF: > { %v808_v5 = vld [vmem:[%s957_s7 + $0x40] sm:$0xff]   ;;  %v810_v7 = vld [vmem:[%s957_s7 + $0x48] sm:$0xff]   ;;  %v812_v9 = vld [vmem:[%s957_s7 + $0x50] sm:$0xff]   ;;  %p712_p11 = scmp.ne.s32.totalorder %s876_s14, 4 }
  0x28   : > { %v809_v6 = vld [vmem:[%s957_s7] sm:$0xff]   ;;  %723 = vmatprep.subr.bf16.mxu0 %v808_v5  ;;  %751 = vmatprep.subr.bf16.mxu1 %v808_v5  ;;  %v811_v8 = vld [vmem:[%s957_s7 + $0x8] sm:$0xff]   ;;  %v813_v10 = vld [vmem:[%s957_s7 + $0x10] sm:$0xff]  }
  0x29   : > { %724 = vmatpush3.bf16.msra.mxu0 %v809_v6  ;;  %759 = vmatpush3.bf16.msra.mxu1 %v809_v6  ;;  %v814_v11 = vld [vmem:[%s957_s7 + $0x58] sm:$0xff]   ;;  %v816_v13 = vld [vmem:[%s957_s7 + $0x60] sm:$0xff]   ;;  %v818_v15 = vld [vmem:[%s957_s7 + $0x68] sm:$0xff]  }
  0x2a   : > { %725 = vmatprep.subr.bf16.mxu0 %v810_v7  ;;  %752 = vmatprep.subr.bf16.mxu1 %v810_v7  ;;  %v815_v12 = vld [vmem:[%s957_s7 + $0x18] sm:$0xff]   ;;  %v817_v14 = vld [vmem:[%s957_s7 + $0x20] sm:$0xff]   ;;  %v819_v18 = vld [vmem:[%s957_s7 + $0x28] sm:$0xff]  }
  0x2b   : > { %v826_v16 = vld [vmem:[%s959_s8 + $0x4] ss:$8 sps:$4 sm:$0xff]   ;;  %v829_v17 = vld [vmem:[%s959_s8 + $0x14] ss:$8 sps:$4 sm:$0xff]   ;;  %v824_v23 = vld [vmem:[%s959_s8] ss:$8 sps:$4 sm:$0xff]  }
  0x2c   : > { %v820_v19 = vld [vmem:[%s957_s7 + $0x70] sm:$0xff]   ;;  %497 = vmatprep.mubr.bf16.mxu0 %v826_v16  ;;  %505 = vmatprep.mubr.bf16.mxu1 %v829_v17  ;;  %v822_v21 = vld [vmem:[%s957_s7 + $0x78] sm:$0xff]   ;;  %v309_v27 = vld [vmem:[#allocation2] sm:$0xff] }
  0x2d   : > { %726 = vmatpush3.bf16.msra.mxu0 %v811_v8  ;;  %760 = vmatpush3.bf16.msra.mxu1 %v811_v8  ;;  %v821_v20 = vld [vmem:[%s957_s7 + $0x30] sm:$0xff]   ;;  %v823_v22 = vld [vmem:[%s957_s7 + $0x38] sm:$0xff]   ;;  %v310_v35 = vld [vmem:[#allocation2 + $0x8] sm:$0xff] }
  0x2e   : > { %727 = vmatprep.subr.bf16.mxu0 %v812_v9  ;;  %753 = vmatprep.subr.bf16.mxu1 %v812_v9  ;;  %v827_v24 = vld [vmem:[%s959_s8 + $0x10] ss:$8 sps:$4 sm:$0xff]   ;;  %v713_v46 = vld [vmem:[%s1015_s2] ss:$0 sm:$0xff] (!%p712_p11) }
  0x2f   : > { %v311_v29 = vld [vmem:[#allocation2 + $0x10] sm:$0xff]  ;;  %v312_v37 = vld [vmem:[#allocation2 + $0x18] sm:$0xff] }
  0x31   : > { %728 = vmatpush3.bf16.msra.mxu0 %v813_v10  ;;  %761 = vmatpush3.bf16.msra.mxu1 %v813_v10 }
  0x32   : > { %729 = vmatprep.subr.bf16.mxu0 %v814_v11  ;;  %754 = vmatprep.subr.bf16.mxu1 %v814_v11 }
  0x35   : > { %730 = vmatpush3.bf16.msra.mxu0 %v815_v12  ;;  %762 = vmatpush3.bf16.msra.mxu1 %v815_v12 }
  0x36   : > { %731 = vmatprep.subr.bf16.mxu0 %v816_v13  ;;  %755 = vmatprep.subr.bf16.mxu1 %v816_v13 }
  0x39   : > { %732 = vmatpush3.bf16.msra.mxu0 %v817_v14  ;;  %763 = vmatpush3.bf16.msra.mxu1 %v817_v14 }
  0x3a   : > { %733 = vmatprep.subr.bf16.mxu0 %v818_v15  ;;  %756 = vmatprep.subr.bf16.mxu1 %v818_v15 }
  0x3d   : > { %734 = vmatpush3.bf16.msra.mxu0 %v819_v18  ;;  %764 = vmatpush3.bf16.msra.mxu1 %v819_v18 }
  0x3e   : > { %735 = vmatprep.subr.bf16.mxu0 %v820_v19  ;;  %757 = vmatprep.subr.bf16.mxu1 %v820_v19 }
  0x41   : > { %736 = vmatpush3.bf16.msra.mxu0 %v821_v20  ;;  %765 = vmatpush3.bf16.msra.mxu1 %v821_v20 }
  0x42   : > { %737 = vmatprep.subr.bf16.mxu0 %v822_v21  ;;  %758 = vmatprep.subr.bf16.mxu1 %v822_v21 }
  0x45   : > { %738 = vmatpush3.bf16.msra.mxu0 %v823_v22  ;;  %766 = vmatpush3.bf16.msra.mxu1 %v823_v22 }
  0x48   : > { %498 = vmatmul.mubr.bf16.vlgmr.msra.gmra.mrb[0].mxu0 %v824_v23  ;;  %506 = vmatmul.mubr.bf16.vlgmr.msra.gmra.mrb[0].mxu1 %v827_v24 }
 0x11b   : > { %v739_v25 = vpop.f32.mrb[0].mxu0  ;;  %v745_v26 = vpop.f32.mrb[0].mxu1 }
 0x11c   : > { %v740_v28 = vpop.f32.mrb[1].mxu0  ;;  %v746_v30 = vpop.f32.mrb[1].mxu1 }
 0x11d   : > { %v741_v31 = vadd.f32 %v740_v28, %v739_v25  ;;  %v747_v32 = vadd.f32 %v746_v30, %v745_v26  ;;  %v742_v33 = vpop.f32.mrb[2].mxu0  ;;  %v748_v34 = vpop.f32.mrb[2].mxu1  ;;  %525 = sbr.rel (%p712_p11) target bundleno = 330 (0x14a), region = 78 }
 0x11e   : > { %v743_v36 = vpop.f32.mrb[3].mxu0  ;;  %v749_v38 = vpop.f32.mrb[3].mxu1 }
 0x11f   : > { %v514_v39 = vadd.f32 %v741_v31, %v309_v27  ;;  %v516_v40 = vadd.f32 %v747_v32, %v311_v29  ;;  %v744_v41 = vadd.f32 %v743_v36, %v742_v33  ;;  %v750_v42 = vadd.f32 %v749_v38, %v748_v34 }
 0x121   : > { %518 = vst [vmem:[#allocation2] sm:$0xff] %v514_v39  ;;  %520 = vst [vmem:[#allocation2 + $0x10] sm:$0xff] %v516_v40  ;;  %v515_v43 = vadd.f32 %v744_v41, %v310_v35  ;;  %v517_v44 = vadd.f32 %v750_v42, %v312_v37 }
 0x123   : > { %519 = vst [vmem:[#allocation2 + $0x8] sm:$0xff] %v515_v43  ;;  %521 = vst [vmem:[#allocation2 + $0x18] sm:$0xff] %v517_v44 }
 0x128   : > { %v526_v45 = vld [vmem:[#allocation2] sm:$0xff]  ;;  %v528_v50 = vld [vmem:[#allocation2 + $0x10] sm:$0xff] }
 0x129   : > { %v537_v48 = vadd.f32 %v713_v46, %v526_v45  ;;  %v539_v52 = vadd.f32 %v713_v46, %v528_v50 }
 0x12a   : > { %v527_v47 = vld [vmem:[#allocation2 + $0x8] sm:$0xff]  ;;  %v529_v51 = vld [vmem:[#allocation2 + $0x18] sm:$0xff] }
 0x12b   : > { %v538_v49 = vadd.f32 %v713_v46, %v527_v47  ;;  %v540_v53 = vadd.f32 %v713_v46, %v529_v51  ;;  %v714_v54 = vmul.f32 -1.442695, %v537_v48  ;;  %v716_v56 = vmul.f32 -1.442695, %v539_v52 }
 0x12d   : > { %v715_v55 = vmul.f32 -1.442695, %v538_v49  ;;  %v717_v57 = vmul.f32 -1.442695, %v540_v53  ;;  %830 = vpow2.f32 %v714_v54 }
 0x12f   : > { %832 = vpow2.f32 %v715_v55 }
 0x130   : > { %834 = vpow2.f32 %v716_v56 }
 0x131   : > { %836 = vpow2.f32 %v717_v57 }
 0x137   : > { %v831_v58 = vpop.eup %830 }
 0x138   : > { %v553_v60 = vadd.f32 1.0, %v831_v58 }
 0x139   : > { %v833_v59 = vpop.eup %832 }
 0x13a   : > { %v835_v61 = vpop.eup %834  ;;  %v554_v62 = vadd.f32 1.0, %v833_v59  ;;  %838 = vrcp.f32 %v553_v60 }
 0x13b   : > { %v837_v63 = vpop.eup %836  ;;  %v555_v0 = vadd.f32 1.0, %v835_v61 }
 0x13c   : > { %840 = vrcp.f32 %v554_v62  ;;  %v556_v1 = vadd.f32 1.0, %v837_v63 }
 0x13d   : > { %842 = vrcp.f32 %v555_v0 }
 0x13e   : > { %844 = vrcp.f32 %v556_v1 }
 0x144   : > { %v839_v2 = vpop.eup %838 }
 0x145   : > { %565 = vst [vmem:[%s1016_s3] sm:$0xff] %v839_v2 }
 0x146   : > { %v841_v3 = vpop.eup %840 }
 0x147   : > { %v843_v4 = vpop.eup %842  ;;  %566 = vst [vmem:[%s1016_s3 + $0x8] sm:$0xff] %v841_v3 }
 0x148   : > { %v845_v5 = vpop.eup %844  ;;  %567 = vst [vmem:[%s1016_s3 + $0x10] sm:$0xff] %v843_v4 }
 0x149   : > { %568 = vst [vmem:[%s1016_s3 + $0x18] sm:$0xff] %v845_v5 }
 0x14a PF: > { %s13_s16 = sadd.s32 1, %s884_s16   ;;  %s1017_s12 = smov %s872_s13 }
 0x14b   : > { %p10_p12 = scmp.ge.s32.totalorder %s13_s16, 7   ;;  %s1018_s13 = smov %s942_s20 }
 0x14c   : > { %s1019_s14 = smov %s880_s15  ;;  %s1020_s15 = smov %s1022_s17 }
 0x14d   :  { %12 = sbr.rel (!%p10_p12) target bundleno = 3 (0x3), region = 119 }

// kernel: _lambda_.38
= control target key start
LH: loop header
LB: loop body
LE: loop exit
PB: predicated region body
PF: predicated region fallthrough
CT: control target
= control target key end

     0   :  { %s1067_s18 = smov 0   ;;  %s1069_s19 = smov 0   ;;  %s1197_s0 = inlined_call_operand.vmem [shape: bf16[32,1280], index: 0, kind: input, shape index: {}]   ;;  %s1198_s1 = inlined_call_operand.vmem [shape: bf16[1280,128], index: 1, kind: input, shape index: {}]   ;;  %s1199_s2 = inlined_call_operand.vmem [shape: f32[1,128], index: 2, kind: input, shape index: {}]   ;;  %s1200_s3 = inlined_call_operand.vmem [shape: f32[32,128], index: 3, kind: input, shape index: {}]   ;;  %s1201_s4 = inlined_call_operand.vmem [shape: f32[32,128], index: 4, kind: input, shape index: {}]   ;;  %s1202_s5 = inlined_call_operand.vmem [shape: f32[32,128], index: 5, kind: output, shape index: {}]  }
   0x1   :  { %s1071_s20 = smov 0   ;;  %s1073_s21 = smov 0  }
   0x2   :  { %s1075_s22 = smov 0  }
   0x3 LB: > { %s27_s23 = sadd.s32 1, %s1030_s21  ;;  %p50_p1 = scmp.ne.s32.totalorder %s1022_s19, %s1018_s18  ;;  %s1034_s22 = sphi %s1075_s22, %s15_s22   ;;  %s1030_s21 = sphi %s1073_s21, %s1206_s21   ;;  %s1026_s20 = sphi %s1071_s20, %s1205_s20   ;;  %s1022_s19 = sphi %s1069_s19, %s1204_s19   ;;  %s1018_s18 = sphi %s1067_s18, %s1203_s18  }
   0x4   : > { %p28_p0 = scmp.ge.s32.totalorder %s27_s23, 5  ;;  %p51_p2 = scmp.eq.s32.totalorder %s1034_s22, 0 }
   0x5   : > { %s43_s25 = sadd.s32 1, %s1022_s19  ;;  %p845_p5 = scmp.ge.s32.totalorder %s1034_s22, 5 }
   0x6   : > { %s1208_s23 = smov (%p28_p0, %s27_s23), 0  ;;  %p52_p3 = por %p51_p2, %p50_p1 }
   0x7   : > { %s39_s24 = ssub.s32 %s1030_s21, %s1208_s23  ;;  %244 = sbr.rel (%p845_p5) target bundleno = 21 (0x15), region = 28 }
   0x8   : > { %p41_p4 = scmp.eq.s32.totalorder %s39_s24, 0 }
   0xa   : > { %s1102_s26 = scalar_select %p41_p4, %s1022_s19, %s43_s25  }
   0xe   : > { %247 = sbr.rel (!%p52_p3) target bundleno = 21 (0x15), region = 32  ;;  %s249_s27 = sand.u32 (%p52_p3), 1, %s1022_s19  }
   0xf   : > { %s880_s28 = sshll.u32 (%p52_p3), %s1030_s21, 3  ;;  %s846_s29 = sshll.u32 (%p52_p3), %s249_s27, 5 }
  0x10   : > { %s257_s7 = scalar_lea.vmem (%p52_p3), %s1197_s0, %s880_s28  ;;  %s251_s8 = scalar_lea.vmem (%p52_p3), [#allocation3], %s846_s29 }
  0x11   : > { %v291_v0 = vld [vmem:[%s257_s7] sm:$0xff] (%p52_p3)  ;;  %v293_v1 = vld [vmem:[%s257_s7 + $0x28] sm:$0xff] (%p52_p3)  ;;  %v295_v2 = vld [vmem:[%s257_s7 + $0x50] sm:$0xff] (%p52_p3) }
  0x12   : > { %292 = vst [vmem:[%s251_s8] sm:$0xff] (%p52_p3), %v291_v0  ;;  %294 = vst [vmem:[%s251_s8 + $0x8] sm:$0xff] (%p52_p3), %v293_v1  ;;  %v297_v3 = vld [vmem:[%s257_s7 + $0x78] sm:$0xff] (%p52_p3) }
  0x13   : > { %296 = vst [vmem:[%s251_s8 + $0x10] sm:$0xff] (%p52_p3), %v295_v2  ;;  %298 = vst [vmem:[%s251_s8 + $0x18] sm:$0xff] (%p52_p3), %v297_v3 }
  0x15 PF: > { %p849_p6 = scmp.ge.s32.totalorder %s1034_s22, 1  ;;  %p315_p7 = scmp.lt.s32.totalorder %s1034_s22, 6 }
  0x17   : > { %p316_p8 = pnand %p849_p6, %p315_p7 }
  0x18   : > { %s322_s9 = sand.u32 (!%p316_p8), 1, %s1018_s18   ;;  %s851_s10 = sshll.u32 (!%p316_p8), %s1026_s20, 5 }
  0x19   : > { %319 = sbr.rel (%p316_p8) target bundleno = 319 (0x13f), region = 74  ;;  %s850_s11 = sshll.u32 (!%p316_p8), %s322_s9, 5 }
  0x1a   : > { %p382_p9 = scmp.lt.s32.totalorder (!%p316_p8), %s851_s10, 159  ;;  %s1119_s16 = scalar_lea.vmem (!%p316_p8), [#allocation3], %s850_s11 }
  0x1b   : > { %p853_p10 = scmp.ne.s32.totalorder (!%p316_p8), %s1026_s20, 0 }
  0x20   : > { %s1210_s10 = smov (!%p382_p9, %s851_s10), 159  ;;  %424 = sbr.rel (%p853_p10) target bundleno = 39 (0x27), region = 82 }
  0x21   : > { %s852_s12 = sshll.u32 %s1210_s10, 2  ;;  %v1036_v4 = vmov (!%p853_p10), 0.0  }
  0x22   : > { %s1117_s15 = scalar_lea.vmem %s1198_s1, %s852_s12  ;;  %425 = vst [vmem:[#allocation2] sm:$0xff] (!%p853_p10), %v1036_v4  ;;  %426 = vst [vmem:[#allocation2 + $0x8] sm:$0xff] (!%p853_p10), %v1036_v4 }
  0x23   : > { %427 = vst [vmem:[#allocation2 + $0x10] sm:$0xff] (!%p853_p10), %v1036_v4  ;;  %428 = vst [vmem:[#allocation2 + $0x18] sm:$0xff] (!%p853_p10), %v1036_v4 }
  0x27 PF: > { %v966_v5 = vld [vmem:[%s1117_s15 + $0x40] sm:$0xff]   ;;  %v968_v7 = vld [vmem:[%s1117_s15 + $0x48] sm:$0xff]   ;;  %v970_v9 = vld [vmem:[%s1117_s15 + $0x50] sm:$0xff]   ;;  %p874_p11 = scmp.ne.s32.totalorder %s1026_s20, 4 }
  0x28   : > { %v967_v6 = vld [vmem:[%s1117_s15] sm:$0xff]   ;;  %881 = vmatprep.subr.bf16.mxu0 %v966_v5  ;;  %909 = vmatprep.subr.bf16.mxu1 %v966_v5  ;;  %v969_v8 = vld [vmem:[%s1117_s15 + $0x8] sm:$0xff]   ;;  %v971_v10 = vld [vmem:[%s1117_s15 + $0x10] sm:$0xff]  }
  0x29   : > { %882 = vmatpush3.bf16.msra.mxu0 %v967_v6  ;;  %917 = vmatpush3.bf16.msra.mxu1 %v967_v6  ;;  %v972_v11 = vld [vmem:[%s1117_s15 + $0x58] sm:$0xff]   ;;  %v974_v13 = vld [vmem:[%s1117_s15 + $0x60] sm:$0xff]   ;;  %v976_v15 = vld [vmem:[%s1117_s15 + $0x68] sm:$0xff]  }
  0x2a   : > { %883 = vmatprep.subr.bf16.mxu0 %v968_v7  ;;  %910 = vmatprep.subr.bf16.mxu1 %v968_v7  ;;  %v973_v12 = vld [vmem:[%s1117_s15 + $0x18] sm:$0xff]   ;;  %v975_v14 = vld [vmem:[%s1117_s15 + $0x20] sm:$0xff]   ;;  %v977_v18 = vld [vmem:[%s1117_s15 + $0x28] sm:$0xff]  }
  0x2b   : > { %v984_v16 = vld [vmem:[%s1119_s16 + $0x4] ss:$8 sps:$4 sm:$0xff]   ;;  %v987_v17 = vld [vmem:[%s1119_s16 + $0x14] ss:$8 sps:$4 sm:$0xff]   ;;  %v982_v23 = vld [vmem:[%s1119_s16] ss:$8 sps:$4 sm:$0xff]  }
  0x2c   : > { %v978_v19 = vld [vmem:[%s1117_s15 + $0x70] sm:$0xff]   ;;  %617 = vmatprep.mubr.bf16.mxu0 %v984_v16  ;;  %625 = vmatprep.mubr.bf16.mxu1 %v987_v17  ;;  %v980_v21 = vld [vmem:[%s1117_s15 + $0x78] sm:$0xff]   ;;  %v429_v27 = vld [vmem:[#allocation2] sm:$0xff] }
  0x2d   : > { %884 = vmatpush3.bf16.msra.mxu0 %v969_v8  ;;  %918 = vmatpush3.bf16.msra.mxu1 %v969_v8  ;;  %v979_v20 = vld [vmem:[%s1117_s15 + $0x30] sm:$0xff]   ;;  %v981_v22 = vld [vmem:[%s1117_s15 + $0x38] sm:$0xff]   ;;  %v430_v35 = vld [vmem:[#allocation2 + $0x8] sm:$0xff] }
  0x2e   : > { %885 = vmatprep.subr.bf16.mxu0 %v970_v9  ;;  %911 = vmatprep.subr.bf16.mxu1 %v970_v9  ;;  %v985_v24 = vld [vmem:[%s1119_s16 + $0x10] ss:$8 sps:$4 sm:$0xff]   ;;  %v875_v46 = vld [vmem:[%s1199_s2] ss:$0 sm:$0xff] (!%p874_p11)  ;;  %v666_v55 = vld [vmem:[%s1201_s4 + $0x8] sm:$0xff] (!%p874_p11) }
  0x2f   : > { %v431_v29 = vld [vmem:[#allocation2 + $0x10] sm:$0xff]  ;;  %v432_v37 = vld [vmem:[#allocation2 + $0x18] sm:$0xff]  ;;  %v665_v54 = vld [vmem:[%s1201_s4] sm:$0xff] (!%p874_p11)  ;;  %v670_v60 = vsub.f32 (!%p874_p11), 1.0, %v666_v55 }
  0x30   : > { %v667_v56 = vld [vmem:[%s1201_s4 + $0x10] sm:$0xff] (!%p874_p11)  ;;  %v669_v57 = vsub.f32 (!%p874_p11), 1.0, %v665_v54  ;;  %v668_v58 = vld [vmem:[%s1201_s4 + $0x18] sm:$0xff] (!%p874_p11)  ;;  %v673_v59 = vld [vmem:[%s1200_s3] sm:$0xff] (!%p874_p11) }
  0x31   : > { %886 = vmatpush3.bf16.msra.mxu0 %v971_v10  ;;  %919 = vmatpush3.bf16.msra.mxu1 %v971_v10  ;;  %v674_v61 = vld [vmem:[%s1200_s3 + $0x8] sm:$0xff] (!%p874_p11)  ;;  %v671_v62 = vsub.f32 (!%p874_p11), 1.0, %v667_v56  ;;  %v675_v63 = vld [vmem:[%s1200_s3 + $0x10] sm:$0xff] (!%p874_p11)  ;;  %v672_v0 = vsub.f32 (!%p874_p11), 1.0, %v668_v58  ;;  %v676_v2 = vld [vmem:[%s1200_s3 + $0x18] sm:$0xff] (!%p874_p11) }
  0x32   : > { %887 = vmatprep.subr.bf16.mxu0 %v972_v11  ;;  %912 = vmatprep.subr.bf16.mxu1 %v972_v11  ;;  %v677_v1 = vmul.f32 (!%p874_p11), %v673_v59, %v669_v57  ;;  %v678_v4 = vmul.f32 (!%p874_p11), %v674_v61, %v670_v60 }
  0x33   : > { %v679_v7 = vmul.f32 (!%p874_p11), %v675_v63, %v671_v62  ;;  %v680_v10 = vmul.f32 (!%p874_p11), %v676_v2, %v672_v0 }
  0x35   : > { %888 = vmatpush3.bf16.msra.mxu0 %v973_v12  ;;  %920 = vmatpush3.bf16.msra.mxu1 %v973_v12 }
  0x36   : > { %889 = vmatprep.subr.bf16.mxu0 %v974_v13  ;;  %913 = vmatprep.subr.bf16.mxu1 %v974_v13 }
  0x39   : > { %890 = vmatpush3.bf16.msra.mxu0 %v975_v14  ;;  %921 = vmatpush3.bf16.msra.mxu1 %v975_v14 }
  0x3a   : > { %891 = vmatprep.subr.bf16.mxu0 %v976_v15  ;;  %914 = vmatprep.subr.bf16.mxu1 %v976_v15 }
  0x3d   : > { %892 = vmatpush3.bf16.msra.mxu0 %v977_v18  ;;  %922 = vmatpush3.bf16.msra.mxu1 %v977_v18 }
  0x3e   : > { %893 = vmatprep.subr.bf16.mxu0 %v978_v19  ;;  %915 = vmatprep.subr.bf16.mxu1 %v978_v19 }
  0x41   : > { %894 = vmatpush3.bf16.msra.mxu0 %v979_v20  ;;  %923 = vmatpush3.bf16.msra.mxu1 %v979_v20 }
  0x42   : > { %895 = vmatprep.subr.bf16.mxu0 %v980_v21  ;;  %916 = vmatprep.subr.bf16.mxu1 %v980_v21 }
  0x45   : > { %896 = vmatpush3.bf16.msra.mxu0 %v981_v22  ;;  %924 = vmatpush3.bf16.msra.mxu1 %v981_v22 }
  0x48   : > { %618 = vmatmul.mubr.bf16.vlgmr.msra.gmra.mrb[0].mxu0 %v982_v23  ;;  %626 = vmatmul.mubr.bf16.vlgmr.msra.gmra.mrb[0].mxu1 %v985_v24 }
 0x11b   : > { %v897_v25 = vpop.f32.mrb[0].mxu0  ;;  %v903_v26 = vpop.f32.mrb[0].mxu1 }
 0x11c   : > { %v898_v28 = vpop.f32.mrb[1].mxu0  ;;  %v904_v30 = vpop.f32.mrb[1].mxu1 }
 0x11d   : > { %v899_v31 = vadd.f32 %v898_v28, %v897_v25  ;;  %v905_v32 = vadd.f32 %v904_v30, %v903_v26  ;;  %v900_v33 = vpop.f32.mrb[2].mxu0  ;;  %v906_v34 = vpop.f32.mrb[2].mxu1  ;;  %645 = sbr.rel (%p874_p11) target bundleno = 319 (0x13f), region = 86 }
 0x11e   : > { %v901_v36 = vpop.f32.mrb[3].mxu0  ;;  %v907_v38 = vpop.f32.mrb[3].mxu1 }
 0x11f   : > { %v634_v39 = vadd.f32 %v899_v31, %v429_v27  ;;  %v636_v40 = vadd.f32 %v905_v32, %v431_v29  ;;  %v902_v41 = vadd.f32 %v901_v36, %v900_v33  ;;  %v908_v42 = vadd.f32 %v907_v38, %v906_v34 }
 0x121   : > { %638 = vst [vmem:[#allocation2] sm:$0xff] %v634_v39  ;;  %640 = vst [vmem:[#allocation2 + $0x10] sm:$0xff] %v636_v40  ;;  %v635_v43 = vadd.f32 %v902_v41, %v430_v35  ;;  %v637_v44 = vadd.f32 %v908_v42, %v432_v37 }
 0x123   : > { %639 = vst [vmem:[#allocation2 + $0x8] sm:$0xff] %v635_v43  ;;  %641 = vst [vmem:[#allocation2 + $0x18] sm:$0xff] %v637_v44 }
 0x128   : > { %v646_v45 = vld [vmem:[#allocation2] sm:$0xff]  ;;  %v648_v50 = vld [vmem:[#allocation2 + $0x10] sm:$0xff] }
 0x129   : > { %v657_v47 = vadd.f32 %v875_v46, %v646_v45  ;;  %v659_v51 = vadd.f32 %v875_v46, %v648_v50 }
 0x12a   : > { %v647_v48 = vld [vmem:[#allocation2 + $0x8] sm:$0xff]  ;;  %v649_v52 = vld [vmem:[#allocation2 + $0x18] sm:$0xff] }
 0x12b   : > { %v658_v49 = vadd.f32 %v875_v46, %v647_v48  ;;  %988 = vtanh.f32 %v657_v47  ;;  %v660_v53 = vadd.f32 %v875_v46, %v649_v52 }
 0x12d   : > { %990 = vtanh.f32 %v658_v49 }
 0x12e   : > { %992 = vtanh.f32 %v659_v51 }
 0x12f   : > { %994 = vtanh.f32 %v660_v53 }
 0x135   : > { %v989_v3 = vpop.eup %988 }
 0x136   : > { %v681_v6 = vmul.f32 %v989_v3, %v665_v54 }
 0x137   : > { %v991_v5 = vpop.eup %990 }
 0x138   : > { %v993_v8 = vpop.eup %992  ;;  %v682_v9 = vmul.f32 %v991_v5, %v666_v55  ;;  %v685_v12 = vadd.f32 %v681_v6, %v677_v1 }
 0x139   : > { %v995_v11 = vpop.eup %994  ;;  %v683_v13 = vmul.f32 %v993_v8, %v667_v56 }
 0x13a   : > { %v686_v14 = vadd.f32 %v682_v9, %v678_v4  ;;  %v684_v15 = vmul.f32 %v995_v11, %v668_v58  ;;  %689 = vst [vmem:[%s1202_s5] sm:$0xff] %v685_v12 }
 0x13b   : > { %v687_v16 = vadd.f32 %v683_v13, %v679_v7 }
 0x13c   : > { %690 = vst [vmem:[%s1202_s5 + $0x8] sm:$0xff] %v686_v14  ;;  %v688_v17 = vadd.f32 %v684_v15, %v680_v10 }
 0x13d   : > { %691 = vst [vmem:[%s1202_s5 + $0x10] sm:$0xff] %v687_v16 }
 0x13e   : > { %692 = vst [vmem:[%s1202_s5 + $0x18] sm:$0xff] %v688_v17 }
 0x13f PF: > { %s15_s22 = sadd.s32 1, %s1034_s22   ;;  %s1203_s18 = smov %s1022_s19 }
 0x140   : > { %p12_p12 = scmp.ge.s32.totalorder %s15_s22, 7   ;;  %s1204_s19 = smov %s1102_s26 }
 0x141   : > { %s1205_s20 = smov %s1030_s21  ;;  %s1206_s21 = smov %s1208_s23 }
 0x142   :  { %14 = sbr.rel (!%p12_p12) target bundleno = 3 (0x3), region = 133 }

// kernel: _lambda_.41
= control target key start
LH: loop header
LB: loop body
LE: loop exit
PB: predicated region body
PF: predicated region fallthrough
CT: control target
= control target key end

     0   :  { %s1124_s12 = smov 0   ;;  %s1126_s13 = smov 0   ;;  %s1287_s0 = inlined_call_operand.vmem [shape: bf16[32,640], index: 0, kind: input, shape index: {}]   ;;  %s1288_s1 = inlined_call_operand.vmem [shape: bf16[640,512], index: 1, kind: input, shape index: {}]   ;;  %s1289_s2 = inlined_call_operand.vmem [shape: f32[1,512], index: 2, kind: input, shape index: {}]   ;;  %s1290_s3 = inlined_call_operand.vmem [shape: f32[32,512], index: 3, kind: output, shape index: {}]  }
   0x1   :  { %s1128_s14 = smov 0   ;;  %s1130_s15 = smov 0  }
   0x2   :  { %s1132_s16 = smov 0  }
   0x3 LB: > { %s25_s17 = sadd.s32 1, %s1096_s15  ;;  %p48_p1 = scmp.ne.s32.totalorder %s1088_s13, %s1084_s12  ;;  %s1100_s16 = sphi %s1132_s16, %s13_s16   ;;  %s1096_s15 = sphi %s1130_s15, %s1294_s15   ;;  %s1092_s14 = sphi %s1128_s14, %s1293_s14   ;;  %s1088_s13 = sphi %s1126_s13, %s1292_s13   ;;  %s1084_s12 = sphi %s1124_s12, %s1291_s12  }
   0x4   : > { %p26_p0 = scmp.ge.s32.totalorder %s25_s17, 5  ;;  %p49_p2 = scmp.eq.s32.totalorder %s1100_s16, 0 }
   0x5   : > { %s41_s19 = sadd.s32 1, %s1088_s13  ;;  %p921_p5 = scmp.ge.s32.totalorder %s1100_s16, 5 }
   0x6   : > { %s1296_s17 = smov (%p26_p0, %s25_s17), 0  ;;  %p50_p3 = por %p49_p2, %p48_p1 }
   0x7   : > { %s37_s18 = ssub.s32 %s1096_s15, %s1296_s17  ;;  %164 = sbr.rel (%p921_p5) target bundleno = 21 (0x15), region = 20 }
   0x8   : > { %p39_p4 = scmp.eq.s32.totalorder %s37_s18, 0 }
   0xa   : > { %s1159_s20 = scalar_select %p39_p4, %s1088_s13, %s41_s19  }
   0xe   : > { %167 = sbr.rel (!%p50_p3) target bundleno = 21 (0x15), region = 24  ;;  %s169_s21 = sand.u32 (%p50_p3), 1, %s1088_s13  }
   0xf   : > { %s923_s22 = sshll.u32 (%p50_p3), %s1096_s15, 2  ;;  %s922_s23 = sshll.u32 (%p50_p3), %s169_s21, 4 }
  0x10   : > { %s176_s26 = scalar_lea.vmem (%p50_p3), %s1287_s0, %s923_s22  ;;  %s171_s27 = scalar_lea.vmem (%p50_p3), [#allocation3], %s922_s23 }
  0x11   : > { %v192_v0 = vld [vmem:[%s176_s26] sm:$0xf] (%p50_p3)  ;;  %v194_v1 = vld [vmem:[%s176_s26 + $0x14] sm:$0xf] (%p50_p3)  ;;  %v196_v2 = vld [vmem:[%s176_s26 + $0x28] sm:$0xf] (%p50_p3) }
  0x12   : > { %193 = vst [vmem:[%s171_s27] sm:$0xf] (%p50_p3), %v192_v0  ;;  %195 = vst [vmem:[%s171_s27 + $0x4] sm:$0xf] (%p50_p3), %v194_v1  ;;  %v198_v3 = vld [vmem:[%s176_s26 + $0x3c] sm:$0xf] (%p50_p3) }
  0x13   : > { %197 = vst [vmem:[%s171_s27 + $0x8] sm:$0xf] (%p50_p3), %v196_v2  ;;  %199 = vst [vmem:[%s171_s27 + $0xc] sm:$0xf] (%p50_p3), %v198_v3 }
  0x15 PF: > { %p924_p6 = scmp.ge.s32.totalorder %s1100_s16, 1  ;;  %p244_p7 = scmp.lt.s32.totalorder %s1100_s16, 6 }
  0x17   : > { %p245_p8 = pnand %p924_p6, %p244_p7 }
  0x18   : > { %s251_s28 = sand.u32 (!%p245_p8), 1, %s1084_s12   ;;  %s926_s29 = sshll.u32 (!%p245_p8), %s1092_s14, 4 }
  0x19   : > { %248 = sbr.rel (%p245_p8) target bundleno = 314 (0x13a), region = 69  ;;  %s1171_s30 = sshll.u32 (!%p245_p8), %s251_s28, 4 }
  0x1a   : > { %p296_p9 = scmp.lt.s32.totalorder (!%p245_p8), %s926_s29, 79  ;;  %s253_s8 = scalar_lea.vmem (!%p245_p8), [#allocation3], %s1171_s30 }
  0x1b   : > { %p929_p10 = scmp.ne.s32.totalorder (!%p245_p8), %s1092_s14, 0 }
  0x20   : > { %s1298_s29 = smov (!%p296_p9, %s926_s29), 79  ;;  %327 = sbr.rel (%p929_p10) target bundleno = 42 (0x2a), region = 77 }
  0x21   : > { %s969_s4 = sshll.u32 %s1298_s29, 4  ;;  %v1102_v4 = vmov (!%p929_p10), 0.0  }
  0x22   : > { %s1176_s7 = scalar_lea.vmem %s1288_s1, %s969_s4  ;;  %328 = vst [vmem:[#allocation2] sm:$0xff] (!%p929_p10), %v1102_v4  ;;  %329 = vst [vmem:[#allocation2 + $0x8] sm:$0xff] (!%p929_p10), %v1102_v4 }
  0x23   : > { %330 = vst [vmem:[#allocation2 + $0x10] sm:$0xff] (!%p929_p10), %v1102_v4  ;;  %331 = vst [vmem:[#allocation2 + $0x18] sm:$0xff] (!%p929_p10), %v1102_v4 }
  0x24   : > { %332 = vst [vmem:[#allocation2 + $0x20] sm:$0xff] (!%p929_p10), %v1102_v4  ;;  %333 = vst [vmem:[#allocation2 + $0x28] sm:$0xff] (!%p929_p10), %v1102_v4 }
  0x25   : > { %334 = vst [vmem:[#allocation2 + $0x30] sm:$0xff] (!%p929_p10), %v1102_v4  ;;  %335 = vst [vmem:[#allocation2 + $0x38] sm:$0xff] (!%p929_p10), %v1102_v4 }
  0x26   : > { %336 = vst [vmem:[#allocation2 + $0x40] sm:$0xff] (!%p929_p10), %v1102_v4  ;;  %337 = vst [vmem:[#allocation2 + $0x48] sm:$0xff] (!%p929_p10), %v1102_v4 }
  0x27   : > { %338 = vst [vmem:[#allocation2 + $0x50] sm:$0xff] %v1102_v4  ;;  %339 = vst [vmem:[#allocation2 + $0x58] sm:$0xff] %v1102_v4 }
  0x28   : > { %340 = vst [vmem:[#allocation2 + $0x60] sm:$0xff] %v1102_v4  ;;  %341 = vst [vmem:[#allocation2 + $0x68] sm:$0xff] %v1102_v4 }
  0x29   : > { %342 = vst [vmem:[#allocation2 + $0x70] sm:$0xff] %v1102_v4  ;;  %343 = vst [vmem:[#allocation2 + $0x78] sm:$0xff] %v1102_v4 }
  0x2a PF: > { %v1012_v5 = vld [vmem:[%s1176_s7 + $0x4] ss:$16 sps:$4 sm:$0xff]   ;;  %v1014_v6 = vld [vmem:[%s1176_s7 + $0xc] ss:$16 sps:$4 sm:$0xff]   ;;  %v1103_v7 = vmov 0   ;;  %p964_p11 = scmp.ne.s32.totalorder %s1092_s14, 4 }
  0x2b   : > { %600 = vmatprep.mubr.bf16.mxu0 %v1103_v7  ;;  %653 = vmatprep.mubr.bf16.mxu1 %v1103_v7  ;;  %v1016_v8 = vld [vmem:[%s1176_s7] ss:$16 sps:$4 sm:$0xff]   ;;  %v1017_v9 = vld [vmem:[%s1176_s7 + $0x8] ss:$16 sps:$4 sm:$0xff]   ;;  %v1018_v10 = vld [vmem:[%s1176_s7 + $0x24] ss:$16 sps:$4 sm:$0xff]  }
  0x2c   : > { %568 = vmatprep.subr.bf16.mxu0 %v1012_v5  ;;  %621 = vmatprep.subr.bf16.mxu1 %v1014_v6  ;;  %v1020_v11 = vld [vmem:[%s1176_s7 + $0x2c] ss:$16 sps:$4 sm:$0xff]   ;;  %v1022_v12 = vld [vmem:[%s1176_s7 + $0x20] ss:$16 sps:$4 sm:$0xff]   ;;  %v1023_v13 = vld [vmem:[%s1176_s7 + $0x28] ss:$16 sps:$4 sm:$0xff]  }
  0x2d   : > { %569 = vmatpush1.bf16.msra.mxu0 %v1016_v8  ;;  %622 = vmatpush1.bf16.msra.mxu1 %v1017_v9  ;;  %v1024_v14 = vld [vmem:[%s1176_s7 + $0x44] ss:$16 sps:$4 sm:$0xff]   ;;  %v1026_v15 = vld [vmem:[%s1176_s7 + $0x4c] ss:$16 sps:$4 sm:$0xff]   ;;  %v1028_v16 = vld [vmem:[%s1176_s7 + $0x40] ss:$16 sps:$4 sm:$0xff]  }
  0x2e   : > { %570 = vmatprep.subr.bf16.mxu0 %v1018_v10  ;;  %623 = vmatprep.subr.bf16.mxu1 %v1020_v11  ;;  %v1029_v17 = vld [vmem:[%s1176_s7 + $0x48] ss:$16 sps:$4 sm:$0xff]   ;;  %v1030_v18 = vld [vmem:[%s1176_s7 + $0x64] ss:$16 sps:$4 sm:$0xff]   ;;  %v1032_v19 = vld [vmem:[%s1176_s7 + $0x6c] ss:$16 sps:$4 sm:$0xff]  }
  0x2f   : > { %v1034_v20 = vld [vmem:[%s1176_s7 + $0x60] ss:$16 sps:$4 sm:$0xff]   ;;  %v1035_v21 = vld [vmem:[%s1176_s7 + $0x68] ss:$16 sps:$4 sm:$0xff]   ;;  %v1036_v22 = vld [vmem:[%s1176_s7 + $0x84] ss:$16 sps:$4 sm:$0xff]  }
  0x30   : > { %v1038_v23 = vld [vmem:[%s1176_s7 + $0x8c] ss:$16 sps:$4 sm:$0xff]   ;;  %v1040_v24 = vld [vmem:[%s1176_s7 + $0x80] ss:$16 sps:$4 sm:$0xff]   ;;  %v1041_v25 = vld [vmem:[%s1176_s7 + $0x88] ss:$16 sps:$4 sm:$0xff]  }
  0x31   : > { %571 = vmatpush1.bf16.msra.mxu0 %v1022_v12  ;;  %624 = vmatpush1.bf16.msra.mxu1 %v1023_v13  ;;  %v1042_v26 = vld [vmem:[%s1176_s7 + $0xa4] ss:$16 sps:$4 sm:$0xff]   ;;  %v1044_v27 = vld [vmem:[%s1176_s7 + $0xac] ss:$16 sps:$4 sm:$0xff]   ;;  %v1046_v28 = vld [vmem:[%s1176_s7 + $0xa0] ss:$16 sps:$4 sm:$0xff]  }
  0x32   : > { %572 = vmatprep.subr.bf16.mxu0 %v1024_v14  ;;  %625 = vmatprep.subr.bf16.mxu1 %v1026_v15  ;;  %v1047_v29 = vld [vmem:[%s1176_s7 + $0xa8] ss:$16 sps:$4 sm:$0xff]   ;;  %v1048_v30 = vld [vmem:[%s1176_s7 + $0xc4] ss:$16 sps:$4 sm:$0xff]   ;;  %v1050_v31 = vld [vmem:[%s1176_s7 + $0xcc] ss:$16 sps:$4 sm:$0xff]  }
  0x33   : > { %v1052_v32 = vld [vmem:[%s1176_s7 + $0xc0] ss:$16 sps:$4 sm:$0xff]   ;;  %v1053_v33 = vld [vmem:[%s1176_s7 + $0xc8] ss:$16 sps:$4 sm:$0xff]   ;;  %v1054_v34 = vld [vmem:[%s1176_s7 + $0xe4] ss:$16 sps:$4 sm:$0xff]  }
  0x34   : > { %v1056_v35 = vld [vmem:[%s1176_s7 + $0xec] ss:$16 sps:$4 sm:$0xff]   ;;  %v1058_v36 = vld [vmem:[%s1176_s7 + $0xe0] ss:$16 sps:$4 sm:$0xff]   ;;  %v1059_v37 = vld [vmem:[%s1176_s7 + $0xe8] ss:$16 sps:$4 sm:$0xff]  }
  0x35   : > { %573 = vmatpush1.bf16.msra.mxu0 %v1028_v16  ;;  %626 = vmatpush1.bf16.msra.mxu1 %v1029_v17  ;;  %v1060_v38 = vld [vmem:[%s253_s8] sm:$0xff]   ;;  %v1061_v39 = vld [vmem:[%s253_s8 + $0x8] sm:$0xff]  }
  0x36   : > { %574 = vmatprep.subr.bf16.mxu0 %v1030_v18  ;;  %627 = vmatprep.subr.bf16.mxu1 %v1032_v19  ;;  %v344_v40 = vld [vmem:[#allocation2] sm:$0xff]  ;;  %v346_v41 = vld [vmem:[#allocation2 + $0x10] sm:$0xff]  ;;  %v345_v42 = vld [vmem:[#allocation2 + $0x8] sm:$0xff] }
  0x37   : > { %v347_v43 = vld [vmem:[#allocation2 + $0x18] sm:$0xff]  ;;  %v348_v46 = vld [vmem:[#allocation2 + $0x20] sm:$0xff]  ;;  %v350_v47 = vld [vmem:[#allocation2 + $0x30] sm:$0xff] }
  0x38   : > { %v349_v52 = vld [vmem:[#allocation2 + $0x28] sm:$0xff]  ;;  %v351_v53 = vld [vmem:[#allocation2 + $0x38] sm:$0xff]  ;;  %v352_v0 = vld [vmem:[#allocation2 + $0x40] sm:$0xff] }
  0x39   : > { %575 = vmatpush1.bf16.msra.mxu0 %v1034_v20  ;;  %628 = vmatpush1.bf16.msra.mxu1 %v1035_v21  ;;  %v354_v1 = vld [vmem:[#allocation2 + $0x50] sm:$0xff]  ;;  %v353_v2 = vld [vmem:[#allocation2 + $0x48] sm:$0xff]  ;;  %v355_v3 = vld [vmem:[#allocation2 + $0x58] sm:$0xff] }
  0x3a   : > { %576 = vmatprep.subr.bf16.mxu0 %v1036_v22  ;;  %629 = vmatprep.subr.bf16.mxu1 %v1038_v23  ;;  %v356_v6 = vld [vmem:[#allocation2 + $0x60] sm:$0xff]  ;;  %v357_v12 = vld [vmem:[#allocation2 + $0x68] sm:$0xff]  ;;  %v359_v13 = vld [vmem:[#allocation2 + $0x78] sm:$0xff] }
  0x3d   : > { %577 = vmatpush1.bf16.msra.mxu0 %v1040_v24  ;;  %630 = vmatpush1.bf16.msra.mxu1 %v1041_v25  ;;  %v728_v24 = vlaneseq (!%p964_p11) }
  0x3e   : > { %578 = vmatprep.subr.bf16.mxu0 %v1042_v26  ;;  %631 = vmatprep.subr.bf16.mxu1 %v1044_v27  ;;  %v726_v26 = vld [vmem:[%s1289_s2] sm:$0xf] (!%p964_p11) }
  0x3f   : > { %v729_v25 = vshrl.u32 (!%p964_p11), %v728_v24, 7 }
  0x41   : > { %579 = vmatpush1.bf16.msra.mxu0 %v1046_v28  ;;  %632 = vmatpush1.bf16.msra.mxu1 %v1047_v29  ;;  %v730_v28 = vsub.s32 (!%p964_p11), 0, %v729_v25 }
  0x42   : > { %580 = vmatprep.subr.bf16.mxu0 %v1048_v30  ;;  %633 = vmatprep.subr.bf16.mxu1 %v1050_v31  ;;  %v734_v30 = vsub.s32 (!%p964_p11), 1, %v729_v25  ;;  %v738_v31 = vsub.s32 (!%p964_p11), 2, %v729_v25 }
  0x45   : > { %581 = vmatpush1.bf16.msra.mxu0 %v1052_v32  ;;  %634 = vmatpush1.bf16.msra.mxu1 %v1053_v33  ;;  %v742_v32 = vsub.s32 (!%p964_p11), 3, %v729_v25 }
  0x46   : > { %582 = vmatprep.subr.bf16.mxu0 %v1054_v34  ;;  %635 = vmatprep.subr.bf16.mxu1 %v1056_v35 }
  0x49   : > { %583 = vmatpush1.bf16.msra.mxu0 %v1058_v36  ;;  %636 = vmatpush1.bf16.msra.mxu1 %v1059_v37  ;;  %v731_v36 = vrot.slane (!%p964_p11), %v726_v26, %v730_v28  ;;  %v735_v37 = vrot.slane (!%p964_p11), %v726_v26, %v734_v30 }
  0x4c   : > { %601 = vmatmul.mubr.bf16.vlgmr.msra.gmra.mrb[0].mxu0 %v1060_v38  ;;  %654 = vmatmul.mubr.bf16.vlgmr.msra.gmra.mrb[0].mxu1 %v1060_v38  ;;  %v739_v38 = vrot.slane (!%p964_p11), %v726_v26, %v738_v31 }
  0x4d   : > { %610 = vmatprep.mubr.bf16.mxu0 %v1103_v7  ;;  %663 = vmatprep.mubr.bf16.mxu1 %v1103_v7  ;;  %v358_v7 = vld [vmem:[#allocation2 + $0x70] sm:$0xff] }
  0x54   : > { %611 = vmatmul.mubr.bf16.gmra.mrb[4].mxu0 %v1061_v39  ;;  %664 = vmatmul.mubr.bf16.gmra.mrb[4].mxu1 %v1061_v39  ;;  %v743_v39 = vrot.slane (!%p964_p11), %v726_v26, %v742_v32 }
 0x11f   : > { %v602_v44 = vpop.f32.mrb[0].mxu0  ;;  %v655_v45 = vpop.f32.mrb[0].mxu1 }
 0x120   : > { %v674_v48 = vadd.f32 %v602_v44, %v344_v40  ;;  %v676_v49 = vadd.f32 %v655_v45, %v346_v41  ;;  %v604_v50 = vpop.f32.mrb[1].mxu0  ;;  %v657_v51 = vpop.f32.mrb[1].mxu1 }
 0x121   : > { %v675_v54 = vadd.f32 %v604_v50, %v345_v42  ;;  %v677_v55 = vadd.f32 %v657_v51, %v347_v43  ;;  %v606_v56 = vpop.f32.mrb[2].mxu0  ;;  %v659_v57 = vpop.f32.mrb[2].mxu1 }
 0x122   : > { %690 = vst [vmem:[#allocation2] sm:$0xff] %v674_v48  ;;  %692 = vst [vmem:[#allocation2 + $0x10] sm:$0xff] %v676_v49  ;;  %v678_v58 = vadd.f32 %v606_v56, %v348_v46  ;;  %v680_v59 = vadd.f32 %v659_v57, %v350_v47  ;;  %v608_v60 = vpop.f32.mrb[3].mxu0  ;;  %v661_v61 = vpop.f32.mrb[3].mxu1 }
 0x123   : > { %691 = vst [vmem:[#allocation2 + $0x8] sm:$0xff] %v675_v54  ;;  %693 = vst [vmem:[#allocation2 + $0x18] sm:$0xff] %v677_v55  ;;  %v679_v62 = vadd.f32 %v608_v60, %v349_v52  ;;  %v681_v63 = vadd.f32 %v661_v61, %v351_v53 }
 0x124   : > { %694 = vst [vmem:[#allocation2 + $0x20] sm:$0xff] %v678_v58  ;;  %696 = vst [vmem:[#allocation2 + $0x30] sm:$0xff] %v680_v59 }
 0x125   : > { %695 = vst [vmem:[#allocation2 + $0x28] sm:$0xff] %v679_v62  ;;  %697 = vst [vmem:[#allocation2 + $0x38] sm:$0xff] %v681_v63 }
 0x127   : > { %v612_v4 = vpop.f32.mrb[4].mxu0  ;;  %v665_v5 = vpop.f32.mrb[4].mxu1  ;;  %709 = sbr.rel (%p964_p11) target bundleno = 314 (0x13a), region = 81 }
 0x128   : > { %v682_v8 = vadd.f32 %v612_v4, %v352_v0  ;;  %v684_v9 = vadd.f32 %v665_v5, %v354_v1  ;;  %v614_v10 = vpop.f32.mrb[5].mxu0  ;;  %v667_v11 = vpop.f32.mrb[5].mxu1 }
 0x129   : > { %v683_v14 = vadd.f32 %v614_v10, %v353_v2  ;;  %v685_v15 = vadd.f32 %v667_v11, %v355_v3  ;;  %v616_v16 = vpop.f32.mrb[6].mxu0  ;;  %v669_v17 = vpop.f32.mrb[6].mxu1  ;;  %v710_v27 = vld [vmem:[#allocation2] sm:$0xff] (!%p964_p11)  ;;  %v712_v33 = vld [vmem:[#allocation2 + $0x10] sm:$0xff] (!%p964_p11) }
 0x12a   : > { %698 = vst [vmem:[#allocation2 + $0x40] sm:$0xff] %v682_v8  ;;  %700 = vst [vmem:[#allocation2 + $0x50] sm:$0xff] %v684_v9  ;;  %v686_v18 = vadd.f32 %v616_v16, %v356_v6  ;;  %v688_v19 = vadd.f32 %v669_v17, %v358_v7  ;;  %v618_v20 = vpop.f32.mrb[7].mxu0  ;;  %v671_v21 = vpop.f32.mrb[7].mxu1  ;;  %v711_v29 = vld [vmem:[#allocation2 + $0x8] sm:$0xff] (!%p964_p11)  ;;  %v713_v34 = vld [vmem:[#allocation2 + $0x18] sm:$0xff] (!%p964_p11)  ;;  %v748_v43 = vadd.f32 (!%p964_p11), %v731_v36, %v710_v27 }
 0x12b   : > { %699 = vst [vmem:[#allocation2 + $0x48] sm:$0xff] %v683_v14  ;;  %701 = vst [vmem:[#allocation2 + $0x58] sm:$0xff] %v685_v15  ;;  %v687_v22 = vadd.f32 %v618_v20, %v357_v12  ;;  %v689_v23 = vadd.f32 %v671_v21, %v359_v13  ;;  %v714_v35 = vld [vmem:[#allocation2 + $0x20] sm:$0xff] (!%p964_p11)  ;;  %v716_v41 = vld [vmem:[#allocation2 + $0x30] sm:$0xff] (!%p964_p11)  ;;  %v749_v44 = vadd.f32 (!%p964_p11), %v735_v37, %v711_v29 }
 0x12c   : > { %702 = vst [vmem:[#allocation2 + $0x60] sm:$0xff] %v686_v18  ;;  %704 = vst [vmem:[#allocation2 + $0x70] sm:$0xff] %v688_v19  ;;  %v715_v40 = vld [vmem:[#allocation2 + $0x28] sm:$0xff] (!%p964_p11)  ;;  %v717_v42 = vld [vmem:[#allocation2 + $0x38] sm:$0xff] (!%p964_p11)  ;;  %v750_v45 = vadd.f32 (!%p964_p11), %v739_v38, %v712_v33  ;;  %v751_v46 = vadd.f32 (!%p964_p11), %v743_v39, %v713_v34  ;;  %v752_v50 = vadd.f32 (!%p964_p11), %v731_v36, %v714_v35  ;;  %v764_v57 = vmax.f32 (!%p964_p11), %v748_v43, 0.0 }
 0x12d   : > { %703 = vst [vmem:[#allocation2 + $0x68] sm:$0xff] %v687_v22  ;;  %705 = vst [vmem:[#allocation2 + $0x78] sm:$0xff] %v689_v23  ;;  %v753_v51 = vadd.f32 (!%p964_p11), %v735_v37, %v715_v40  ;;  %v754_v52 = vadd.f32 (!%p964_p11), %v739_v38, %v716_v41  ;;  %v755_v53 = vadd.f32 (!%p964_p11), %v743_v39, %v717_v42  ;;  %v765_v58 = vmax.f32 (!%p964_p11), %v749_v44, 0.0 }
 0x12e   : > { %v766_v59 = vmax.f32 %v750_v45, 0.0  ;;  %v767_v60 = vmax.f32 %v751_v46, 0.0  ;;  %v768_v63 = vmax.f32 %v752_v50, 0.0  ;;  %780 = vst [vmem:[%s1290_s3] sm:$0xff] %v764_v57 }
 0x12f   : > { %v769_v0 = vmax.f32 %v753_v51, 0.0  ;;  %v770_v1 = vmax.f32 %v754_v52, 0.0  ;;  %v771_v2 = vmax.f32 %v755_v53, 0.0  ;;  %781 = vst [vmem:[%s1290_s3 + $0x8] sm:$0xff] %v765_v58 }
 0x130   : > { %782 = vst [vmem:[%s1290_s3 + $0x10] sm:$0xff] %v766_v59  ;;  %783 = vst [vmem:[%s1290_s3 + $0x18] sm:$0xff] %v767_v60 }
 0x131   : > { %v718_v47 = vld [vmem:[#allocation2 + $0x40] sm:$0xff]  ;;  %v720_v49 = vld [vmem:[#allocation2 + $0x50] sm:$0xff]  ;;  %784 = vst [vmem:[%s1290_s3 + $0x20] sm:$0xff] %v768_v63  ;;  %785 = vst [vmem:[%s1290_s3 + $0x28] sm:$0xff] %v769_v0 }
 0x132   : > { %v719_v48 = vld [vmem:[#allocation2 + $0x48] sm:$0xff]  ;;  %v721_v54 = vld [vmem:[#allocation2 + $0x58] sm:$0xff]  ;;  %v756_v3 = vadd.f32 %v731_v36, %v718_v47  ;;  %v758_v5 = vadd.f32 %v739_v38, %v720_v49  ;;  %786 = vst [vmem:[%s1290_s3 + $0x30] sm:$0xff] %v770_v1  ;;  %787 = vst [vmem:[%s1290_s3 + $0x38] sm:$0xff] %v771_v2 }
 0x133   : > { %v722_v55 = vld [vmem:[#allocation2 + $0x60] sm:$0xff]  ;;  %v724_v61 = vld [vmem:[#allocation2 + $0x70] sm:$0xff]  ;;  %v757_v4 = vadd.f32 %v735_v37, %v719_v48  ;;  %v759_v6 = vadd.f32 %v743_v39, %v721_v54 }
 0x134   : > { %v723_v56 = vld [vmem:[#allocation2 + $0x68] sm:$0xff]  ;;  %v725_v62 = vld [vmem:[#allocation2 + $0x78] sm:$0xff]  ;;  %v760_v7 = vadd.f32 %v731_v36, %v722_v55  ;;  %v762_v9 = vadd.f32 %v739_v38, %v724_v61  ;;  %v772_v11 = vmax.f32 %v756_v3, 0.0  ;;  %v774_v13 = vmax.f32 %v758_v5, 0.0 }
 0x135   : > { %v761_v8 = vadd.f32 %v735_v37, %v723_v56  ;;  %v763_v10 = vadd.f32 %v743_v39, %v725_v62  ;;  %v773_v12 = vmax.f32 %v757_v4, 0.0  ;;  %v775_v14 = vmax.f32 %v759_v6, 0.0 }
 0x136   : > { %v776_v15 = vmax.f32 %v760_v7, 0.0  ;;  %v778_v17 = vmax.f32 %v762_v9, 0.0  ;;  %788 = vst [vmem:[%s1290_s3 + $0x40] sm:$0xff] %v772_v11  ;;  %790 = vst [vmem:[%s1290_s3 + $0x50] sm:$0xff] %v774_v13 }
 0x137   : > { %v777_v16 = vmax.f32 %v761_v8, 0.0  ;;  %v779_v18 = vmax.f32 %v763_v10, 0.0  ;;  %789 = vst [vmem:[%s1290_s3 + $0x48] sm:$0xff] %v773_v12  ;;  %791 = vst [vmem:[%s1290_s3 + $0x58] sm:$0xff] %v775_v14 }
 0x138   : > { %792 = vst [vmem:[%s1290_s3 + $0x60] sm:$0xff] %v776_v15  ;;  %794 = vst [vmem:[%s1290_s3 + $0x70] sm:$0xff] %v778_v17 }
 0x139   : > { %793 = vst [vmem:[%s1290_s3 + $0x68] sm:$0xff] %v777_v16  ;;  %795 = vst [vmem:[%s1290_s3 + $0x78] sm:$0xff] %v779_v18 }
 0x13a PF: > { %s13_s16 = sadd.s32 1, %s1100_s16   ;;  %s1291_s12 = smov %s1088_s13 }
 0x13b   : > { %p10_p12 = scmp.ge.s32.totalorder %s13_s16, 7   ;;  %s1292_s13 = smov %s1159_s20 }
 0x13c   : > { %s1293_s14 = smov %s1096_s15  ;;  %s1294_s15 = smov %s1296_s17 }
 0x13d   :  { %12 = sbr.rel (!%p10_p12) target bundleno = 3 (0x3), region = 122 }

// kernel: _lambda_.42
= control target key start
LH: loop header
LB: loop body
LE: loop exit
PB: predicated region body
PF: predicated region fallthrough
CT: control target
= control target key end

     0   :  { %s1032_s12 = smov 0   ;;  %s1034_s13 = smov 0   ;;  %s1148_s0 = inlined_call_operand.vmem [shape: bf16[32,2304], index: 0, kind: input, shape index: {}]   ;;  %s1149_s1 = inlined_call_operand.vmem [shape: bf16[2304,128], index: 1, kind: input, shape index: {}]   ;;  %s1150_s2 = inlined_call_operand.vmem [shape: f32[1,128], index: 2, kind: input, shape index: {}]   ;;  %s1151_s3 = inlined_call_operand.vmem [shape: f32[32,128], index: 3, kind: output, shape index: {}]  }
   0x1   :  { %s1036_s14 = smov 0   ;;  %s1038_s15 = smov 0  }
   0x2   :  { %s1040_s16 = smov 0  }
   0x3 LB: > { %s25_s17 = sadd.s32 1, %s1005_s15  ;;  %p48_p1 = scmp.ne.s32.totalorder %s997_s13, %s993_s12  ;;  %s1009_s16 = sphi %s1040_s16, %s13_s16   ;;  %s1005_s15 = sphi %s1038_s15, %s1155_s15   ;;  %s1001_s14 = sphi %s1036_s14, %s1154_s14   ;;  %s997_s13 = sphi %s1034_s13, %s1153_s13   ;;  %s993_s12 = sphi %s1032_s12, %s1152_s12  }
   0x4   : > { %p26_p0 = scmp.ge.s32.totalorder %s25_s17, 6  ;;  %p49_p2 = scmp.eq.s32.totalorder %s1009_s16, 0 }
   0x5   : > { %s41_s19 = sadd.s32 1, %s997_s13  ;;  %p788_p5 = scmp.ge.s32.totalorder %s1009_s16, 6 }
   0x6   : > { %s1157_s17 = smov (%p26_p0, %s25_s17), 0  ;;  %p50_p3 = por %p49_p2, %p48_p1 }
   0x7   : > { %s37_s18 = ssub.s32 %s1005_s15, %s1157_s17  ;;  %162 = sbr.rel (%p788_p5) target bundleno = 23 (0x17), region = 20 }
   0x8   : > { %p39_p4 = scmp.eq.s32.totalorder %s37_s18, 0 }
   0xa   : > { %s1067_s20 = scalar_select %p39_p4, %s997_s13, %s41_s19  }
   0xe   : > { %165 = sbr.rel (!%p50_p3) target bundleno = 23 (0x17), region = 24  ;;  %s167_s21 = sand.u32 (%p50_p3), 1, %s997_s13  }
   0xf   : > { %s837_s22 = smul.u32 (%p50_p3), 12, %s1005_s15 }
  0x10   : > { %s896_s23 = smul.u32 (%p50_p3), 48, %s167_s21 }
  0x11   : > { %s175_s26 = scalar_lea.vmem (%p50_p3), %s1148_s0, %s837_s22 }
  0x12   : > { %v190_v0 = vld [vmem:[%s175_s26] sm:$0xff] (%p50_p3)  ;;  %v192_v1 = vld [vmem:[%s175_s26 + $0x48] sm:$0xff] (%p50_p3)  ;;  %v194_v2 = vld [vmem:[%s175_s26 + $0x90] sm:$0xff] (%p50_p3)  ;;  %s169_s27 = scalar_lea.vmem (%p50_p3), [#allocation3], %s896_s23 }
  0x13   : > { %191 = vst [vmem:[%s169_s27] sm:$0xff] (%p50_p3), %v190_v0  ;;  %193 = vst [vmem:[%s169_s27 + $0xc] sm:$0xff] (%p50_p3), %v192_v1  ;;  %v196_v3 = vld [vmem:[%s175_s26 + $0xd8] sm:$0xff] (%p50_p3)  ;;  %v790_v4 = vld [vmem:[%s175_s26 + $0x8] sm:$0xf] (%p50_p3) }
  0x14   : > { %195 = vst [vmem:[%s169_s27 + $0x18] sm:$0xff] (%p50_p3), %v194_v2  ;;  %v792_v5 = vld [vmem:[%s175_s26 + $0x50] sm:$0xf] (%p50_p3)  ;;  %197 = vst [vmem:[%s169_s27 + $0x24] sm:$0xff] (%p50_p3), %v196_v3  ;;  %v794_v6 = vld [vmem:[%s175_s26 + $0x98] sm:$0xf] (%p50_p3) }
  0x15   : > { %791 = vst [vmem:[%s169_s27 + $0x8] sm:$0xf] %v790_v4  ;;  %793 = vst [vmem:[%s169_s27 + $0x14] sm:$0xf] %v792_v5  ;;  %v796_v7 = vld [vmem:[%s175_s26 + $0xe0] sm:$0xf] }
  0x16   : > { %795 = vst [vmem:[%s169_s27 + $0x20] sm:$0xf] %v794_v6  ;;  %797 = vst [vmem:[%s169_s27 + $0x2c] sm:$0xf] %v796_v7 }
  0x17 PF: > { %p798_p6 = scmp.ge.s32.totalorder %s1009_s16, 1  ;;  %p229_p7 = scmp.lt.s32.totalorder %s1009_s16, 7 }
  0x19   : > { %p230_p8 = pnand %p798_p6, %p229_p7 }
  0x1a   : > { %s236_s28 = sand.u32 (!%p230_p8), 1, %s993_s12   ;;  %s275_s29 = smul.u32 (!%p230_p8), 48, %s1001_s14 }
  0x1b   : > { %233 = sbr.rel (%p230_p8) target bundleno = 314 (0x13a), region = 54  ;;  %p800_p10 = scmp.ne.s32.totalorder (!%p230_p8), %s1001_s14, 0 }
  0x1c   : > { %s897_s30 = smul.u32 (!%p230_p8), 48, %s236_s28  ;;  %p276_p9 = scmp.lt.s32.totalorder (!%p230_p8), %s275_s29, 287 }
  0x1e   : > { %s1084_s8 = scalar_lea.vmem (!%p230_p8), [#allocation3], %s897_s30 }
  0x22   : > { %s1159_s29 = smov (!%p276_p9, %s275_s29), 287  ;;  %300 = sbr.rel (%p800_p10) target bundleno = 41 (0x29), region = 62 }
  0x23   : > { %s799_s4 = sshll.u32 %s1159_s29, 2  ;;  %v1011_v8 = vmov (!%p800_p10), 0.0  }
  0x24   : > { %s1082_s7 = scalar_lea.vmem %s1149_s1, %s799_s4  ;;  %301 = vst [vmem:[#allocation2] sm:$0xff] (!%p800_p10), %v1011_v8  ;;  %302 = vst [vmem:[#allocation2 + $0x8] sm:$0xff] (!%p800_p10), %v1011_v8 }
  0x25   : > { %303 = vst [vmem:[#allocation2 + $0x10] sm:$0xff] (!%p800_p10), %v1011_v8  ;;  %304 = vst [vmem:[#allocation2 + $0x18] sm:$0xff] (!%p800_p10), %v1011_v8 }
  0x29 PF: > { %v939_v9 = vld [vmem:[%s1082_s7 + $0x40] sm:$0xff]   ;;  %v942_v12 = vld [vmem:[%s1082_s7 + $0x48] sm:$0xff]   ;;  %v945_v15 = vld [vmem:[%s1082_s7 + $0x50] sm:$0xff]   ;;  %p831_p11 = scmp.ne.s32.totalorder %s1001_s14, 5 }
  0x2a   : > { %v940_v10 = vld [vmem:[%s1082_s7] sm:$0xff]   ;;  %838 = vmatprep.subr.bf16.mxu0 %v939_v9  ;;  %v943_v13 = vld [vmem:[%s1082_s7 + $0x8] sm:$0xff]   ;;  %v946_v16 = vld [vmem:[%s1082_s7 + $0x10] sm:$0xff]  }
  0x2b   : > { %v941_v11 = vld [vmem:[%s1082_s7 + $0x80] sm:$0xff]   ;;  %839 = vmatpush3.bf16.msra.mxu0 %v940_v10  ;;  %v944_v14 = vld [vmem:[%s1082_s7 + $0x88] sm:$0xff]   ;;  %v947_v17 = vld [vmem:[%s1082_s7 + $0x90] sm:$0xff]  }
  0x2c   : > { %876 = vmatprep.subr.bf16.mxu1 %v941_v11  ;;  %840 = vmatprep.subr.bf16.mxu0 %v942_v12  ;;  %v948_v18 = vld [vmem:[%s1082_s7 + $0x58] sm:$0xff]   ;;  %v951_v21 = vld [vmem:[%s1082_s7 + $0x60] sm:$0xff]   ;;  %v954_v24 = vld [vmem:[%s1082_s7 + $0x68] sm:$0xff]  }
  0x2d   : > { %877 = vmatpush3.bf16.msra.mxu1 %v941_v11  ;;  %v949_v19 = vld [vmem:[%s1082_s7 + $0x18] sm:$0xff]   ;;  %v953_v22 = vld [vmem:[%s1082_s7 + $0xa0] sm:$0xff]   ;;  %v956_v25 = vld [vmem:[%s1082_s7 + $0xa8] sm:$0xff]  }
  0x2e   : > { %878 = vmatprep.subr.bf16.mxu1 %v944_v14  ;;  %v950_v20 = vld [vmem:[%s1082_s7 + $0x98] sm:$0xff]   ;;  %v952_v23 = vld [vmem:[%s1082_s7 + $0x20] sm:$0xff]   ;;  %v955_v26 = vld [vmem:[%s1082_s7 + $0x28] sm:$0xff]  }
  0x2f   : > { %841 = vmatpush3.bf16.msra.mxu0 %v943_v13  ;;  %v957_v27 = vld [vmem:[%s1082_s7 + $0x70] sm:$0xff]   ;;  %v960_v30 = vld [vmem:[%s1082_s7 + $0x78] sm:$0xff]   ;;  %v305_v45 = vld [vmem:[#allocation2] sm:$0xff] }
  0x30   : > { %842 = vmatprep.subr.bf16.mxu0 %v945_v15  ;;  %v958_v28 = vld [vmem:[%s1082_s7 + $0x30] sm:$0xff]   ;;  %v962_v31 = vld [vmem:[%s1082_s7 + $0xb8] sm:$0xff]   ;;  %v306_v50 = vld [vmem:[#allocation2 + $0x8] sm:$0xff] }
  0x31   : > { %879 = vmatpush3.bf16.msra.mxu1 %v944_v14  ;;  %v959_v29 = vld [vmem:[%s1082_s7 + $0xb0] sm:$0xff]   ;;  %v961_v34 = vld [vmem:[%s1082_s7 + $0x38] sm:$0xff]   ;;  %v832_v4 = vld [vmem:[%s1150_s2] ss:$0 sm:$0xff] (!%p831_p11) }
  0x32   : > { %880 = vmatprep.subr.bf16.mxu1 %v947_v17  ;;  %v965_v32 = vld [vmem:[%s1084_s8 + $0x4] ss:$12 sps:$4 sm:$0xff]   ;;  %v966_v33 = vld [vmem:[%s1084_s8 + $0x8] ss:$12 sps:$4 sm:$0xff]   ;;  %v963_v35 = vld [vmem:[%s1084_s8] ss:$12 sps:$4 sm:$0xff]  }
  0x33   : > { %843 = vmatpush3.bf16.msra.mxu0 %v946_v16  ;;  %573 = vmatprep.mubr.bf16.mxu0 %v965_v32  ;;  %v968_v36 = vld [vmem:[%s1084_s8 + $0x1c] ss:$12 sps:$4 sm:$0xff]   ;;  %v967_v37 = vld [vmem:[%s1084_s8 + $0x20] ss:$12 sps:$4 sm:$0xff]   ;;  %v970_v38 = vld [vmem:[%s1084_s8 + $0x18] ss:$12 sps:$4 sm:$0xff]  }
  0x34   : > { %844 = vmatprep.subr.bf16.mxu0 %v948_v18  ;;  %892 = vmatprep.mubr.bf16.mxu1 %v966_v33  ;;  %v307_v59 = vld [vmem:[#allocation2 + $0x10] sm:$0xff]  ;;  %v308_v63 = vld [vmem:[#allocation2 + $0x18] sm:$0xff] }
  0x35   : > { %881 = vmatpush3.bf16.msra.mxu1 %v947_v17 }
  0x36   : > { %882 = vmatprep.subr.bf16.mxu1 %v950_v20 }
  0x37   : > { %845 = vmatpush3.bf16.msra.mxu0 %v949_v19 }
  0x38   : > { %846 = vmatprep.subr.bf16.mxu0 %v951_v21 }
  0x39   : > { %883 = vmatpush3.bf16.msra.mxu1 %v950_v20 }
  0x3a   : > { %884 = vmatprep.subr.bf16.mxu1 %v953_v22 }
  0x3b   : > { %847 = vmatpush3.bf16.msra.mxu0 %v952_v23 }
  0x3c   : > { %848 = vmatprep.subr.bf16.mxu0 %v954_v24 }
  0x3d   : > { %885 = vmatpush3.bf16.msra.mxu1 %v953_v22 }
  0x3e   : > { %886 = vmatprep.subr.bf16.mxu1 %v956_v25 }
  0x3f   : > { %849 = vmatpush3.bf16.msra.mxu0 %v955_v26 }
  0x40   : > { %850 = vmatprep.subr.bf16.mxu0 %v957_v27 }
  0x41   : > { %887 = vmatpush3.bf16.msra.mxu1 %v956_v25 }
  0x42   : > { %888 = vmatprep.subr.bf16.mxu1 %v959_v29 }
  0x43   : > { %851 = vmatpush3.bf16.msra.mxu0 %v958_v28 }
  0x44   : > { %852 = vmatprep.subr.bf16.mxu0 %v960_v30 }
  0x45   : > { %889 = vmatpush3.bf16.msra.mxu1 %v959_v29 }
  0x46   : > { %890 = vmatprep.subr.bf16.mxu1 %v962_v31 }
  0x47   : > { %853 = vmatpush3.bf16.msra.mxu0 %v961_v34 }
  0x49   : > { %891 = vmatpush3.bf16.msra.mxu1 %v962_v31 }
  0x4a   : > { %574 = vmatmul.mubr.bf16.vlgmr.msra.gmra.mrb[0].mxu0 %v963_v35 }
  0x4b   : > { %581 = vmatprep.mubr.bf16.mxu0 %v968_v36 }
  0x4c   : > { %893 = vmatmul.mubr.bf16.vlgmr.msra.gmra.mrb[0].mxu1 %v967_v37 }
  0x52   : > { %582 = vmatmul.mubr.bf16.gmra.mrb[4].mxu0 %v970_v38 }
 0x11d   : > { %v854_v39 = vpop.f32.mrb[0].mxu0 }
 0x11e   : > { %v855_v40 = vpop.f32.mrb[1].mxu0 }
 0x11f   : > { %v856_v41 = vadd.f32 %v855_v40, %v854_v39  ;;  %v857_v42 = vpop.f32.mrb[2].mxu0  ;;  %v894_v43 = vpop.f32.mrb[0].mxu1 }
 0x120   : > { %v858_v44 = vpop.f32.mrb[3].mxu0  ;;  %v624_v46 = vpop.f32.mrb[1].mxu1 }
 0x121   : > { %v859_v47 = vadd.f32 %v858_v44, %v857_v42  ;;  %v625_v48 = vadd.f32 %v856_v41, %v624_v46  ;;  %v895_v49 = vpop.f32.mrb[2].mxu1 }
 0x122   : > { %v627_v51 = vpop.f32.mrb[3].mxu1 }
 0x123   : > { %v639_v52 = vadd.f32 %v625_v48, %v305_v45  ;;  %v628_v53 = vadd.f32 %v859_v47, %v627_v51 }
 0x125   : > { %643 = vst [vmem:[#allocation2] sm:$0xff] %v639_v52  ;;  %v640_v54 = vadd.f32 %v628_v53, %v306_v50  ;;  %v860_v55 = vpop.f32.mrb[4].mxu0 }
 0x126   : > { %v861_v56 = vpop.f32.mrb[5].mxu0 }
 0x127   : > { %644 = vst [vmem:[#allocation2 + $0x8] sm:$0xff] %v640_v54  ;;  %v862_v57 = vadd.f32 %v861_v56, %v860_v55  ;;  %v863_v58 = vpop.f32.mrb[6].mxu0 }
 0x128   : > { %v864_v60 = vpop.f32.mrb[7].mxu0 }
 0x129   : > { %v633_v61 = vadd.f32 %v894_v43, %v862_v57  ;;  %v865_v62 = vadd.f32 %v864_v60, %v863_v58  ;;  %650 = sbr.rel (%p831_p11) target bundleno = 314 (0x13a), region = 66 }
 0x12b   : > { %v641_v0 = vadd.f32 %v633_v61, %v307_v59  ;;  %v636_v1 = vadd.f32 %v895_v49, %v865_v62 }
 0x12c   : > { %v651_v3 = vld [vmem:[#allocation2] sm:$0xff] (!%p831_p11) }
 0x12d   : > { %645 = vst [vmem:[#allocation2 + $0x10] sm:$0xff] %v641_v0  ;;  %v642_v2 = vadd.f32 %v636_v1, %v308_v63  ;;  %v662_v6 = vadd.f32 (!%p831_p11), %v832_v4, %v651_v3 }
 0x12e   : > { %v652_v5 = vld [vmem:[#allocation2 + $0x8] sm:$0xff] (!%p831_p11) }
 0x12f   : > { %646 = vst [vmem:[#allocation2 + $0x18] sm:$0xff] %v642_v2  ;;  %v663_v7 = vadd.f32 (!%p831_p11), %v832_v4, %v652_v5  ;;  %666 = vst [vmem:[%s1151_s3] sm:$0xff] (!%p831_p11), %v662_v6 }
 0x131   : > { %667 = vst [vmem:[%s1151_s3 + $0x8] sm:$0xff] %v663_v7 }
 0x134   : > { %v653_v8 = vld [vmem:[#allocation2 + $0x10] sm:$0xff] }
 0x135   : > { %v664_v10 = vadd.f32 %v832_v4, %v653_v8 }
 0x136   : > { %v654_v9 = vld [vmem:[#allocation2 + $0x18] sm:$0xff] }
 0x137   : > { %v665_v11 = vadd.f32 %v832_v4, %v654_v9  ;;  %668 = vst [vmem:[%s1151_s3 + $0x10] sm:$0xff] %v664_v10 }
 0x139   : > { %669 = vst [vmem:[%s1151_s3 + $0x18] sm:$0xff] %v665_v11 }
 0x13a PF: > { %s13_s16 = sadd.s32 1, %s1009_s16   ;;  %s1152_s12 = smov %s997_s13 }
 0x13b   : > { %p10_p12 = scmp.ge.s32.totalorder %s13_s16, 8   ;;  %s1153_s13 = smov %s1067_s20 }
 0x13c   : > { %s1154_s14 = smov %s1005_s15  ;;  %s1155_s15 = smov %s1157_s17 }
 0x13d   :  { %12 = sbr.rel (!%p10_p12) target bundleno = 3 (0x3), region = 113 }

// kernel: _lambda_.55
= control target key start
LH: loop header
LB: loop body
LE: loop exit
PB: predicated region body
PF: predicated region fallthrough
CT: control target
= control target key end

     0   :  { %s1016_s12 = smov 0   ;;  %s1018_s13 = smov 0   ;;  %s1195_s0 = inlined_call_operand.vmem [shape: bf16[32,256], index: 0, kind: input, shape index: {}]   ;;  %s1196_s1 = inlined_call_operand.vmem [shape: bf16[256,640], index: 1, kind: input, shape index: {}]   ;;  %s1197_s2 = inlined_call_operand.vmem [shape: f32[1,640], index: 2, kind: input, shape index: {}]   ;;  %s1198_s3 = inlined_call_operand.vmem [shape: f32[32,640], index: 3, kind: output, shape index: {}]  }
   0x1   :  { %s1020_s14 = smov 0   ;;  %s1022_s15 = smov 0  }
   0x2   :  { %s1024_s16 = smov 0  }
   0x3 LB: > { %s28_s17 = sadd.s32 1, %s990_s15  ;;  %s815_s18 = sadd.s32 4294967295, %s994_s16   ;;  %s994_s16 = sphi %s1024_s16, %s13_s16   ;;  %s990_s15 = sphi %s1022_s15, %s1203_s15   ;;  %s986_s14 = sphi %s1020_s14, %s1202_s14   ;;  %s982_s13 = sphi %s1018_s13, %s1201_s13   ;;  %s978_s12 = sphi %s1016_s12, %s1200_s12  }
   0x4   : > { %p30_p0 = scmp.ge.s32.totalorder %s28_s17, 5  ;;  %p76_p1 = scmp.ne.s32.totalorder %s982_s13, %s978_s12 }
   0x5   : > { %p77_p2 = scmp.eq.s32.totalorder %s994_s16, 0  ;;  %p134_p4 = scmp.eq.s32.totalorder %s815_s18, 4 }
   0x6   : > { %s1205_s17 = smov (%p30_p0, %s28_s17), 0  ;;  %s69_s20 = sadd.s32 1, %s982_s13 }
   0x7   : > { %p78_p3 = por %p77_p2, %p76_p1  ;;  %s65_s19 = ssub.s32 %s990_s15, %s1205_s17 }
   0x8   : > { %p67_p5 = scmp.eq.s32.totalorder %s65_s19, 0  ;;  %p1051_p6 = por %p134_p4, %p76_p1 }
   0x9   : > { %p819_p7 = scmp.ge.s32.totalorder %s994_s16, 5 }
   0xa   : > { %s1056_s22 = scalar_select %p67_p5, %s982_s13, %s69_s20  }
   0xb   : > { %171 = sbr.rel (%p819_p7) target bundleno = 43 (0x2b), region = 20 }
  0x12   : > { %174 = sbr.rel (!%p78_p3) target bundleno = 43 (0x2b), region = 24  ;;  %s176_s23 = sand.u32 (%p78_p3), 1, %s982_s13  }
  0x13   : > { %s821_s24 = sshll.u32 (%p78_p3), %s990_s15, 2  ;;  %s820_s25 = sshll.u32 (%p78_p3), %s176_s23, 7 }
  0x14   : > { %s1064_s28 = scalar_lea.vmem (%p78_p3), %s1196_s1, %s821_s24  ;;  %s1068_s29 = scalar_lea.vmem (%p78_p3), [#allocation3], %s820_s25 }
  0x15   : > { %v199_v0 = vld [vmem:[%s1064_s28] sm:$0xf] (%p78_p3)  ;;  %v201_v1 = vld [vmem:[%s1064_s28 + $0x14] sm:$0xf] (%p78_p3)  ;;  %v203_v2 = vld [vmem:[%s1064_s28 + $0x28] sm:$0xf] (%p78_p3) }
  0x16   : > { %200 = vst [vmem:[%s1068_s29] sm:$0xf] (%p78_p3), %v199_v0  ;;  %202 = vst [vmem:[%s1068_s29 + $0x4] sm:$0xf] (%p78_p3), %v201_v1  ;;  %v205_v3 = vld [vmem:[%s1064_s28 + $0x3c] sm:$0xf] (%p78_p3) }
  0x17   : > { %v207_v4 = vld [vmem:[%s1064_s28 + $0x50] sm:$0xf] (%p78_p3)  ;;  %204 = vst [vmem:[%s1068_s29 + $0x8] sm:$0xf] (%p78_p3), %v203_v2  ;;  %206 = vst [vmem:[%s1068_s29 + $0xc] sm:$0xf] (%p78_p3), %v205_v3 }
  0x18   : > { %208 = vst [vmem:[%s1068_s29 + $0x10] sm:$0xf] (%p78_p3), %v207_v4  ;;  %v209_v5 = vld [vmem:[%s1064_s28 + $0x64] sm:$0xf] (%p78_p3)  ;;  %v211_v6 = vld [vmem:[%s1064_s28 + $0x78] sm:$0xf] (%p78_p3) }
  0x19   : > { %v213_v7 = vld [vmem:[%s1064_s28 + $0x8c] sm:$0xf]  ;;  %210 = vst [vmem:[%s1068_s29 + $0x14] sm:$0xf] %v209_v5  ;;  %212 = vst [vmem:[%s1068_s29 + $0x18] sm:$0xf] %v211_v6 }
  0x1a   : > { %214 = vst [vmem:[%s1068_s29 + $0x1c] sm:$0xf] %v213_v7  ;;  %v215_v8 = vld [vmem:[%s1064_s28 + $0xa0] sm:$0xf]  ;;  %v217_v9 = vld [vmem:[%s1064_s28 + $0xb4] sm:$0xf] }
  0x1b   : > { %v219_v10 = vld [vmem:[%s1064_s28 + $0xc8] sm:$0xf]  ;;  %216 = vst [vmem:[%s1068_s29 + $0x20] sm:$0xf] %v215_v8  ;;  %218 = vst [vmem:[%s1068_s29 + $0x24] sm:$0xf] %v217_v9 }
  0x1c   : > { %220 = vst [vmem:[%s1068_s29 + $0x28] sm:$0xf] %v219_v10  ;;  %v221_v11 = vld [vmem:[%s1064_s28 + $0xdc] sm:$0xf]  ;;  %v223_v12 = vld [vmem:[%s1064_s28 + $0xf0] sm:$0xf] }
  0x1d   : > { %v225_v13 = vld [vmem:[%s1064_s28 + $0x104] sm:$0xf]  ;;  %222 = vst [vmem:[%s1068_s29 + $0x2c] sm:$0xf] %v221_v11  ;;  %224 = vst [vmem:[%s1068_s29 + $0x30] sm:$0xf] %v223_v12 }
  0x1e   : > { %226 = vst [vmem:[%s1068_s29 + $0x34] sm:$0xf] %v225_v13  ;;  %v227_v14 = vld [vmem:[%s1064_s28 + $0x118] sm:$0xf]  ;;  %v229_v15 = vld [vmem:[%s1064_s28 + $0x12c] sm:$0xf] }
  0x1f   : > { %v231_v16 = vld [vmem:[%s1064_s28 + $0x140] sm:$0xf]  ;;  %228 = vst [vmem:[%s1068_s29 + $0x38] sm:$0xf] %v227_v14  ;;  %230 = vst [vmem:[%s1068_s29 + $0x3c] sm:$0xf] %v229_v15 }
  0x20   : > { %232 = vst [vmem:[%s1068_s29 + $0x40] sm:$0xf] %v231_v16  ;;  %v233_v17 = vld [vmem:[%s1064_s28 + $0x154] sm:$0xf]  ;;  %v235_v18 = vld [vmem:[%s1064_s28 + $0x168] sm:$0xf] }
  0x21   : > { %v237_v19 = vld [vmem:[%s1064_s28 + $0x17c] sm:$0xf]  ;;  %234 = vst [vmem:[%s1068_s29 + $0x44] sm:$0xf] %v233_v17  ;;  %236 = vst [vmem:[%s1068_s29 + $0x48] sm:$0xf] %v235_v18 }
  0x22   : > { %238 = vst [vmem:[%s1068_s29 + $0x4c] sm:$0xf] %v237_v19  ;;  %v239_v20 = vld [vmem:[%s1064_s28 + $0x190] sm:$0xf]  ;;  %v241_v21 = vld [vmem:[%s1064_s28 + $0x1a4] sm:$0xf] }
  0x23   : > { %v243_v22 = vld [vmem:[%s1064_s28 + $0x1b8] sm:$0xf]  ;;  %240 = vst [vmem:[%s1068_s29 + $0x50] sm:$0xf] %v239_v20  ;;  %242 = vst [vmem:[%s1068_s29 + $0x54] sm:$0xf] %v241_v21 }
  0x24   : > { %244 = vst [vmem:[%s1068_s29 + $0x58] sm:$0xf] %v243_v22  ;;  %v245_v23 = vld [vmem:[%s1064_s28 + $0x1cc] sm:$0xf]  ;;  %v247_v24 = vld [vmem:[%s1064_s28 + $0x1e0] sm:$0xf] }
  0x25   : > { %v249_v25 = vld [vmem:[%s1064_s28 + $0x1f4] sm:$0xf]  ;;  %246 = vst [vmem:[%s1068_s29 + $0x5c] sm:$0xf] %v245_v23  ;;  %248 = vst [vmem:[%s1068_s29 + $0x60] sm:$0xf] %v247_v24 }
  0x26   : > { %250 = vst [vmem:[%s1068_s29 + $0x64] sm:$0xf] %v249_v25  ;;  %v251_v26 = vld [vmem:[%s1064_s28 + $0x208] sm:$0xf]  ;;  %v253_v27 = vld [vmem:[%s1064_s28 + $0x21c] sm:$0xf] }
  0x27   : > { %v255_v28 = vld [vmem:[%s1064_s28 + $0x230] sm:$0xf]  ;;  %252 = vst [vmem:[%s1068_s29 + $0x68] sm:$0xf] %v251_v26  ;;  %254 = vst [vmem:[%s1068_s29 + $0x6c] sm:$0xf] %v253_v27 }
  0x28   : > { %256 = vst [vmem:[%s1068_s29 + $0x70] sm:$0xf] %v255_v28  ;;  %v257_v29 = vld [vmem:[%s1064_s28 + $0x244] sm:$0xf]  ;;  %v259_v30 = vld [vmem:[%s1064_s28 + $0x258] sm:$0xf] }
  0x29   : > { %v261_v31 = vld [vmem:[%s1064_s28 + $0x26c] sm:$0xf]  ;;  %258 = vst [vmem:[%s1068_s29 + $0x74] sm:$0xf] %v257_v29  ;;  %260 = vst [vmem:[%s1068_s29 + $0x78] sm:$0xf] %v259_v30 }
  0x2a   : > { %262 = vst [vmem:[%s1068_s29 + $0x7c] sm:$0xf] %v261_v31 }
  0x2b PF: > { %p822_p8 = scmp.ge.s32.totalorder %s994_s16, 1  ;;  %p354_p9 = scmp.lt.s32.totalorder %s994_s16, 6 }
  0x2d   : > { %p355_p10 = pnand %p822_p8, %p354_p9 }
  0x2e   : > { %s361_s30 = sand.u32 (!%p355_p10), 1, %s978_s12   ;;  %v952_v32 = vld [vmem:[%s1195_s0 + $0x4] ss:$8 sps:$4 sm:$0xff] (!%p355_p10)   ;;  %v955_v33 = vld [vmem:[%s1195_s0 + $0x14] ss:$8 sps:$4 sm:$0xff] (!%p355_p10)   ;;  %p409_p11 = scmp.lt.s32.totalorder (!%p355_p10), %s986_s14, 4 }
  0x2f   : > { %358 = sbr.rel (%p355_p10) target bundleno = 310 (0x136), region = 69  ;;  %s823_s4 = sshll.u32 (!%p355_p10), %s361_s30, 7  ;;  %610 = vmatprep.mubr.bf16.mxu0 (!%p355_p10), %v952_v32  ;;  %618 = vmatprep.mubr.bf16.mxu1 (!%p355_p10), %v955_v33  ;;  %v950_v50 = vld [vmem:[%s1195_s0] ss:$8 sps:$4 sm:$0xff] (!%p355_p10)   ;;  %v953_v51 = vld [vmem:[%s1195_s0 + $0x10] ss:$8 sps:$4 sm:$0xff] (!%p355_p10)  }
  0x30   : > { %s1143_s9 = scalar_lea.vmem (!%p355_p10), [#allocation3], %s823_s4  ;;  %s824_s26 = sshll.u32 (!%p355_p10), %s361_s30, 5 }
  0x31   : > { %v934_v34 = vld [vmem:[%s1143_s9 + $0x40] sm:$0xff] (!%p355_p10)   ;;  %v936_v36 = vld [vmem:[%s1143_s9 + $0x48] sm:$0xff] (!%p355_p10)   ;;  %v938_v38 = vld [vmem:[%s1143_s9 + $0x50] sm:$0xff] (!%p355_p10)   ;;  %s395_s27 = scalar_lea.vmem (!%p355_p10), [#allocation4], %s824_s26 }
  0x32   : > { %v935_v35 = vld [vmem:[%s1143_s9] sm:$0xff] (!%p355_p10)   ;;  %850 = vmatprep.subr.bf16.mxu0 (!%p355_p10), %v934_v34  ;;  %878 = vmatprep.subr.bf16.mxu1 (!%p355_p10), %v934_v34  ;;  %v937_v37 = vld [vmem:[%s1143_s9 + $0x8] sm:$0xff] (!%p355_p10)   ;;  %v939_v39 = vld [vmem:[%s1143_s9 + $0x10] sm:$0xff] (!%p355_p10)  }
  0x33   : > { %851 = vmatpush3.bf16.msra.mxu0 (!%p355_p10), %v935_v35  ;;  %886 = vmatpush3.bf16.msra.mxu1 (!%p355_p10), %v935_v35  ;;  %v940_v40 = vld [vmem:[%s1143_s9 + $0x58] sm:$0xff] (!%p355_p10)   ;;  %v942_v42 = vld [vmem:[%s1143_s9 + $0x60] sm:$0xff] (!%p355_p10)   ;;  %v944_v44 = vld [vmem:[%s1143_s9 + $0x68] sm:$0xff] (!%p355_p10)  }
  0x34   : > { %852 = vmatprep.subr.bf16.mxu0 (!%p355_p10), %v936_v36  ;;  %879 = vmatprep.subr.bf16.mxu1 (!%p355_p10), %v936_v36  ;;  %v941_v41 = vld [vmem:[%s1143_s9 + $0x18] sm:$0xff] (!%p355_p10)   ;;  %v943_v43 = vld [vmem:[%s1143_s9 + $0x20] sm:$0xff] (!%p355_p10)   ;;  %v945_v45 = vld [vmem:[%s1143_s9 + $0x28] sm:$0xff] (!%p355_p10)  }
  0x35   : > { %v946_v46 = vld [vmem:[%s1143_s9 + $0x70] sm:$0xff] (!%p355_p10)   ;;  %v948_v48 = vld [vmem:[%s1143_s9 + $0x78] sm:$0xff] (!%p355_p10)  }
  0x36   : > { %v947_v47 = vld [vmem:[%s1143_s9 + $0x30] sm:$0xff]   ;;  %v949_v49 = vld [vmem:[%s1143_s9 + $0x38] sm:$0xff]   ;;  %s410_s20 = scalar_select %p409_p11, %s986_s14, 4 }
  0x37   : > { %853 = vmatpush3.bf16.msra.mxu0 %v937_v37  ;;  %887 = vmatpush3.bf16.msra.mxu1 %v937_v37  ;;  %s847_s12 = sshll.u32 (%p1051_p6), %s986_s14, 3 }
  0x38   : > { %854 = vmatprep.subr.bf16.mxu0 %v938_v38  ;;  %880 = vmatprep.subr.bf16.mxu1 %v938_v38  ;;  %s411_s25 = scalar_lea.vmem %s1197_s2, %s410_s20  ;;  %s668_s30 = scalar_lea.vmem (%p1051_p6), %s1198_s3, %s847_s12 }
  0x39   : > { %v845_v55 = vld [vmem:[%s411_s25] ss:$0 sm:$0xff] }
  0x3b   : > { %855 = vmatpush3.bf16.msra.mxu0 %v939_v39  ;;  %888 = vmatpush3.bf16.msra.mxu1 %v939_v39 }
  0x3c   : > { %856 = vmatprep.subr.bf16.mxu0 %v940_v40  ;;  %881 = vmatprep.subr.bf16.mxu1 %v940_v40 }
  0x3f   : > { %857 = vmatpush3.bf16.msra.mxu0 %v941_v41  ;;  %889 = vmatpush3.bf16.msra.mxu1 %v941_v41 }
  0x40   : > { %858 = vmatprep.subr.bf16.mxu0 %v942_v42  ;;  %882 = vmatprep.subr.bf16.mxu1 %v942_v42 }
  0x43   : > { %859 = vmatpush3.bf16.msra.mxu0 %v943_v43  ;;  %890 = vmatpush3.bf16.msra.mxu1 %v943_v43 }
  0x44   : > { %860 = vmatprep.subr.bf16.mxu0 %v944_v44  ;;  %883 = vmatprep.subr.bf16.mxu1 %v944_v44 }
  0x47   : > { %861 = vmatpush3.bf16.msra.mxu0 %v945_v45  ;;  %891 = vmatpush3.bf16.msra.mxu1 %v945_v45 }
  0x48   : > { %862 = vmatprep.subr.bf16.mxu0 %v946_v46  ;;  %884 = vmatprep.subr.bf16.mxu1 %v946_v46 }
  0x4b   : > { %863 = vmatpush3.bf16.msra.mxu0 %v947_v47  ;;  %892 = vmatpush3.bf16.msra.mxu1 %v947_v47 }
  0x4c   : > { %864 = vmatprep.subr.bf16.mxu0 %v948_v48  ;;  %885 = vmatprep.subr.bf16.mxu1 %v948_v48 }
  0x4f   : > { %865 = vmatpush3.bf16.msra.mxu0 %v949_v49  ;;  %893 = vmatpush3.bf16.msra.mxu1 %v949_v49 }
  0x52   : > { %611 = vmatmul.mubr.bf16.vlgmr.msra.gmra.mrb[0].mxu0 %v950_v50  ;;  %619 = vmatmul.mubr.bf16.vlgmr.msra.gmra.mrb[0].mxu1 %v953_v51 }
 0x125   : > { %v866_v52 = vpop.f32.mrb[0].mxu0  ;;  %v872_v53 = vpop.f32.mrb[0].mxu1 }
 0x126   : > { %v867_v54 = vpop.f32.mrb[1].mxu0  ;;  %v873_v56 = vpop.f32.mrb[1].mxu1 }
 0x127   : > { %v868_v57 = vadd.f32 %v867_v54, %v866_v52  ;;  %v874_v58 = vadd.f32 %v873_v56, %v872_v53  ;;  %v869_v59 = vpop.f32.mrb[2].mxu0  ;;  %v875_v60 = vpop.f32.mrb[2].mxu1  ;;  %663 = sbr.rel (!%p1051_p6) target bundleno = 310 (0x136), region = 85 }
 0x128   : > { %v870_v61 = vpop.f32.mrb[3].mxu0  ;;  %v876_v62 = vpop.f32.mrb[3].mxu1 }
 0x129   : > { %v649_v63 = vadd.f32 %v868_v57, %v845_v55  ;;  %v651_v0 = vadd.f32 %v874_v58, %v845_v55  ;;  %v871_v1 = vadd.f32 %v870_v61, %v869_v59  ;;  %v877_v2 = vadd.f32 %v876_v62, %v875_v60 }
 0x12b   : > { %653 = vst [vmem:[%s395_s27] sm:$0xff] %v649_v63  ;;  %655 = vst [vmem:[%s395_s27 + $0x10] sm:$0xff] %v651_v0  ;;  %v650_v3 = vadd.f32 %v871_v1, %v845_v55  ;;  %v652_v4 = vadd.f32 %v877_v2, %v845_v55 }
 0x12d   : > { %654 = vst [vmem:[%s395_s27 + $0x8] sm:$0xff] %v650_v3  ;;  %656 = vst [vmem:[%s395_s27 + $0x18] sm:$0xff] %v652_v4 }
 0x132   : > { %v702_v5 = vld [vmem:[%s395_s27] sm:$0xff]  ;;  %v706_v7 = vld [vmem:[%s395_s27 + $0x10] sm:$0xff] }
 0x133   : > { %703 = vst [vmem:[%s668_s30] sm:$0xff] %v702_v5  ;;  %707 = vst [vmem:[%s668_s30 + $0x50] sm:$0xff] %v706_v7 }
 0x134   : > { %v704_v6 = vld [vmem:[%s395_s27 + $0x8] sm:$0xff]  ;;  %v708_v8 = vld [vmem:[%s395_s27 + $0x18] sm:$0xff] }
 0x135   : > { %705 = vst [vmem:[%s668_s30 + $0x28] sm:$0xff] %v704_v6  ;;  %709 = vst [vmem:[%s668_s30 + $0x78] sm:$0xff] %v708_v8 }
 0x136 PF: > { %s13_s16 = sadd.s32 1, %s994_s16   ;;  %s1200_s12 = smov %s982_s13 }
 0x137   : > { %p10_p12 = scmp.ge.s32.totalorder %s13_s16, 7   ;;  %s1201_s13 = smov %s1056_s22 }
 0x138   : > { %s1202_s14 = smov %s990_s15  ;;  %s1203_s15 = smov %s1205_s17 }
 0x139   :  { %12 = sbr.rel (!%p10_p12) target bundleno = 3 (0x3), region = 160 }

</bundles_post_ra>
